<compile_context>
chip_gen: v7x
topology: tpu7x:2x2x1
jax: 0.10.0
libtpu: 0.0.40
codegen_flags: <defaults>
</compile_context>

<pallas_src>
import jax
import jax.numpy as jnp
from jax import lax
from jax.experimental import pallas as pl
from jax.experimental.pallas import tpu as pltpu


def _round_up(x, m):
    return ((x + m - 1) // m) * m


def _make_dense_kernel(cfg):
    depth = cfg["depth"]
    gr = cfg["growth_rate"]
    n_in = cfg["n_in"]
    K = cfg["ks"]
    K_pad = cfg["k_pad"]           # ks rounded up to whole tap groups (zero taps)
    G = cfg["tap_group"]
    C_total = cfg["c_total"]
    C_pad = cfg["c_pad"]           # channel rows rounded up to a multiple of 8
    L = cfg["length"]
    a0 = cfg["a0"]                 # lane offset of the valid time window in feat
    pad = K // 2
    base = a0 - pad                # lane offset read by conv tap 0
    n_blocks = depth + 1

    def kernel(*refs):
        x_ref = refs[0]
        w_refs = refs[1:1 + n_blocks]
        b_refs = refs[1 + n_blocks:1 + 2 * n_blocks]
        w1_refs = refs[1 + 2 * n_blocks:1 + 3 * n_blocks]
        w2_refs = refs[1 + 3 * n_blocks:1 + 4 * n_blocks]
        out_ref = refs[1 + 4 * n_blocks]
        scal_ref = refs[2 + 4 * n_blocks]
        feat = refs[3 + 4 * n_blocks]          # VMEM scratch (C_pad, Lp), f32

        # Reset the resident feature map: conv zero padding, not-yet-written
        # channel rows and all alignment padding read as exact zeros.
        feat[...] = jnp.zeros_like(feat)
        # Drop this batch element's input into its channel slot (the PyTorch
        # dense concat keeps the original input as the LAST channel block).
        feat[depth * gr:depth * gr + n_in, a0:a0 + L] = x_ref[0].astype(feat.dtype)

        def seconv(w_ref, b_ref, w1_ref, w2_ref, cout):
            # conv as tap-group im2col: (cout, G*C_pad) @ (G*C_pad, L) matmuls
            acc = jnp.zeros((cout, L), jnp.float32)
            for t0 in range(0, K_pad, G):
                slab = jnp.concatenate(
                    [feat[:, base + t0 + k:base + t0 + k + L].astype(jnp.bfloat16)
                     for k in range(G)],
                    axis=0)                                  # (G*C_pad, L) bf16
                acc = acc + jnp.dot(
                    w_ref[:, t0 * C_pad:(t0 + G) * C_pad], slab,
                    preferred_element_type=jnp.float32)
            y = jnp.maximum(acc + b_ref[...], 0.0)           # bias + ReLU (f32)
            # squeeze-excitation gate (f32; tiny column-vector matmuls)
            m = jnp.mean(y, axis=1, keepdims=True)           # (cout, 1)
            z = jnp.maximum(
                jnp.dot(w1_ref[...], m, preferred_element_type=jnp.float32), 0.0)
            s = jax.nn.sigmoid(
                jnp.dot(w2_ref[...], z, preferred_element_type=jnp.float32))
            return y * s                                     # (cout, L)

        # Dense layers: each writes its growth_rate channels into the slot the
        # PyTorch `torch.cat([x_forward, x], 1)` ordering assigns to it.
        for i in range(depth):
            gated = seconv(w_refs[i], b_refs[i], w1_refs[i], w2_refs[i], gr)
            feat[(depth - 1 - i) * gr:(depth - i) * gr, a0:a0 + L] = gated
            scal_ref[0, i * gr:(i + 1) * gr, :] = jnp.mean(
                gated, axis=1, keepdims=True)

        # Transition layer -> one lane-dense (C_total, L) NCL output block.
        t_out = seconv(w_refs[depth], b_refs[depth], w1_refs[depth],
                       w2_refs[depth], C_total)
        out_ref[0] = t_out.astype(out_ref.dtype)
        scal_ref[0, depth * gr:depth * gr + C_total, :] = jnp.mean(
            t_out, axis=1, keepdims=True)

    return kernel


def _dense_features_fused(params, x):
    """x: (B, n_in, L) in PyTorch NCL. Returns (out (B,C_total,L), scalars (B,S))."""
    cfg = dict(params["cfg"])
    B, n_in, L = x.shape
    assert n_in == cfg["n_in"], (n_in, cfg["n_in"])
    depth, gr = cfg["depth"], cfg["growth_rate"]
    K, K_pad = cfg["ks"], cfg["k_pad"]
    C_total, C_pad = cfg["c_total"], cfg["c_pad"]
    pad = K // 2
    a0 = _round_up(pad, 128)                             # lane-aligned interior
    lp = _round_up((a0 - pad) + (K_pad - 1) + L, 128)    # scratch lane extent
    S = depth * gr + C_total

    cfg.update(length=L, a0=a0)
    kernel = _make_dense_kernel(cfg)

    blocks = list(params["layers"]) + [params["transition"]]
    ws = [blk["w"] for blk in blocks]
    bs = [blk["b"] for blk in blocks]
    w1s = [blk["w1"] for blk in blocks]
    w2s = [blk["w2"] for blk in blocks]

    in_specs = [pl.BlockSpec((1, n_in, L), lambda b: (b, 0, 0))]
    in_specs += [pl.BlockSpec(a.shape, lambda b: (0, 0))
                 for a in ws + bs + w1s + w2s]

    out, scal = pl.pallas_call(
        kernel,
        out_shape=(jax.ShapeDtypeStruct((B, C_total, L), x.dtype),
                   jax.ShapeDtypeStruct((B, S, 1), jnp.float32)),
        grid_spec=pltpu.PrefetchScalarGridSpec(
            num_scalar_prefetch=0,
            grid=(B,),
            in_specs=in_specs,
            out_specs=(pl.BlockSpec((1, C_total, L), lambda b: (b, 0, 0)),
                       pl.BlockSpec((1, S, 1), lambda b: (b, 0, 0))),
            scratch_shapes=[pltpu.VMEM((C_pad, lp), jnp.float32)]),
        compiler_params=pltpu.CompilerParams(
            dimension_semantics=("parallel",)),
    )(x, *ws, *bs, *w1s, *w2s)
    return out, scal[:, :, 0]


def dense_features(params, x_ncl, also_scalar=False):
    """Forward pass of DenseFeatures. x_ncl: (B, n_in, L), PyTorch NCL layout."""
    out, scalars = _dense_features_fused(params, x_ncl)
    if also_scalar:
        return out, scalars
    return out


def _init_seconv(key, n_in, n_out, ks, ch_off, c_pad, k_pad):
    """PyTorch-like uniform init; conv weight pre-flattened for the fused kernel.

    The (n_out, n_in, ks) conv weight is embedded at feature-map channel offset
    `ch_off` into a zero (n_out, k_pad, c_pad) block and flattened tap-major to
    (n_out, k_pad*c_pad) so the kernel contracts taps and channels in one
    im2col matmul.  Zero rows cover channels this layer must not see.
    """
    kw, kb, k1, k2 = jax.random.split(key, 4)
    bound = 1.0 / float(n_in * ks) ** 0.5
    w = jax.random.uniform(kw, (n_out, n_in, ks), jnp.float32, -bound, bound)
    b = jax.random.uniform(kb, (n_out,), jnp.float32, -bound, bound)
    cr = max(1, n_out // 4)
    b1 = 1.0 / float(n_out) ** 0.5
    b2 = 1.0 / float(cr) ** 0.5
    w1 = jax.random.uniform(k1, (cr, n_out), jnp.float32, -b1, b1)   # SE fc1
    w2 = jax.random.uniform(k2, (n_out, cr), jnp.float32, -b2, b2)   # SE fc2
    w_full = jnp.zeros((n_out, k_pad, c_pad), jnp.float32)
    w_full = w_full.at[:, :ks, ch_off:ch_off + n_in].set(
        jnp.transpose(w, (0, 2, 1)))                  # tap-major, channel-minor
    return dict(
        w=w_full.reshape(n_out, k_pad * c_pad).astype(jnp.bfloat16),  # MXU bf16
        b=b.reshape(n_out, 1),
        w1=w1,
        w2=w2,
        w_raw=w,                   # kept only for the pure-JAX reference check
    )


def init_dense_features(key, n_in, depth=5, growth_rate=8, ks=255, tap_group=8):
    assert ks % 2 == 1, "ks must be odd for exact 'same' padding"
    c_total = n_in + depth * growth_rate
    c_pad = _round_up(c_total, 8)        # sublane-aligned channel rows
    k_pad = _round_up(ks, tap_group)     # whole tap groups (extra taps are zero)
    keys = jax.random.split(key, depth + 1)
    layers = []
    for i in range(depth):
        cin = n_in + i * growth_rate
        ch_off = (depth - i) * growth_rate   # feat slot of this layer's input
        layers.append(_init_seconv(keys[i], cin, growth_rate, ks,
                                   ch_off, c_pad, k_pad))
    transition = _init_seconv(keys[depth], c_total, c_total, ks, 0, c_pad, k_pad)
    cfg = dict(n_in=n_in, depth=depth, growth_rate=growth_rate, ks=ks,
               k_pad=k_pad, c_total=c_total, c_pad=c_pad, tap_group=tap_group)
    return dict(layers=layers, transition=transition, cfg=cfg)


# ----------------------------- pure-JAX reference ---------------------------
def _seconv_ref(blk, x):
    """Reference SEConv on NCL input (conv weights bf16-rounded like the MXU path)."""
    w = blk["w_raw"].astype(jnp.bfloat16).astype(jnp.float32)
    b = blk["b"][:, 0]
    pad = w.shape[2] // 2
    y = lax.conv_general_dilated(
        x, w, window_strides=(1,), padding=[(pad, pad)],
        dimension_numbers=("NCH", "OIH", "NCH"),
        precision=lax.Precision.HIGHEST)
    y = jnp.maximum(y + b[None, :, None], 0.0)
    m = jnp.mean(y, axis=2)                                     # (B, Cout)
    z = jnp.maximum(m @ blk["w1"].T, 0.0)
    s = jax.nn.sigmoid(z @ blk["w2"].T)
    return y * s[:, :, None]


def dense_features_ref(params, x):
    scalars = []
    for blk in params["layers"]:
        x_fwd = _seconv_ref(blk, x)
        x = jnp.concatenate([x_fwd, x], axis=1)
        scalars.append(jnp.mean(x_fwd, axis=2))
    transited = _seconv_ref(params["transition"], x)
    scalars.append(jnp.mean(transited, axis=2))
    return transited, jnp.concatenate(scalars, axis=1)


if __name__ == "__main__":
    key = jax.random.PRNGKey(0)
    k_param, k_x = jax.random.split(key)

    # Small shapes consistent with the module (odd ks, NCL input).
    n_in, depth, growth_rate, ks = 4, 3, 8, 15
    B, L = 2, 128

    params = init_dense_features(k_param, n_in, depth=depth,
                                 growth_rate=growth_rate, ks=ks)
    x = jax.random.normal(k_x, (B, n_in, L), jnp.float32)

    out, scalars = dense_features(params, x, also_scalar=True)
    out = jax.block_until_ready(out)

    c_total = n_in + depth * growth_rate
    assert out.shape == (B, c_total, L), out.shape
    assert scalars.shape == (B, depth * growth_rate + c_total), scalars.shape
    assert out.dtype == jnp.float32

    # Correctness vs. a pure-JAX/XLA reference (loose tol for the bf16 MXU path).
    ref_out, ref_scal = dense_features_ref(params, x)
    assert jnp.allclose(out, ref_out, rtol=5e-2, atol=5e-2), (
        float(jnp.max(jnp.abs(out - ref_out))))
    assert jnp.allclose(scalars, ref_scal, rtol=5e-2, atol=5e-2), (
        float(jnp.max(jnp.abs(scalars - ref_scal))))

    print("KERNEL_OK")
</pallas_src>

<mosaic_0001>
module attributes {stable_mosaic.version = 11 : i64} {
  func.func @kernel(%arg0: i32, %arg1: memref<1x4x128xf32, #tpu.memory_space<vmem>>, %arg2: memref<8x512xbf16, #tpu.memory_space<vmem>>, %arg3: memref<8x512xbf16, #tpu.memory_space<vmem>>, %arg4: memref<8x512xbf16, #tpu.memory_space<vmem>>, %arg5: memref<28x512xbf16, #tpu.memory_space<vmem>>, %arg6: memref<8x1xf32, #tpu.memory_space<vmem>>, %arg7: memref<8x1xf32, #tpu.memory_space<vmem>>, %arg8: memref<8x1xf32, #tpu.memory_space<vmem>>, %arg9: memref<28x1xf32, #tpu.memory_space<vmem>>, %arg10: memref<2x8xf32, #tpu.memory_space<vmem>>, %arg11: memref<2x8xf32, #tpu.memory_space<vmem>>, %arg12: memref<2x8xf32, #tpu.memory_space<vmem>>, %arg13: memref<7x28xf32, #tpu.memory_space<vmem>>, %arg14: memref<8x2xf32, #tpu.memory_space<vmem>>, %arg15: memref<8x2xf32, #tpu.memory_space<vmem>>, %arg16: memref<8x2xf32, #tpu.memory_space<vmem>>, %arg17: memref<28x7xf32, #tpu.memory_space<vmem>>, %arg18: memref<1x28x128xf32, #tpu.memory_space<vmem>>, %arg19: memref<1x52x1xf32, #tpu.memory_space<vmem>>, %arg20: memref<32x384xf32, #tpu.memory_space<vmem>>) attributes {dimension_semantics = [#tpu.dimension_semantics<parallel>], iteration_bounds = array<i64: 2>, scalar_prefetch = 0 : i64, scratch_operands = 1 : i64, tpu.core_type = #tpu.core_type<tc>, window_params = [{transform_indices = @transform_0, window_bounds = array<i64: 1, 4, 128>}, {pipeline_mode = #tpu.pipeline_mode<synchronous>, transform_indices = @transform_1, window_bounds = array<i64: 8, 512>}, {pipeline_mode = #tpu.pipeline_mode<synchronous>, transform_indices = @transform_2, window_bounds = array<i64: 8, 512>}, {pipeline_mode = #tpu.pipeline_mode<synchronous>, transform_indices = @transform_3, window_bounds = array<i64: 8, 512>}, {pipeline_mode = #tpu.pipeline_mode<synchronous>, transform_indices = @transform_4, window_bounds = array<i64: 28, 512>}, {pipeline_mode = #tpu.pipeline_mode<synchronous>, transform_indices = @transform_5, window_bounds = array<i64: 8, 1>}, {pipeline_mode = #tpu.pipeline_mode<synchronous>, transform_indices = @transform_6, window_bounds = array<i64: 8, 1>}, {pipeline_mode = #tpu.pipeline_mode<synchronous>, transform_indices = @transform_7, window_bounds = array<i64: 8, 1>}, {pipeline_mode = #tpu.pipeline_mode<synchronous>, transform_indices = @transform_8, window_bounds = array<i64: 28, 1>}, {pipeline_mode = #tpu.pipeline_mode<synchronous>, transform_indices = @transform_9, window_bounds = array<i64: 2, 8>}, {pipeline_mode = #tpu.pipeline_mode<synchronous>, transform_indices = @transform_10, window_bounds = array<i64: 2, 8>}, {pipeline_mode = #tpu.pipeline_mode<synchronous>, transform_indices = @transform_11, window_bounds = array<i64: 2, 8>}, {pipeline_mode = #tpu.pipeline_mode<synchronous>, transform_indices = @transform_12, window_bounds = array<i64: 7, 28>}, {pipeline_mode = #tpu.pipeline_mode<synchronous>, transform_indices = @transform_13, window_bounds = array<i64: 8, 2>}, {pipeline_mode = #tpu.pipeline_mode<synchronous>, transform_indices = @transform_14, window_bounds = array<i64: 8, 2>}, {pipeline_mode = #tpu.pipeline_mode<synchronous>, transform_indices = @transform_15, window_bounds = array<i64: 8, 2>}, {pipeline_mode = #tpu.pipeline_mode<synchronous>, transform_indices = @transform_16, window_bounds = array<i64: 28, 7>}, {transform_indices = @transform_17, window_bounds = array<i64: 1, 28, 128>}, {transform_indices = @transform_18, window_bounds = array<i64: 1, 52, 1>}]} {
    %cst = arith.constant 0.000000e+00 : f32
    %0 = vector.broadcast %cst : f32 to vector<32x384xf32>
    %c0 = arith.constant 0 : index
    %c0_0 = arith.constant 0 : index
    %1 = vector.load %arg20[%c0, %c0_0] : memref<32x384xf32, #tpu.memory_space<vmem>>, vector<32x384xf32>
    tpu.vector_store %arg20[%c0, %c0_0], %0 {strides = array<i32>} : memref<32x384xf32, #tpu.memory_space<vmem>>, vector<32x384xf32>,
    %c0_1 = arith.constant 0 : index
    %c0_2 = arith.constant 0 : index
    %c0_3 = arith.constant 0 : index
    %2 = vector.load %arg1[%c0_1, %c0_2, %c0_3] : memref<1x4x128xf32, #tpu.memory_space<vmem>>, vector<1x4x128xf32>
    %3 = vector.shape_cast %2 : vector<1x4x128xf32> to vector<4x128xf32>
    %c24 = arith.constant 24 : index
    %c128 = arith.constant 128 : index
    %4 = vector.load %arg20[%c24, %c128] : memref<32x384xf32, #tpu.memory_space<vmem>>, vector<4x128xf32>
    tpu.vector_store %arg20[%c24, %c128], %3 {strides = array<i32>} : memref<32x384xf32, #tpu.memory_space<vmem>>, vector<4x128xf32>,
    %cst_4 = arith.constant 0.000000e+00 : f32
    %5 = vector.broadcast %cst_4 : f32 to vector<8x128xf32>
    %c0_5 = arith.constant 0 : index
    %c121 = arith.constant 121 : index
    %6 = vector.load %arg20[%c0_5, %c121] : memref<32x384xf32, #tpu.memory_space<vmem>>, vector<32x128xf32>
    %7 = arith.truncf %6 : vector<32x128xf32> to vector<32x128xbf16>
    %c0_6 = arith.constant 0 : index
    %c122 = arith.constant 122 : index
    %8 = vector.load %arg20[%c0_6, %c122] : memref<32x384xf32, #tpu.memory_space<vmem>>, vector<32x128xf32>
    %9 = arith.truncf %8 : vector<32x128xf32> to vector<32x128xbf16>
    %c0_7 = arith.constant 0 : index
    %c123 = arith.constant 123 : index
    %10 = vector.load %arg20[%c0_7, %c123] : memref<32x384xf32, #tpu.memory_space<vmem>>, vector<32x128xf32>
    %11 = arith.truncf %10 : vector<32x128xf32> to vector<32x128xbf16>
    %c0_8 = arith.constant 0 : index
    %c124 = arith.constant 124 : index
    %12 = vector.load %arg20[%c0_8, %c124] : memref<32x384xf32, #tpu.memory_space<vmem>>, vector<32x128xf32>
    %13 = arith.truncf %12 : vector<32x128xf32> to vector<32x128xbf16>
    %c0_9 = arith.constant 0 : index
    %c125 = arith.constant 125 : index
    %14 = vector.load %arg20[%c0_9, %c125] : memref<32x384xf32, #tpu.memory_space<vmem>>, vector<32x128xf32>
    %15 = arith.truncf %14 : vector<32x128xf32> to vector<32x128xbf16>
    %c0_10 = arith.constant 0 : index
    %c126 = arith.constant 126 : index
    %16 = vector.load %arg20[%c0_10, %c126] : memref<32x384xf32, #tpu.memory_space<vmem>>, vector<32x128xf32>
    %17 = arith.truncf %16 : vector<32x128xf32> to vector<32x128xbf16>
    %c0_11 = arith.constant 0 : index
    %c127 = arith.constant 127 : index
    %18 = vector.load %arg20[%c0_11, %c127] : memref<32x384xf32, #tpu.memory_space<vmem>>, vector<32x128xf32>
    %19 = arith.truncf %18 : vector<32x128xf32> to vector<32x128xbf16>
    %c0_12 = arith.constant 0 : index
    %c128_13 = arith.constant 128 : index
    %20 = vector.load %arg20[%c0_12, %c128_13] : memref<32x384xf32, #tpu.memory_space<vmem>>, vector<32x128xf32>
    %21 = arith.truncf %20 : vector<32x128xf32> to vector<32x128xbf16>
    %22 = tpu.concatenate %7, %9, %11, %13, %15, %17, %19, %21 in 0 : vector<32x128xbf16>, vector<32x128xbf16>, vector<32x128xbf16>, vector<32x128xbf16>, vector<32x128xbf16>, vector<32x128xbf16>, vector<32x128xbf16>, vector<32x128xbf16> -> vector<256x128xbf16>
    %c0_14 = arith.constant 0 : index
    %c0_15 = arith.constant 0 : index
    %23 = vector.load %arg2[%c0_14, %c0_15] : memref<8x512xbf16, #tpu.memory_space<vmem>>, vector<8x256xbf16>
    %cst_16 = arith.constant dense<0.000000e+00> : vector<8x128xf32>
    %24 = tpu.matmul %23, %22, %cst_16 {dimension_numbers = #tpu.dot_dimension_numbers<[1], [0], [0], [1], [0, 0, 1, 1], [], []>} : vector<8x256xbf16>, vector<256x128xbf16>, vector<8x128xf32> -> vector<8x128xf32>
    %25 = arith.addf %5, %24 : vector<8x128xf32>
    %c0_17 = arith.constant 0 : index
    %c129 = arith.constant 129 : index
    %26 = vector.load %arg20[%c0_17, %c129] : memref<32x384xf32, #tpu.memory_space<vmem>>, vector<32x128xf32>
    %27 = arith.truncf %26 : vector<32x128xf32> to vector<32x128xbf16>
    %c0_18 = arith.constant 0 : index
    %c130 = arith.constant 130 : index
    %28 = vector.load %arg20[%c0_18, %c130] : memref<32x384xf32, #tpu.memory_space<vmem>>, vector<32x128xf32>
    %29 = arith.truncf %28 : vector<32x128xf32> to vector<32x128xbf16>
    %c0_19 = arith.constant 0 : index
    %c131 = arith.constant 131 : index
    %30 = vector.load %arg20[%c0_19, %c131] : memref<32x384xf32, #tpu.memory_space<vmem>>, vector<32x128xf32>
    %31 = arith.truncf %30 : vector<32x128xf32> to vector<32x128xbf16>
    %c0_20 = arith.constant 0 : index
    %c132 = arith.constant 132 : index
    %32 = vector.load %arg20[%c0_20, %c132] : memref<32x384xf32, #tpu.memory_space<vmem>>, vector<32x128xf32>
    %33 = arith.truncf %32 : vector<32x128xf32> to vector<32x128xbf16>
    %c0_21 = arith.constant 0 : index
    %c133 = arith.constant 133 : index
    %34 = vector.load %arg20[%c0_21, %c133] : memref<32x384xf32, #tpu.memory_space<vmem>>, vector<32x128xf32>
    %35 = arith.truncf %34 : vector<32x128xf32> to vector<32x128xbf16>
    %c0_22 = arith.constant 0 : index
    %c134 = arith.constant 134 : index
    %36 = vector.load %arg20[%c0_22, %c134] : memref<32x384xf32, #tpu.memory_space<vmem>>, vector<32x128xf32>
    %37 = arith.truncf %36 : vector<32x128xf32> to vector<32x128xbf16>
    %c0_23 = arith.constant 0 : index
    %c135 = arith.constant 135 : index
    %38 = vector.load %arg20[%c0_23, %c135] : memref<32x384xf32, #tpu.memory_space<vmem>>, vector<32x128xf32>
    %39 = arith.truncf %38 : vector<32x128xf32> to vector<32x128xbf16>
    %c0_24 = arith.constant 0 : index
    %c136 = arith.constant 136 : index
    %40 = vector.load %arg20[%c0_24, %c136] : memref<32x384xf32, #tpu.memory_space<vmem>>, vector<32x128xf32>
    %41 = arith.truncf %40 : vector<32x128xf32> to vector<32x128xbf16>
    %42 = tpu.concatenate %27, %29, %31, %33, %35, %37, %39, %41 in 0 : vector<32x128xbf16>, vector<32x128xbf16>, vector<32x128xbf16>, vector<32x128xbf16>, vector<32x128xbf16>, vector<32x128xbf16>, vector<32x128xbf16>, vector<32x128xbf16> -> vector<256x128xbf16>
    %c0_25 = arith.constant 0 : index
    %c256 = arith.constant 256 : index
    %43 = vector.load %arg2[%c0_25, %c256] : memref<8x512xbf16, #tpu.memory_space<vmem>>, vector<8x256xbf16>
    %cst_26 = arith.constant dense<0.000000e+00> : vector<8x128xf32>
    %44 = tpu.matmul %43, %42, %cst_26 {dimension_numbers = #tpu.dot_dimension_numbers<[1], [0], [0], [1], [0, 0, 1, 1], [], []>} : vector<8x256xbf16>, vector<256x128xbf16>, vector<8x128xf32> -> vector<8x128xf32>
    %45 = arith.addf %25, %44 : vector<8x128xf32>
    %c0_27 = arith.constant 0 : index
    %c0_28 = arith.constant 0 : index
    %46 = vector.load %arg6[%c0_27, %c0_28] : memref<8x1xf32, #tpu.memory_space<vmem>>, vector<8x1xf32>
    %47 = vector.broadcast %46 : vector<8x1xf32> to vector<8x128xf32>
    %48 = arith.addf %45, %47 : vector<8x128xf32>
    %cst_29 = arith.constant 0.000000e+00 : f32
    %49 = vector.broadcast %cst_29 : f32 to vector<8x128xf32>
    %50 = arith.maximumf %48, %49 : vector<8x128xf32>
    %cst_30 = arith.constant dense<0.000000e+00> : vector<8xf32>
    %51 = vector.multi_reduction <add>, %50, %cst_30 [1] : vector<8x128xf32> to vector<8xf32>
    %52 = vector.shape_cast %51 : vector<8xf32> to vector<8x1xf32>
    %cst_31 = arith.constant 1.280000e+02 : f32
    %53 = vector.broadcast %cst_31 : f32 to vector<8x1xf32>
    %54 = arith.divf %52, %53 : vector<8x1xf32>
    %c0_32 = arith.constant 0 : index
    %c0_33 = arith.constant 0 : index
    %55 = vector.load %arg10[%c0_32, %c0_33] : memref<2x8xf32, #tpu.memory_space<vmem>>, vector<2x8xf32>
    %cst_34 = arith.constant dense<0.000000e+00> : vector<2x1xf32>
    %56 = tpu.matmul %55, %54, %cst_34 {dimension_numbers = #tpu.dot_dimension_numbers<[1], [0], [0], [1], [0, 0, 1, 1], [], []>} : vector<2x8xf32>, vector<8x1xf32>, vector<2x1xf32> -> vector<2x1xf32>
    %cst_35 = arith.constant 0.000000e+00 : f32
    %57 = vector.broadcast %cst_35 : f32 to vector<2x1xf32>
    %58 = arith.maximumf %56, %57 : vector<2x1xf32>
    %c0_36 = arith.constant 0 : index
    %c0_37 = arith.constant 0 : index
    %59 = vector.load %arg14[%c0_36, %c0_37] : memref<8x2xf32, #tpu.memory_space<vmem>>, vector<8x2xf32>
    %cst_38 = arith.constant dense<0.000000e+00> : vector<8x1xf32>
    %60 = tpu.matmul %59, %58, %cst_38 {dimension_numbers = #tpu.dot_dimension_numbers<[1], [0], [0], [1], [0, 0, 1, 1], [], []>} : vector<8x2xf32>, vector<2x1xf32>, vector<8x1xf32> -> vector<8x1xf32>
    %61 = arith.negf %60 : vector<8x1xf32>
    %62 = math.exp %61 : vector<8x1xf32>
    %cst_39 = arith.constant 1.000000e+00 : f32
    %63 = vector.broadcast %cst_39 : f32 to vector<8x1xf32>
    %64 = arith.addf %63, %62 : vector<8x1xf32>
    %65 = arith.divf %63, %64 : vector<8x1xf32>
    %66 = vector.broadcast %65 : vector<8x1xf32> to vector<8x128xf32>
    %67 = arith.mulf %50, %66 : vector<8x128xf32>
    %c16 = arith.constant 16 : index
    %c128_40 = arith.constant 128 : index
    %68 = vector.load %arg20[%c16, %c128_40] : memref<32x384xf32, #tpu.memory_space<vmem>>, vector<8x128xf32>
    tpu.vector_store %arg20[%c16, %c128_40], %67 {strides = array<i32>} : memref<32x384xf32, #tpu.memory_space<vmem>>, vector<8x128xf32>,
    %cst_41 = arith.constant dense<0.000000e+00> : vector<8xf32>
    %69 = vector.multi_reduction <add>, %67, %cst_41 [1] : vector<8x128xf32> to vector<8xf32>
    %70 = vector.shape_cast %69 : vector<8xf32> to vector<8x1xf32>
    %cst_42 = arith.constant 1.280000e+02 : f32
    %71 = vector.broadcast %cst_42 : f32 to vector<8x1xf32>
    %72 = arith.divf %70, %71 : vector<8x1xf32>
    %c0_43 = arith.constant 0 : index
    %c0_44 = arith.constant 0 : index
    %c0_45 = arith.constant 0 : index
    %73 = vector.load %arg19[%c0_43, %c0_44, %c0_45] : memref<1x52x1xf32, #tpu.memory_space<vmem>>, vector<1x8x1xf32>
    %74 = vector.shape_cast %73 : vector<1x8x1xf32> to vector<8x1xf32>
    %75 = vector.shape_cast %72 : vector<8x1xf32> to vector<1x8x1xf32>
    tpu.vector_store %arg19[%c0_43, %c0_44, %c0_45], %75 {strides = array<i32>} : memref<1x52x1xf32, #tpu.memory_space<vmem>>, vector<1x8x1xf32>,
    %cst_46 = arith.constant 0.000000e+00 : f32
    %76 = vector.broadcast %cst_46 : f32 to vector<8x128xf32>
    %c0_47 = arith.constant 0 : index
    %c121_48 = arith.constant 121 : index
    %77 = vector.load %arg20[%c0_47, %c121_48] : memref<32x384xf32, #tpu.memory_space<vmem>>, vector<32x128xf32>
    %78 = arith.truncf %77 : vector<32x128xf32> to vector<32x128xbf16>
    %c0_49 = arith.constant 0 : index
    %c122_50 = arith.constant 122 : index
    %79 = vector.load %arg20[%c0_49, %c122_50] : memref<32x384xf32, #tpu.memory_space<vmem>>, vector<32x128xf32>
    %80 = arith.truncf %79 : vector<32x128xf32> to vector<32x128xbf16>
    %c0_51 = arith.constant 0 : index
    %c123_52 = arith.constant 123 : index
    %81 = vector.load %arg20[%c0_51, %c123_52] : memref<32x384xf32, #tpu.memory_space<vmem>>, vector<32x128xf32>
    %82 = arith.truncf %81 : vector<32x128xf32> to vector<32x128xbf16>
    %c0_53 = arith.constant 0 : index
    %c124_54 = arith.constant 124 : index
    %83 = vector.load %arg20[%c0_53, %c124_54] : memref<32x384xf32, #tpu.memory_space<vmem>>, vector<32x128xf32>
    %84 = arith.truncf %83 : vector<32x128xf32> to vector<32x128xbf16>
    %c0_55 = arith.constant 0 : index
    %c125_56 = arith.constant 125 : index
    %85 = vector.load %arg20[%c0_55, %c125_56] : memref<32x384xf32, #tpu.memory_space<vmem>>, vector<32x128xf32>
    %86 = arith.truncf %85 : vector<32x128xf32> to vector<32x128xbf16>
    %c0_57 = arith.constant 0 : index
    %c126_58 = arith.constant 126 : index
    %87 = vector.load %arg20[%c0_57, %c126_58] : memref<32x384xf32, #tpu.memory_space<vmem>>, vector<32x128xf32>
    %88 = arith.truncf %87 : vector<32x128xf32> to vector<32x128xbf16>
    %c0_59 = arith.constant 0 : index
    %c127_60 = arith.constant 127 : index
    %89 = vector.load %arg20[%c0_59, %c127_60] : memref<32x384xf32, #tpu.memory_space<vmem>>, vector<32x128xf32>
    %90 = arith.truncf %89 : vector<32x128xf32> to vector<32x128xbf16>
    %c0_61 = arith.constant 0 : index
    %c128_62 = arith.constant 128 : index
    %91 = vector.load %arg20[%c0_61, %c128_62] : memref<32x384xf32, #tpu.memory_space<vmem>>, vector<32x128xf32>
    %92 = arith.truncf %91 : vector<32x128xf32> to vector<32x128xbf16>
    %93 = tpu.concatenate %78, %80, %82, %84, %86, %88, %90, %92 in 0 : vector<32x128xbf16>, vector<32x128xbf16>, vector<32x128xbf16>, vector<32x128xbf16>, vector<32x128xbf16>, vector<32x128xbf16>, vector<32x128xbf16>, vector<32x128xbf16> -> vector<256x128xbf16>
    %c0_63 = arith.constant 0 : index
    %c0_64 = arith.constant 0 : index
    %94 = vector.load %arg3[%c0_63, %c0_64] : memref<8x512xbf16, #tpu.memory_space<vmem>>, vector<8x256xbf16>
    %cst_65 = arith.constant dense<0.000000e+00> : vector<8x128xf32>
    %95 = tpu.matmul %94, %93, %cst_65 {dimension_numbers = #tpu.dot_dimension_numbers<[1], [0], [0], [1], [0, 0, 1, 1], [], []>} : vector<8x256xbf16>, vector<256x128xbf16>, vector<8x128xf32> -> vector<8x128xf32>
    %96 = arith.addf %76, %95 : vector<8x128xf32>
    %c0_66 = arith.constant 0 : index
    %c129_67 = arith.constant 129 : index
    %97 = vector.load %arg20[%c0_66, %c129_67] : memref<32x384xf32, #tpu.memory_space<vmem>>, vector<32x128xf32>
    %98 = arith.truncf %97 : vector<32x128xf32> to vector<32x128xbf16>
    %c0_68 = arith.constant 0 : index
    %c130_69 = arith.constant 130 : index
    %99 = vector.load %arg20[%c0_68, %c130_69] : memref<32x384xf32, #tpu.memory_space<vmem>>, vector<32x128xf32>
    %100 = arith.truncf %99 : vector<32x128xf32> to vector<32x128xbf16>
    %c0_70 = arith.constant 0 : index
    %c131_71 = arith.constant 131 : index
    %101 = vector.load %arg20[%c0_70, %c131_71] : memref<32x384xf32, #tpu.memory_space<vmem>>, vector<32x128xf32>
    %102 = arith.truncf %101 : vector<32x128xf32> to vector<32x128xbf16>
    %c0_72 = arith.constant 0 : index
    %c132_73 = arith.constant 132 : index
    %103 = vector.load %arg20[%c0_72, %c132_73] : memref<32x384xf32, #tpu.memory_space<vmem>>, vector<32x128xf32>
    %104 = arith.truncf %103 : vector<32x128xf32> to vector<32x128xbf16>
    %c0_74 = arith.constant 0 : index
    %c133_75 = arith.constant 133 : index
    %105 = vector.load %arg20[%c0_74, %c133_75] : memref<32x384xf32, #tpu.memory_space<vmem>>, vector<32x128xf32>
    %106 = arith.truncf %105 : vector<32x128xf32> to vector<32x128xbf16>
    %c0_76 = arith.constant 0 : index
    %c134_77 = arith.constant 134 : index
    %107 = vector.load %arg20[%c0_76, %c134_77] : memref<32x384xf32, #tpu.memory_space<vmem>>, vector<32x128xf32>
    %108 = arith.truncf %107 : vector<32x128xf32> to vector<32x128xbf16>
    %c0_78 = arith.constant 0 : index
    %c135_79 = arith.constant 135 : index
    %109 = vector.load %arg20[%c0_78, %c135_79] : memref<32x384xf32, #tpu.memory_space<vmem>>, vector<32x128xf32>
    %110 = arith.truncf %109 : vector<32x128xf32> to vector<32x128xbf16>
    %c0_80 = arith.constant 0 : index
    %c136_81 = arith.constant 136 : index
    %111 = vector.load %arg20[%c0_80, %c136_81] : memref<32x384xf32, #tpu.memory_space<vmem>>, vector<32x128xf32>
    %112 = arith.truncf %111 : vector<32x128xf32> to vector<32x128xbf16>
    %113 = tpu.concatenate %98, %100, %102, %104, %106, %108, %110, %112 in 0 : vector<32x128xbf16>, vector<32x128xbf16>, vector<32x128xbf16>, vector<32x128xbf16>, vector<32x128xbf16>, vector<32x128xbf16>, vector<32x128xbf16>, vector<32x128xbf16> -> vector<256x128xbf16>
    %c0_82 = arith.constant 0 : index
    %c256_83 = arith.constant 256 : index
    %114 = vector.load %arg3[%c0_82, %c256_83] : memref<8x512xbf16, #tpu.memory_space<vmem>>, vector<8x256xbf16>
    %cst_84 = arith.constant dense<0.000000e+00> : vector<8x128xf32>
    %115 = tpu.matmul %114, %113, %cst_84 {dimension_numbers = #tpu.dot_dimension_numbers<[1], [0], [0], [1], [0, 0, 1, 1], [], []>} : vector<8x256xbf16>, vector<256x128xbf16>, vector<8x128xf32> -> vector<8x128xf32>
    %116 = arith.addf %96, %115 : vector<8x128xf32>
    %c0_85 = arith.constant 0 : index
    %c0_86 = arith.constant 0 : index
    %117 = vector.load %arg7[%c0_85, %c0_86] : memref<8x1xf32, #tpu.memory_space<vmem>>, vector<8x1xf32>
    %118 = vector.broadcast %117 : vector<8x1xf32> to vector<8x128xf32>
    %119 = arith.addf %116, %118 : vector<8x128xf32>
    %cst_87 = arith.constant 0.000000e+00 : f32
    %120 = vector.broadcast %cst_87 : f32 to vector<8x128xf32>
    %121 = arith.maximumf %119, %120 : vector<8x128xf32>
    %cst_88 = arith.constant dense<0.000000e+00> : vector<8xf32>
    %122 = vector.multi_reduction <add>, %121, %cst_88 [1] : vector<8x128xf32> to vector<8xf32>
    %123 = vector.shape_cast %122 : vector<8xf32> to vector<8x1xf32>
    %cst_89 = arith.constant 1.280000e+02 : f32
    %124 = vector.broadcast %cst_89 : f32 to vector<8x1xf32>
    %125 = arith.divf %123, %124 : vector<8x1xf32>
    %c0_90 = arith.constant 0 : index
    %c0_91 = arith.constant 0 : index
    %126 = vector.load %arg11[%c0_90, %c0_91] : memref<2x8xf32, #tpu.memory_space<vmem>>, vector<2x8xf32>
    %cst_92 = arith.constant dense<0.000000e+00> : vector<2x1xf32>
    %127 = tpu.matmul %126, %125, %cst_92 {dimension_numbers = #tpu.dot_dimension_numbers<[1], [0], [0], [1], [0, 0, 1, 1], [], []>} : vector<2x8xf32>, vector<8x1xf32>, vector<2x1xf32> -> vector<2x1xf32>
    %cst_93 = arith.constant 0.000000e+00 : f32
    %128 = vector.broadcast %cst_93 : f32 to vector<2x1xf32>
    %129 = arith.maximumf %127, %128 : vector<2x1xf32>
    %c0_94 = arith.constant 0 : index
    %c0_95 = arith.constant 0 : index
    %130 = vector.load %arg15[%c0_94, %c0_95] : memref<8x2xf32, #tpu.memory_space<vmem>>, vector<8x2xf32>
    %cst_96 = arith.constant dense<0.000000e+00> : vector<8x1xf32>
    %131 = tpu.matmul %130, %129, %cst_96 {dimension_numbers = #tpu.dot_dimension_numbers<[1], [0], [0], [1], [0, 0, 1, 1], [], []>} : vector<8x2xf32>, vector<2x1xf32>, vector<8x1xf32> -> vector<8x1xf32>
    %132 = arith.negf %131 : vector<8x1xf32>
    %133 = math.exp %132 : vector<8x1xf32>
    %cst_97 = arith.constant 1.000000e+00 : f32
    %134 = vector.broadcast %cst_97 : f32 to vector<8x1xf32>
    %135 = arith.addf %134, %133 : vector<8x1xf32>
    %136 = arith.divf %134, %135 : vector<8x1xf32>
    %137 = vector.broadcast %136 : vector<8x1xf32> to vector<8x128xf32>
    %138 = arith.mulf %121, %137 : vector<8x128xf32>
    %c8 = arith.constant 8 : index
    %c128_98 = arith.constant 128 : index
    %139 = vector.load %arg20[%c8, %c128_98] : memref<32x384xf32, #tpu.memory_space<vmem>>, vector<8x128xf32>
    tpu.vector_store %arg20[%c8, %c128_98], %138 {strides = array<i32>} : memref<32x384xf32, #tpu.memory_space<vmem>>, vector<8x128xf32>,
    %cst_99 = arith.constant dense<0.000000e+00> : vector<8xf32>
    %140 = vector.multi_reduction <add>, %138, %cst_99 [1] : vector<8x128xf32> to vector<8xf32>
    %141 = vector.shape_cast %140 : vector<8xf32> to vector<8x1xf32>
    %cst_100 = arith.constant 1.280000e+02 : f32
    %142 = vector.broadcast %cst_100 : f32 to vector<8x1xf32>
    %143 = arith.divf %141, %142 : vector<8x1xf32>
    %c0_101 = arith.constant 0 : index
    %c8_102 = arith.constant 8 : index
    %c0_103 = arith.constant 0 : index
    %144 = vector.load %arg19[%c0_101, %c8_102, %c0_103] : memref<1x52x1xf32, #tpu.memory_space<vmem>>, vector<1x8x1xf32>
    %145 = vector.shape_cast %144 : vector<1x8x1xf32> to vector<8x1xf32>
    %146 = vector.shape_cast %143 : vector<8x1xf32> to vector<1x8x1xf32>
    tpu.vector_store %arg19[%c0_101, %c8_102, %c0_103], %146 {strides = array<i32>} : memref<1x52x1xf32, #tpu.memory_space<vmem>>, vector<1x8x1xf32>,
    %cst_104 = arith.constant 0.000000e+00 : f32
    %147 = vector.broadcast %cst_104 : f32 to vector<8x128xf32>
    %c0_105 = arith.constant 0 : index
    %c121_106 = arith.constant 121 : index
    %148 = vector.load %arg20[%c0_105, %c121_106] : memref<32x384xf32, #tpu.memory_space<vmem>>, vector<32x128xf32>
    %149 = arith.truncf %148 : vector<32x128xf32> to vector<32x128xbf16>
    %c0_107 = arith.constant 0 : index
    %c122_108 = arith.constant 122 : index
    %150 = vector.load %arg20[%c0_107, %c122_108] : memref<32x384xf32, #tpu.memory_space<vmem>>, vector<32x128xf32>
    %151 = arith.truncf %150 : vector<32x128xf32> to vector<32x128xbf16>
    %c0_109 = arith.constant 0 : index
    %c123_110 = arith.constant 123 : index
    %152 = vector.load %arg20[%c0_109, %c123_110] : memref<32x384xf32, #tpu.memory_space<vmem>>, vector<32x128xf32>
    %153 = arith.truncf %152 : vector<32x128xf32> to vector<32x128xbf16>
    %c0_111 = arith.constant 0 : index
    %c124_112 = arith.constant 124 : index
    %154 = vector.load %arg20[%c0_111, %c124_112] : memref<32x384xf32, #tpu.memory_space<vmem>>, vector<32x128xf32>
    %155 = arith.truncf %154 : vector<32x128xf32> to vector<32x128xbf16>
    %c0_113 = arith.constant 0 : index
    %c125_114 = arith.constant 125 : index
    %156 = vector.load %arg20[%c0_113, %c125_114] : memref<32x384xf32, #tpu.memory_space<vmem>>, vector<32x128xf32>
    %157 = arith.truncf %156 : vector<32x128xf32> to vector<32x128xbf16>
    %c0_115 = arith.constant 0 : index
    %c126_116 = arith.constant 126 : index
    %158 = vector.load %arg20[%c0_115, %c126_116] : memref<32x384xf32, #tpu.memory_space<vmem>>, vector<32x128xf32>
    %159 = arith.truncf %158 : vector<32x128xf32> to vector<32x128xbf16>
    %c0_117 = arith.constant 0 : index
    %c127_118 = arith.constant 127 : index
    %160 = vector.load %arg20[%c0_117, %c127_118] : memref<32x384xf32, #tpu.memory_space<vmem>>, vector<32x128xf32>
    %161 = arith.truncf %160 : vector<32x128xf32> to vector<32x128xbf16>
    %c0_119 = arith.constant 0 : index
    %c128_120 = arith.constant 128 : index
    %162 = vector.load %arg20[%c0_119, %c128_120] : memref<32x384xf32, #tpu.memory_space<vmem>>, vector<32x128xf32>
    %163 = arith.truncf %162 : vector<32x128xf32> to vector<32x128xbf16>
    %164 = tpu.concatenate %149, %151, %153, %155, %157, %159, %161, %163 in 0 : vector<32x128xbf16>, vector<32x128xbf16>, vector<32x128xbf16>, vector<32x128xbf16>, vector<32x128xbf16>, vector<32x128xbf16>, vector<32x128xbf16>, vector<32x128xbf16> -> vector<256x128xbf16>
    %c0_121 = arith.constant 0 : index
    %c0_122 = arith.constant 0 : index
    %165 = vector.load %arg4[%c0_121, %c0_122] : memref<8x512xbf16, #tpu.memory_space<vmem>>, vector<8x256xbf16>
    %cst_123 = arith.constant dense<0.000000e+00> : vector<8x128xf32>
    %166 = tpu.matmul %165, %164, %cst_123 {dimension_numbers = #tpu.dot_dimension_numbers<[1], [0], [0], [1], [0, 0, 1, 1], [], []>} : vector<8x256xbf16>, vector<256x128xbf16>, vector<8x128xf32> -> vector<8x128xf32>
    %167 = arith.addf %147, %166 : vector<8x128xf32>
    %c0_124 = arith.constant 0 : index
    %c129_125 = arith.constant 129 : index
    %168 = vector.load %arg20[%c0_124, %c129_125] : memref<32x384xf32, #tpu.memory_space<vmem>>, vector<32x128xf32>
    %169 = arith.truncf %168 : vector<32x128xf32> to vector<32x128xbf16>
    %c0_126 = arith.constant 0 : index
    %c130_127 = arith.constant 130 : index
    %170 = vector.load %arg20[%c0_126, %c130_127] : memref<32x384xf32, #tpu.memory_space<vmem>>, vector<32x128xf32>
    %171 = arith.truncf %170 : vector<32x128xf32> to vector<32x128xbf16>
    %c0_128 = arith.constant 0 : index
    %c131_129 = arith.constant 131 : index
    %172 = vector.load %arg20[%c0_128, %c131_129] : memref<32x384xf32, #tpu.memory_space<vmem>>, vector<32x128xf32>
    %173 = arith.truncf %172 : vector<32x128xf32> to vector<32x128xbf16>
    %c0_130 = arith.constant 0 : index
    %c132_131 = arith.constant 132 : index
    %174 = vector.load %arg20[%c0_130, %c132_131] : memref<32x384xf32, #tpu.memory_space<vmem>>, vector<32x128xf32>
    %175 = arith.truncf %174 : vector<32x128xf32> to vector<32x128xbf16>
    %c0_132 = arith.constant 0 : index
    %c133_133 = arith.constant 133 : index
    %176 = vector.load %arg20[%c0_132, %c133_133] : memref<32x384xf32, #tpu.memory_space<vmem>>, vector<32x128xf32>
    %177 = arith.truncf %176 : vector<32x128xf32> to vector<32x128xbf16>
    %c0_134 = arith.constant 0 : index
    %c134_135 = arith.constant 134 : index
    %178 = vector.load %arg20[%c0_134, %c134_135] : memref<32x384xf32, #tpu.memory_space<vmem>>, vector<32x128xf32>
    %179 = arith.truncf %178 : vector<32x128xf32> to vector<32x128xbf16>
    %c0_136 = arith.constant 0 : index
    %c135_137 = arith.constant 135 : index
    %180 = vector.load %arg20[%c0_136, %c135_137] : memref<32x384xf32, #tpu.memory_space<vmem>>, vector<32x128xf32>
    %181 = arith.truncf %180 : vector<32x128xf32> to vector<32x128xbf16>
    %c0_138 = arith.constant 0 : index
    %c136_139 = arith.constant 136 : index
    %182 = vector.load %arg20[%c0_138, %c136_139] : memref<32x384xf32, #tpu.memory_space<vmem>>, vector<32x128xf32>
    %183 = arith.truncf %182 : vector<32x128xf32> to vector<32x128xbf16>
    %184 = tpu.concatenate %169, %171, %173, %175, %177, %179, %181, %183 in 0 : vector<32x128xbf16>, vector<32x128xbf16>, vector<32x128xbf16>, vector<32x128xbf16>, vector<32x128xbf16>, vector<32x128xbf16>, vector<32x128xbf16>, vector<32x128xbf16> -> vector<256x128xbf16>
    %c0_140 = arith.constant 0 : index
    %c256_141 = arith.constant 256 : index
    %185 = vector.load %arg4[%c0_140, %c256_141] : memref<8x512xbf16, #tpu.memory_space<vmem>>, vector<8x256xbf16>
    %cst_142 = arith.constant dense<0.000000e+00> : vector<8x128xf32>
    %186 = tpu.matmul %185, %184, %cst_142 {dimension_numbers = #tpu.dot_dimension_numbers<[1], [0], [0], [1], [0, 0, 1, 1], [], []>} : vector<8x256xbf16>, vector<256x128xbf16>, vector<8x128xf32> -> vector<8x128xf32>
    %187 = arith.addf %167, %186 : vector<8x128xf32>
    %c0_143 = arith.constant 0 : index
    %c0_144 = arith.constant 0 : index
    %188 = vector.load %arg8[%c0_143, %c0_144] : memref<8x1xf32, #tpu.memory_space<vmem>>, vector<8x1xf32>
    %189 = vector.broadcast %188 : vector<8x1xf32> to vector<8x128xf32>
    %190 = arith.addf %187, %189 : vector<8x128xf32>
    %cst_145 = arith.constant 0.000000e+00 : f32
    %191 = vector.broadcast %cst_145 : f32 to vector<8x128xf32>
    %192 = arith.maximumf %190, %191 : vector<8x128xf32>
    %cst_146 = arith.constant dense<0.000000e+00> : vector<8xf32>
    %193 = vector.multi_reduction <add>, %192, %cst_146 [1] : vector<8x128xf32> to vector<8xf32>
    %194 = vector.shape_cast %193 : vector<8xf32> to vector<8x1xf32>
    %cst_147 = arith.constant 1.280000e+02 : f32
    %195 = vector.broadcast %cst_147 : f32 to vector<8x1xf32>
    %196 = arith.divf %194, %195 : vector<8x1xf32>
    %c0_148 = arith.constant 0 : index
    %c0_149 = arith.constant 0 : index
    %197 = vector.load %arg12[%c0_148, %c0_149] : memref<2x8xf32, #tpu.memory_space<vmem>>, vector<2x8xf32>
    %cst_150 = arith.constant dense<0.000000e+00> : vector<2x1xf32>
    %198 = tpu.matmul %197, %196, %cst_150 {dimension_numbers = #tpu.dot_dimension_numbers<[1], [0], [0], [1], [0, 0, 1, 1], [], []>} : vector<2x8xf32>, vector<8x1xf32>, vector<2x1xf32> -> vector<2x1xf32>
    %cst_151 = arith.constant 0.000000e+00 : f32
    %199 = vector.broadcast %cst_151 : f32 to vector<2x1xf32>
    %200 = arith.maximumf %198, %199 : vector<2x1xf32>
    %c0_152 = arith.constant 0 : index
    %c0_153 = arith.constant 0 : index
    %201 = vector.load %arg16[%c0_152, %c0_153] : memref<8x2xf32, #tpu.memory_space<vmem>>, vector<8x2xf32>
    %cst_154 = arith.constant dense<0.000000e+00> : vector<8x1xf32>
    %202 = tpu.matmul %201, %200, %cst_154 {dimension_numbers = #tpu.dot_dimension_numbers<[1], [0], [0], [1], [0, 0, 1, 1], [], []>} : vector<8x2xf32>, vector<2x1xf32>, vector<8x1xf32> -> vector<8x1xf32>
    %203 = arith.negf %202 : vector<8x1xf32>
    %204 = math.exp %203 : vector<8x1xf32>
    %cst_155 = arith.constant 1.000000e+00 : f32
    %205 = vector.broadcast %cst_155 : f32 to vector<8x1xf32>
    %206 = arith.addf %205, %204 : vector<8x1xf32>
    %207 = arith.divf %205, %206 : vector<8x1xf32>
    %208 = vector.broadcast %207 : vector<8x1xf32> to vector<8x128xf32>
    %209 = arith.mulf %192, %208 : vector<8x128xf32>
    %c0_156 = arith.constant 0 : index
    %c128_157 = arith.constant 128 : index
    %210 = vector.load %arg20[%c0_156, %c128_157] : memref<32x384xf32, #tpu.memory_space<vmem>>, vector<8x128xf32>
    tpu.vector_store %arg20[%c0_156, %c128_157], %209 {strides = array<i32>} : memref<32x384xf32, #tpu.memory_space<vmem>>, vector<8x128xf32>,
    %cst_158 = arith.constant dense<0.000000e+00> : vector<8xf32>
    %211 = vector.multi_reduction <add>, %209, %cst_158 [1] : vector<8x128xf32> to vector<8xf32>
    %212 = vector.shape_cast %211 : vector<8xf32> to vector<8x1xf32>
    %cst_159 = arith.constant 1.280000e+02 : f32
    %213 = vector.broadcast %cst_159 : f32 to vector<8x1xf32>
    %214 = arith.divf %212, %213 : vector<8x1xf32>
    %c0_160 = arith.constant 0 : index
    %c16_161 = arith.constant 16 : index
    %c0_162 = arith.constant 0 : index
    %215 = vector.load %arg19[%c0_160, %c16_161, %c0_162] : memref<1x52x1xf32, #tpu.memory_space<vmem>>, vector<1x8x1xf32>
    %216 = vector.shape_cast %215 : vector<1x8x1xf32> to vector<8x1xf32>
    %217 = vector.shape_cast %214 : vector<8x1xf32> to vector<1x8x1xf32>
    tpu.vector_store %arg19[%c0_160, %c16_161, %c0_162], %217 {strides = array<i32>} : memref<1x52x1xf32, #tpu.memory_space<vmem>>, vector<1x8x1xf32>,
    %cst_163 = arith.constant 0.000000e+00 : f32
    %218 = vector.broadcast %cst_163 : f32 to vector<28x128xf32>
    %c0_164 = arith.constant 0 : index
    %c121_165 = arith.constant 121 : index
    %219 = vector.load %arg20[%c0_164, %c121_165] : memref<32x384xf32, #tpu.memory_space<vmem>>, vector<32x128xf32>
    %220 = arith.truncf %219 : vector<32x128xf32> to vector<32x128xbf16>
    %c0_166 = arith.constant 0 : index
    %c122_167 = arith.constant 122 : index
    %221 = vector.load %arg20[%c0_166, %c122_167] : memref<32x384xf32, #tpu.memory_space<vmem>>, vector<32x128xf32>
    %222 = arith.truncf %221 : vector<32x128xf32> to vector<32x128xbf16>
    %c0_168 = arith.constant 0 : index
    %c123_169 = arith.constant 123 : index
    %223 = vector.load %arg20[%c0_168, %c123_169] : memref<32x384xf32, #tpu.memory_space<vmem>>, vector<32x128xf32>
    %224 = arith.truncf %223 : vector<32x128xf32> to vector<32x128xbf16>
    %c0_170 = arith.constant 0 : index
    %c124_171 = arith.constant 124 : index
    %225 = vector.load %arg20[%c0_170, %c124_171] : memref<32x384xf32, #tpu.memory_space<vmem>>, vector<32x128xf32>
    %226 = arith.truncf %225 : vector<32x128xf32> to vector<32x128xbf16>
    %c0_172 = arith.constant 0 : index
    %c125_173 = arith.constant 125 : index
    %227 = vector.load %arg20[%c0_172, %c125_173] : memref<32x384xf32, #tpu.memory_space<vmem>>, vector<32x128xf32>
    %228 = arith.truncf %227 : vector<32x128xf32> to vector<32x128xbf16>
    %c0_174 = arith.constant 0 : index
    %c126_175 = arith.constant 126 : index
    %229 = vector.load %arg20[%c0_174, %c126_175] : memref<32x384xf32, #tpu.memory_space<vmem>>, vector<32x128xf32>
    %230 = arith.truncf %229 : vector<32x128xf32> to vector<32x128xbf16>
    %c0_176 = arith.constant 0 : index
    %c127_177 = arith.constant 127 : index
    %231 = vector.load %arg20[%c0_176, %c127_177] : memref<32x384xf32, #tpu.memory_space<vmem>>, vector<32x128xf32>
    %232 = arith.truncf %231 : vector<32x128xf32> to vector<32x128xbf16>
    %c0_178 = arith.constant 0 : index
    %c128_179 = arith.constant 128 : index
    %233 = vector.load %arg20[%c0_178, %c128_179] : memref<32x384xf32, #tpu.memory_space<vmem>>, vector<32x128xf32>
    %234 = arith.truncf %233 : vector<32x128xf32> to vector<32x128xbf16>
    %235 = tpu.concatenate %220, %222, %224, %226, %228, %230, %232, %234 in 0 : vector<32x128xbf16>, vector<32x128xbf16>, vector<32x128xbf16>, vector<32x128xbf16>, vector<32x128xbf16>, vector<32x128xbf16>, vector<32x128xbf16>, vector<32x128xbf16> -> vector<256x128xbf16>
    %c0_180 = arith.constant 0 : index
    %c0_181 = arith.constant 0 : index
    %236 = vector.load %arg5[%c0_180, %c0_181] : memref<28x512xbf16, #tpu.memory_space<vmem>>, vector<28x256xbf16>
    %cst_182 = arith.constant dense<0.000000e+00> : vector<28x128xf32>
    %237 = tpu.matmul %236, %235, %cst_182 {dimension_numbers = #tpu.dot_dimension_numbers<[1], [0], [0], [1], [0, 0, 1, 1], [], []>} : vector<28x256xbf16>, vector<256x128xbf16>, vector<28x128xf32> -> vector<28x128xf32>
    %238 = arith.addf %218, %237 : vector<28x128xf32>
    %c0_183 = arith.constant 0 : index
    %c129_184 = arith.constant 129 : index
    %239 = vector.load %arg20[%c0_183, %c129_184] : memref<32x384xf32, #tpu.memory_space<vmem>>, vector<32x128xf32>
    %240 = arith.truncf %239 : vector<32x128xf32> to vector<32x128xbf16>
    %c0_185 = arith.constant 0 : index
    %c130_186 = arith.constant 130 : index
    %241 = vector.load %arg20[%c0_185, %c130_186] : memref<32x384xf32, #tpu.memory_space<vmem>>, vector<32x128xf32>
    %242 = arith.truncf %241 : vector<32x128xf32> to vector<32x128xbf16>
    %c0_187 = arith.constant 0 : index
    %c131_188 = arith.constant 131 : index
    %243 = vector.load %arg20[%c0_187, %c131_188] : memref<32x384xf32, #tpu.memory_space<vmem>>, vector<32x128xf32>
    %244 = arith.truncf %243 : vector<32x128xf32> to vector<32x128xbf16>
    %c0_189 = arith.constant 0 : index
    %c132_190 = arith.constant 132 : index
    %245 = vector.load %arg20[%c0_189, %c132_190] : memref<32x384xf32, #tpu.memory_space<vmem>>, vector<32x128xf32>
    %246 = arith.truncf %245 : vector<32x128xf32> to vector<32x128xbf16>
    %c0_191 = arith.constant 0 : index
    %c133_192 = arith.constant 133 : index
    %247 = vector.load %arg20[%c0_191, %c133_192] : memref<32x384xf32, #tpu.memory_space<vmem>>, vector<32x128xf32>
    %248 = arith.truncf %247 : vector<32x128xf32> to vector<32x128xbf16>
    %c0_193 = arith.constant 0 : index
    %c134_194 = arith.constant 134 : index
    %249 = vector.load %arg20[%c0_193, %c134_194] : memref<32x384xf32, #tpu.memory_space<vmem>>, vector<32x128xf32>
    %250 = arith.truncf %249 : vector<32x128xf32> to vector<32x128xbf16>
    %c0_195 = arith.constant 0 : index
    %c135_196 = arith.constant 135 : index
    %251 = vector.load %arg20[%c0_195, %c135_196] : memref<32x384xf32, #tpu.memory_space<vmem>>, vector<32x128xf32>
    %252 = arith.truncf %251 : vector<32x128xf32> to vector<32x128xbf16>
    %c0_197 = arith.constant 0 : index
    %c136_198 = arith.constant 136 : index
    %253 = vector.load %arg20[%c0_197, %c136_198] : memref<32x384xf32, #tpu.memory_space<vmem>>, vector<32x128xf32>
    %254 = arith.truncf %253 : vector<32x128xf32> to vector<32x128xbf16>
    %255 = tpu.concatenate %240, %242, %244, %246, %248, %250, %252, %254 in 0 : vector<32x128xbf16>, vector<32x128xbf16>, vector<32x128xbf16>, vector<32x128xbf16>, vector<32x128xbf16>, vector<32x128xbf16>, vector<32x128xbf16>, vector<32x128xbf16> -> vector<256x128xbf16>
    %c0_199 = arith.constant 0 : index
    %c256_200 = arith.constant 256 : index
    %256 = vector.load %arg5[%c0_199, %c256_200] : memref<28x512xbf16, #tpu.memory_space<vmem>>, vector<28x256xbf16>
    %cst_201 = arith.constant dense<0.000000e+00> : vector<28x128xf32>
    %257 = tpu.matmul %256, %255, %cst_201 {dimension_numbers = #tpu.dot_dimension_numbers<[1], [0], [0], [1], [0, 0, 1, 1], [], []>} : vector<28x256xbf16>, vector<256x128xbf16>, vector<28x128xf32> -> vector<28x128xf32>
    %258 = arith.addf %238, %257 : vector<28x128xf32>
    %c0_202 = arith.constant 0 : index
    %c0_203 = arith.constant 0 : index
    %259 = vector.load %arg9[%c0_202, %c0_203] : memref<28x1xf32, #tpu.memory_space<vmem>>, vector<28x1xf32>
    %260 = vector.broadcast %259 : vector<28x1xf32> to vector<28x128xf32>
    %261 = arith.addf %258, %260 : vector<28x128xf32>
    %cst_204 = arith.constant 0.000000e+00 : f32
    %262 = vector.broadcast %cst_204 : f32 to vector<28x128xf32>
    %263 = arith.maximumf %261, %262 : vector<28x128xf32>
    %cst_205 = arith.constant dense<0.000000e+00> : vector<28xf32>
    %264 = vector.multi_reduction <add>, %263, %cst_205 [1] : vector<28x128xf32> to vector<28xf32>
    %265 = vector.shape_cast %264 : vector<28xf32> to vector<28x1xf32>
    %cst_206 = arith.constant 1.280000e+02 : f32
    %266 = vector.broadcast %cst_206 : f32 to vector<28x1xf32>
    %267 = arith.divf %265, %266 : vector<28x1xf32>
    %c0_207 = arith.constant 0 : index
    %c0_208 = arith.constant 0 : index
    %268 = vector.load %arg13[%c0_207, %c0_208] : memref<7x28xf32, #tpu.memory_space<vmem>>, vector<7x28xf32>
    %cst_209 = arith.constant dense<0.000000e+00> : vector<7x1xf32>
    %269 = tpu.matmul %268, %267, %cst_209 {dimension_numbers = #tpu.dot_dimension_numbers<[1], [0], [0], [1], [0, 0, 1, 1], [], []>} : vector<7x28xf32>, vector<28x1xf32>, vector<7x1xf32> -> vector<7x1xf32>
    %cst_210 = arith.constant 0.000000e+00 : f32
    %270 = vector.broadcast %cst_210 : f32 to vector<7x1xf32>
    %271 = arith.maximumf %269, %270 : vector<7x1xf32>
    %c0_211 = arith.constant 0 : index
    %c0_212 = arith.constant 0 : index
    %272 = vector.load %arg17[%c0_211, %c0_212] : memref<28x7xf32, #tpu.memory_space<vmem>>, vector<28x7xf32>
    %cst_213 = arith.constant dense<0.000000e+00> : vector<28x1xf32>
    %273 = tpu.matmul %272, %271, %cst_213 {dimension_numbers = #tpu.dot_dimension_numbers<[1], [0], [0], [1], [0, 0, 1, 1], [], []>} : vector<28x7xf32>, vector<7x1xf32>, vector<28x1xf32> -> vector<28x1xf32>
    %274 = arith.negf %273 : vector<28x1xf32>
    %275 = math.exp %274 : vector<28x1xf32>
    %cst_214 = arith.constant 1.000000e+00 : f32
    %276 = vector.broadcast %cst_214 : f32 to vector<28x1xf32>
    %277 = arith.addf %276, %275 : vector<28x1xf32>
    %278 = arith.divf %276, %277 : vector<28x1xf32>
    %279 = vector.broadcast %278 : vector<28x1xf32> to vector<28x128xf32>
    %280 = arith.mulf %263, %279 : vector<28x128xf32>
    %c0_215 = arith.constant 0 : index
    %c0_216 = arith.constant 0 : index
    %c0_217 = arith.constant 0 : index
    %281 = vector.load %arg18[%c0_215, %c0_216, %c0_217] : memref<1x28x128xf32, #tpu.memory_space<vmem>>, vector<1x28x128xf32>
    %282 = vector.shape_cast %281 : vector<1x28x128xf32> to vector<28x128xf32>
    %283 = vector.shape_cast %280 : vector<28x128xf32> to vector<1x28x128xf32>
    tpu.vector_store %arg18[%c0_215, %c0_216, %c0_217], %283 {strides = array<i32>} : memref<1x28x128xf32, #tpu.memory_space<vmem>>, vector<1x28x128xf32>,
    %cst_218 = arith.constant dense<0.000000e+00> : vector<28xf32>
    %284 = vector.multi_reduction <add>, %280, %cst_218 [1] : vector<28x128xf32> to vector<28xf32>
    %285 = vector.shape_cast %284 : vector<28xf32> to vector<28x1xf32>
    %cst_219 = arith.constant 1.280000e+02 : f32
    %286 = vector.broadcast %cst_219 : f32 to vector<28x1xf32>
    %287 = arith.divf %285, %286 : vector<28x1xf32>
    %c0_220 = arith.constant 0 : index
    %c24_221 = arith.constant 24 : index
    %c0_222 = arith.constant 0 : index
    %288 = vector.load %arg19[%c0_220, %c24_221, %c0_222] : memref<1x52x1xf32, #tpu.memory_space<vmem>>, vector<1x28x1xf32>
    %289 = vector.shape_cast %288 : vector<1x28x1xf32> to vector<28x1xf32>
    %290 = vector.shape_cast %287 : vector<28x1xf32> to vector<1x28x1xf32>
    tpu.vector_store %arg19[%c0_220, %c24_221, %c0_222], %290 {strides = array<i32>} : memref<1x52x1xf32, #tpu.memory_space<vmem>>, vector<1x28x1xf32>,
    return
  }
  func.func @transform_0(%arg0: i32) -> (i32, i32, i32) {
    %c0_i32 = arith.constant 0 : i32
    %c0_i32_0 = arith.constant 0 : i32
    %c0_i32_1 = arith.constant 0 : i32
    return %arg0, %c0_i32, %c0_i32_0 : i32, i32, i32
  }
  func.func @transform_1(%arg0: i32) -> (i32, i32) {
    %c0_i32 = arith.constant 0 : i32
    %c0_i32_0 = arith.constant 0 : i32
    %c0_i32_1 = arith.constant 0 : i32
    return %c0_i32, %c0_i32_0 : i32, i32
  }
  func.func @transform_2(%arg0: i32) -> (i32, i32) {
    %c0_i32 = arith.constant 0 : i32
    %c0_i32_0 = arith.constant 0 : i32
    %c0_i32_1 = arith.constant 0 : i32
    return %c0_i32, %c0_i32_0 : i32, i32
  }
  func.func @transform_3(%arg0: i32) -> (i32, i32) {
    %c0_i32 = arith.constant 0 : i32
    %c0_i32_0 = arith.constant 0 : i32
    %c0_i32_1 = arith.constant 0 : i32
    return %c0_i32, %c0_i32_0 : i32, i32
  }
  func.func @transform_4(%arg0: i32) -> (i32, i32) {
    %c0_i32 = arith.constant 0 : i32
    %c0_i32_0 = arith.constant 0 : i32
    %c0_i32_1 = arith.constant 0 : i32
    return %c0_i32, %c0_i32_0 : i32, i32
  }
  func.func @transform_5(%arg0: i32) -> (i32, i32) {
    %c0_i32 = arith.constant 0 : i32
    %c0_i32_0 = arith.constant 0 : i32
    %c0_i32_1 = arith.constant 0 : i32
    return %c0_i32, %c0_i32_0 : i32, i32
  }
  func.func @transform_6(%arg0: i32) -> (i32, i32) {
    %c0_i32 = arith.constant 0 : i32
    %c0_i32_0 = arith.constant 0 : i32
    %c0_i32_1 = arith.constant 0 : i32
    return %c0_i32, %c0_i32_0 : i32, i32
  }
  func.func @transform_7(%arg0: i32) -> (i32, i32) {
    %c0_i32 = arith.constant 0 : i32
    %c0_i32_0 = arith.constant 0 : i32
    %c0_i32_1 = arith.constant 0 : i32
    return %c0_i32, %c0_i32_0 : i32, i32
  }
  func.func @transform_8(%arg0: i32) -> (i32, i32) {
    %c0_i32 = arith.constant 0 : i32
    %c0_i32_0 = arith.constant 0 : i32
    %c0_i32_1 = arith.constant 0 : i32
    return %c0_i32, %c0_i32_0 : i32, i32
  }
  func.func @transform_9(%arg0: i32) -> (i32, i32) {
    %c0_i32 = arith.constant 0 : i32
    %c0_i32_0 = arith.constant 0 : i32
    %c0_i32_1 = arith.constant 0 : i32
    return %c0_i32, %c0_i32_0 : i32, i32
  }
  func.func @transform_10(%arg0: i32) -> (i32, i32) {
    %c0_i32 = arith.constant 0 : i32
    %c0_i32_0 = arith.constant 0 : i32
    %c0_i32_1 = arith.constant 0 : i32
    return %c0_i32, %c0_i32_0 : i32, i32
  }
  func.func @transform_11(%arg0: i32) -> (i32, i32) {
    %c0_i32 = arith.constant 0 : i32
    %c0_i32_0 = arith.constant 0 : i32
    %c0_i32_1 = arith.constant 0 : i32
    return %c0_i32, %c0_i32_0 : i32, i32
  }
  func.func @transform_12(%arg0: i32) -> (i32, i32) {
    %c0_i32 = arith.constant 0 : i32
    %c0_i32_0 = arith.constant 0 : i32
    %c0_i32_1 = arith.constant 0 : i32
    return %c0_i32, %c0_i32_0 : i32, i32
  }
  func.func @transform_13(%arg0: i32) -> (i32, i32) {
    %c0_i32 = arith.constant 0 : i32
    %c0_i32_0 = arith.constant 0 : i32
    %c0_i32_1 = arith.constant 0 : i32
    return %c0_i32, %c0_i32_0 : i32, i32
  }
  func.func @transform_14(%arg0: i32) -> (i32, i32) {
    %c0_i32 = arith.constant 0 : i32
    %c0_i32_0 = arith.constant 0 : i32
    %c0_i32_1 = arith.constant 0 : i32
    return %c0_i32, %c0_i32_0 : i32, i32
  }
  func.func @transform_15(%arg0: i32) -> (i32, i32) {
    %c0_i32 = arith.constant 0 : i32
    %c0_i32_0 = arith.constant 0 : i32
    %c0_i32_1 = arith.constant 0 : i32
    return %c0_i32, %c0_i32_0 : i32, i32
  }
  func.func @transform_16(%arg0: i32) -> (i32, i32) {
    %c0_i32 = arith.constant 0 : i32
    %c0_i32_0 = arith.constant 0 : i32
    %c0_i32_1 = arith.constant 0 : i32
    return %c0_i32, %c0_i32_0 : i32, i32
  }
  func.func @transform_17(%arg0: i32) -> (i32, i32, i32) {
    %c0_i32 = arith.constant 0 : i32
    %c0_i32_0 = arith.constant 0 : i32
    %c0_i32_1 = arith.constant 0 : i32
    return %arg0, %c0_i32, %c0_i32_0 : i32, i32, i32
  }
  func.func @transform_18(%arg0: i32) -> (i32, i32, i32) {
    %c0_i32 = arith.constant 0 : i32
    %c0_i32_0 = arith.constant 0 : i32
    %c0_i32_1 = arith.constant 0 : i32
    return %arg0, %c0_i32, %c0_i32_0 : i32, i32, i32
  }
}

</mosaic_0001>

<bundles_post_ra>
// kernel: tpu_custom_call.1
= control target key start
LH: loop header
LB: loop body
LE: loop exit
PB: predicated region body
PF: predicated region fallthrough
CT: control target
= control target key end

     0   :  { %s3862_s27 = smov 0   ;;  %s5465_s0 = inlined_call_operand.vmem [shape: f32[2,4,128], index: 0, kind: input, shape index: {}]   ;;  %s5466_s1 = inlined_call_operand.vmem [shape: bf16[8,512], index: 1, kind: input, shape index: {}]   ;;  %s5467_s2 = inlined_call_operand.vmem [shape: bf16[8,512], index: 2, kind: input, shape index: {}]   ;;  %s5468_s3 = inlined_call_operand.vmem [shape: bf16[8,512], index: 3, kind: input, shape index: {}]   ;;  %s5469_s4 = inlined_call_operand.vmem [shape: bf16[28,512], index: 4, kind: input, shape index: {}]   ;;  %s5470_s5 = inlined_call_operand.vmem [shape: f32[8,1], index: 5, kind: input, shape index: {}]   ;;  %s5471_s6 = inlined_call_operand.vmem [shape: f32[8,1], index: 6, kind: input, shape index: {}]   ;;  %s5472_s7 = inlined_call_operand.vmem [shape: f32[8,1], index: 7, kind: input, shape index: {}]   ;;  %s5473_s8 = inlined_call_operand.vmem [shape: f32[28,1], index: 8, kind: input, shape index: {}]   ;;  %s5474_s9 = inlined_call_operand.vmem [shape: f32[2,8], index: 9, kind: input, shape index: {}]   ;;  %s5475_s10 = inlined_call_operand.vmem [shape: f32[2,8], index: 10, kind: input, shape index: {}]   ;;  %s5476_s11 = inlined_call_operand.vmem [shape: f32[2,8], index: 11, kind: input, shape index: {}]   ;;  %s5477_s12 = inlined_call_operand.vmem [shape: f32[7,28], index: 12, kind: input, shape index: {}]   ;;  %s5478_s13 = inlined_call_operand.vmem [shape: f32[8,2], index: 13, kind: input, shape index: {}]   ;;  %s5479_s14 = inlined_call_operand.vmem [shape: f32[8,2], index: 14, kind: input, shape index: {}]   ;;  %s5480_s15 = inlined_call_operand.vmem [shape: f32[8,2], index: 15, kind: input, shape index: {}]   ;;  %s5481_s16 = inlined_call_operand.vmem [shape: f32[28,7], index: 16, kind: input, shape index: {}]   ;;  %s5482_s17 = inlined_call_operand.vmem [shape: f32[2,28,128], index: 17, kind: output, shape index: {0}]   ;;  %s5483_s18 = inlined_call_operand.vmem [shape: f32[2,52,1], index: 18, kind: output, shape index: {1}]  }
   0x1   :  { %5490 = sst [smem:[#allocation3_spill]] %s5465_s0 }
   0x2   :  { %5491 = sst [smem:[#allocation4_spill]] %s5466_s1 }
   0x3   :  { %5492 = sst [smem:[#allocation5_spill]] %s5467_s2 }
   0x4 LB: > { %s3345_s28 = sadd.s32 4294967295, %s3752_s27   ;;  %p3349_p0 = scmp.ge.s32.totalorder %s3752_s27, 1  ;;  %s3752_s27 = sphi %s3862_s27, %s29_s27  }
   0x5   : > { %p514_p1 = scmp.lt.s32.totalorder %s3752_s27, 3 }
   0x7   : > { %p515_p2 = pnand %p3349_p0, %p514_p1 }
   0x8   : > { %v3754_v0 = vmov (!%p515_p2), 0.0   ;;  %p572_p3 = scmp.lt.s32.totalorder (!%p515_p2), %s3345_s28, 1  ;;  %v3755_v1 = vmov (!%p515_p2), 0.0|0.0   ;;  %s3756_s29 = smov (!%p515_p2), 124   ;;  %vm658_vm0 = vcmask (!%p515_p2), 1014784   ;;  %vm669_vm1 = vcmask (!%p515_p2), 1006592  }
   0x9   : > { %518 = sbr.rel (%p515_p2) target bundleno = 5293 (0x14ad), region = 88  ;;  %587 = vst [vmem:[#allocation2] sm:$0xff] (!%p515_p2), %v3754_v0  ;;  %597 = vst [vmem:[#allocation2 + $0x50] sm:$0xff] (!%p515_p2), %v3754_v0  ;;  %734 = vrot.lane.b32.xlu1 (!%p515_p2), %v3755_v1, %s3756_s29  ;;  %650 = vrot.lane.b32.xlu0 (!%p515_p2), %v3755_v1, %s3756_s29  ;;  %s5493_s1 = sld [smem:[#allocation3_spill]] (!%p515_p2)  ;;  %vm625_vm2 = vcmask (!%p515_p2), 1039360   ;;  %vm680_vm3 = vcmask (!%p515_p2), 998400  }
   0xa   : > { %s3757_s21 = smov (!%p515_p2), 123   ;;  %s3758_s22 = smov (!%p515_p2), 127   ;;  %vm636_vm4 = vcmask (!%p515_p2), 1031168   ;;  %vm772_vm5 = vcmask (!%p515_p2), 990208   ;;  %vm647_vm6 = vcmask (!%p515_p2), 1022976   ;;  %vm976_vm7 = vcmask (!%p515_p2), 56320  }
   0xb   : > { %s3759_s2 = smov (!%p515_p2), 122   ;;  %s3760_s23 = smov (!%p515_p2), 126   ;;  %vm3765_vm8 = vmmov (!%p515_p2), 0   ;;  %vm1060_vm9 = vcmask (!%p515_p2), 64512   ;;  %vm1140_vm10 = vcmask (!%p515_p2), 1041408   ;;  %vm1136_vm11 = vcmask (!%p515_p2), 15360  }
   0xc   : > { %s5486_s24 = smov (!%p515_p2), 121   ;;  %s5488_s25 = smov (!%p515_p2), 125   ;;  %vm2994_vm12 = vcmask (!%p515_p2), 1043456   ;;  %vm3766_vm13 = vmmov (!%p515_p2), 1   ;;  %vm3003_vm15 = vcmask (!%p515_p2), 228352  }
   0xd   : > { %736 = vrot.lane.b32.xlu1 (!%p515_p2), %v3755_v1, %s3756_s29  ;;  %652 = vrot.lane.b32.xlu0 (!%p515_p2), %v3755_v1, %s3756_s29  ;;  %s3763_s26 = smov (!%p515_p2), 7   ;;  %s5494_s19 = sld [smem:[#allocation4_spill]] (!%p515_p2)  ;;  %vm3664_vm14 = vmpackc.low (!%p515_p2), %vm2994_vm12, %vm3766_vm13 }
  0x10   : > { %s5499_s28 = smov (!%p572_p3, %s3345_s28), 1 }
  0x11   : > { %s3350_s30 = sshll.u32 %s5499_s28, 2  ;;  %740 = vrot.lane.b32.xlu1 %v3755_v1, %s3756_s29  ;;  %654 = vrot.lane.b32.xlu0 %v3755_v1, %s3756_s29 }
  0x12   : > { %s575_s20 = scalar_lea.vmem %s5493_s1, %s3350_s30  ;;  %s5495_s30 = sld [smem:[#allocation5_spill]] }
  0x13   : > { %v599_v2 = vld [vmem:[%s575_s20] sm:$0xf]  ;;  %s5496_s20 = smov 121   ;;  %s5497_s1 = smov 125  }
  0x14   : > { %600 = vst [vmem:[#allocation2 + $0x50] sm:$0xf] %v599_v2 }
  0x15   : > { %663 = vrot.lane.b32.xlu1 %v3755_v1, %s3757_s21  ;;  %661 = vrot.lane.b32.xlu0 %v3755_v1, %s3757_s21 }
  0x1b   : > { %v694_v3 = vld [vmem:[#allocation2 + $0x50] sm:$0xff] }
  0x1c   : > { %v698_v4 = vpack.c.bf16 %v694_v3, %v3754_v0 }
  0x1e   : > { %738 = vrot.lane.b32.xlu0 %v698_v4, %s3756_s29  ;;  %656 = vrot.lane.b32.xlu1 %v698_v4, %s3756_s29 }
  0x22   : > { %744 = vrot.lane.b32.xlu0 %v3755_v1, %s3757_s21  ;;  %746 = vrot.lane.b32.xlu1 %v3755_v1, %s3757_s21 }
  0x26   : > { %617 = vrot.lane.b32.xlu0 %v3755_v1, %s3758_s22  ;;  %619 = vrot.lane.b32.xlu1 %v3755_v1, %s3758_s22 }
  0x2a   : > { %704 = vrot.lane.b32.xlu0 %v3755_v1, %s3758_s22  ;;  %706 = vrot.lane.b32.xlu1 %v3755_v1, %s3758_s22 }
  0x2e   : > { %665 = vrot.lane.b32.xlu0 %v3755_v1, %s3757_s21  ;;  %667 = vrot.lane.b32.xlu1 %v698_v4, %s3757_s21 }
  0x32   : > { %748 = vrot.lane.b32.xlu0 %v698_v4, %s3757_s21  ;;  %750 = vrot.lane.b32.xlu1 %v3755_v1, %s3757_s21 }
  0x36   : > { %621 = vrot.lane.b32.xlu0 %v3755_v1, %s3758_s22  ;;  %623 = vrot.lane.b32.xlu1 %v698_v4, %s3758_s22 }
  0x3a   : > { %708 = vrot.lane.b32.xlu0 %v698_v4, %s3758_s22  ;;  %710 = vrot.lane.b32.xlu1 %v3755_v1, %s3758_s22 }
  0x3e   : > { %672 = vrot.lane.b32.xlu0 %v3755_v1, %s3759_s2  ;;  %674 = vrot.lane.b32.xlu1 %v3755_v1, %s3759_s2 }
  0x42   : > { %754 = vrot.lane.b32.xlu0 %v3755_v1, %s3759_s2  ;;  %756 = vrot.lane.b32.xlu1 %v3755_v1, %s3759_s2 }
  0x46   : > { %628 = vrot.lane.b32.xlu0 %v3755_v1, %s3760_s23  ;;  %630 = vrot.lane.b32.xlu1 %v3755_v1, %s3760_s23 }
  0x4a   : > { %714 = vrot.lane.b32.xlu0 %v3755_v1, %s3760_s23  ;;  %716 = vrot.lane.b32.xlu1 %v3755_v1, %s3760_s23 }
  0x4e   : > { %676 = vrot.lane.b32.xlu0 %v3755_v1, %s3759_s2  ;;  %678 = vrot.lane.b32.xlu1 %v698_v4, %s3759_s2 }
  0x52   : > { %758 = vrot.lane.b32.xlu0 %v698_v4, %s3759_s2  ;;  %760 = vrot.lane.b32.xlu1 %v3755_v1, %s3759_s2 }
  0x56   : > { %632 = vrot.lane.b32.xlu0 %v3755_v1, %s3760_s23  ;;  %634 = vrot.lane.b32.xlu1 %v698_v4, %s3760_s23 }
  0x5a   : > { %718 = vrot.lane.b32.xlu0 %v698_v4, %s3760_s23  ;;  %720 = vrot.lane.b32.xlu1 %v3755_v1, %s3760_s23 }
  0x5e   : > { %764 = vrot.lane.b32.xlu0 %v3755_v1, %s5486_s24  ;;  %766 = vrot.lane.b32.xlu1 %v3755_v1, %s5486_s24 }
  0x62   : > { %639 = vrot.lane.b32.xlu0 %v3755_v1, %s5488_s25  ;;  %641 = vrot.lane.b32.xlu1 %v3755_v1, %s5488_s25 }
  0x66   : > { %724 = vrot.lane.b32.xlu0 %v3755_v1, %s5488_s25  ;;  %726 = vrot.lane.b32.xlu1 %v3755_v1, %s5488_s25 }
  0x6a   : > { %683 = vrot.lane.b32.xlu0 %v3755_v1, %s5486_s24  ;;  %768 = vrot.lane.b32.xlu1 %v698_v4, %s5486_s24 }
  0x6e   : > { %770 = vrot.lane.b32.xlu0 %v3755_v1, %s5486_s24  ;;  %643 = vrot.lane.b32.xlu1 %v3755_v1, %s5488_s25 }
  0x72   : > { %645 = vrot.lane.b32.xlu0 %v698_v4, %s5488_s25  ;;  %728 = vrot.lane.b32.xlu1 %v698_v4, %s5488_s25 }
  0x76   : > { %730 = vrot.lane.b32.xlu0 %v3755_v1, %s5488_s25  ;;  %685 = vrot.lane.b32.xlu1 %v698_v4, %s5486_s24 }
  0x7a   : > { %918 = vrot.lane.b32.xlu1 %v3755_v1, %s3763_s26  ;;  %916 = vrot.lane.b32.xlu0 %v3755_v1, %s3763_s26 }
  0x7b   : > { %v735_v5 = vpop.permute.xlu1 %734  ;;  %v651_v6 = vpop.permute.xlu0 %650 }
  0x7e   : > { %922 = vrot.lane.b32.xlu1 %v698_v4, %s3763_s26  ;;  %920 = vrot.lane.b32.xlu0 %v3755_v1, %s3763_s26 }
  0x7f   : > { %v737_v7 = vpop.permute.xlu1 %736  ;;  %v653_v8 = vpop.permute.xlu0 %652 }
  0x80   : > { %v742_v9 = vsel %vm658_vm0, %v735_v5, %v737_v7  ;;  %v659_v12 = vsel %vm658_vm0, %v651_v6, %v653_v8 }
  0x82   : > { %809 = vrot.lane.b32.xlu1 %v737_v7, %s3758_s22  ;;  %807 = vrot.lane.b32.xlu0 %v742_v9, %s3758_s22 }
  0x83   : > { %v741_v10 = vpop.permute.xlu1 %740  ;;  %v655_v11 = vpop.permute.xlu0 %654 }
  0x86   : > { %950 = vrot.lane.b32.xlu1 %v653_v8, %s3763_s26  ;;  %948 = vrot.lane.b32.xlu0 %v659_v12, %s3763_s26 }
  0x87   : > { %v664_v13 = vpop.permute.xlu1 %663  ;;  %v662_v14 = vpop.permute.xlu0 %661 }
  0x88   : > { %v670_v28 = vsel %vm669_vm1, %v662_v14, %v664_v13 }
  0x8a   : > { %813 = vrot.lane.b32.xlu1 %v741_v10, %s3758_s22 }
  0x90   : > { %v739_v15 = vpop.permute.xlu0 %738  ;;  %v657_v16 = vpop.permute.xlu1 %656 }
  0x91   : > { %v743_v22 = vsel %vm658_vm0, %v739_v15, %v741_v10  ;;  %v660_v25 = vsel %vm658_vm0, %v655_v11, %v657_v16 }
  0x94   : > { %v745_v17 = vpop.permute.xlu0 %744  ;;  %v747_v18 = vpop.permute.xlu1 %746 }
  0x95   : > { %817 = vrot.lane.b32.xlu1 %v747_v18, %s3758_s22  ;;  %v752_v19 = vsel %vm669_vm1, %v745_v17, %v747_v18 }
  0x96   : > { %815 = vrot.lane.b32.xlu0 %v752_v19, %s3758_s22  ;;  %v4060_v19 = vld [vmem:[%s5494_s19 + $0x8] sm:$0xff] }
  0x98   : > { %v618_v20 = vpop.permute.xlu0 %617  ;;  %v620_v21 = vpop.permute.xlu1 %619 }
  0x99   : > { %954 = vrot.lane.b32.xlu1 %v657_v16, %s3763_s26  ;;  %v626_v34 = vsel %vm625_vm2, %v618_v20, %v620_v21  ;;  %v3355_v20 = vcombine.high %v4060_v19, %v4060_v19 }
  0x9a   : > { %811 = vrot.lane.b32.xlu0 %v743_v22, %s3758_s22 }
  0x9b   : > { %901 = vmatprep.mubr.bf16.mxu0 %v3355_v20 }
  0x9c   : > { %v705_v23 = vpop.permute.xlu0 %704  ;;  %v707_v24 = vpop.permute.xlu1 %706 }
  0x9d   : > { %958 = vrot.lane.b32.xlu1 %v664_v13, %s3763_s26  ;;  %v4001_v31 = vsel %vm625_vm2, %v705_v23, %v707_v24 }
  0x9e   : > { %952 = vrot.lane.b32.xlu0 %v660_v25, %s3763_s26 }
  0xa0   : > { %v666_v26 = vpop.permute.xlu0 %665  ;;  %v668_v27 = vpop.permute.xlu1 %667 }
  0xa1   : > { %785 = vrot.lane.b32.xlu1 %v707_v24, %s3758_s22  ;;  %v671_v40 = vsel %vm669_vm1, %v666_v26, %v668_v27  ;;  %v4068_v24 = vld [vmem:[%s5494_s19] sm:$0xff] }
  0xa2   : > { %956 = vrot.lane.b32.xlu0 %v670_v28, %s3763_s26  ;;  %v3357_v25 = vcombine.high %v4068_v24, %v4068_v24 }
  0xa4   : > { %v749_v29 = vpop.permute.xlu0 %748  ;;  %v751_v30 = vpop.permute.xlu1 %750  ;;  %1039 = vmatprep.mubr.bf16.mxu1 %v3357_v25 }
  0xa5   : > { %926 = vrot.lane.b32.xlu1 %v620_v21, %s3763_s26  ;;  %v753_v37 = vsel %vm669_vm1, %v749_v29, %v751_v30  ;;  %v3764_v29 = vmov 0  }
  0xa6   : > { %783 = vrot.lane.b32.xlu0 %v4001_v31, %s3758_s22  ;;  %3689 = vset.pattern.permute.xlu1 %v3764_v29 }
  0xa7   : > { %3688 = vset.pattern.permute.xlu0 %v3764_v29 }
  0xa8   : > { %v622_v32 = vpop.permute.xlu0 %621  ;;  %v624_v33 = vpop.permute.xlu1 %623 }
  0xa9   : > { %821 = vrot.lane.b32.xlu1 %v751_v30, %s3758_s22  ;;  %v627_v46 = vsel %vm625_vm2, %v622_v32, %v624_v33 }
  0xaa   : > { %924 = vrot.lane.b32.xlu0 %v626_v34, %s3763_s26  ;;  %v1047_v34 = vld [vmem:[%s5470_s5] sm:$0xff] }
  0xac   : > { %v709_v35 = vpop.permute.xlu0 %708  ;;  %v711_v36 = vpop.permute.xlu1 %710 }
  0xad   : > { %962 = vrot.lane.b32.xlu1 %v668_v27, %s3763_s26  ;;  %v4016_v43 = vsel %vm625_vm2, %v709_v35, %v711_v36 }
  0xae   : > { %819 = vrot.lane.b32.xlu0 %v753_v37, %s3758_s22 }
  0xb0   : > { %v673_v38 = vpop.permute.xlu0 %672  ;;  %v675_v39 = vpop.permute.xlu1 %674 }
  0xb1   : > { %789 = vrot.lane.b32.xlu1 %v711_v36, %s3758_s22  ;;  %v681_v52 = vsel %vm680_vm3, %v673_v38, %v675_v39 }
  0xb2   : > { %960 = vrot.lane.b32.xlu0 %v671_v40, %s3763_s26 }
  0xb4   : > { %v755_v41 = vpop.permute.xlu0 %754  ;;  %v757_v42 = vpop.permute.xlu1 %756 }
  0xb5   : > { %930 = vrot.lane.b32.xlu1 %v624_v33, %s3763_s26  ;;  %v762_v49 = vsel %vm680_vm3, %v755_v41, %v757_v42 }
  0xb6   : > { %787 = vrot.lane.b32.xlu0 %v4016_v43, %s3758_s22 }
  0xb8   : > { %v629_v44 = vpop.permute.xlu0 %628  ;;  %v631_v45 = vpop.permute.xlu1 %630 }
  0xb9   : > { %825 = vrot.lane.b32.xlu1 %v757_v42, %s3758_s22  ;;  %v637_v58 = vsel %vm636_vm4, %v629_v44, %v631_v45 }
  0xba   : > { %928 = vrot.lane.b32.xlu0 %v627_v46, %s3763_s26 }
  0xbc   : > { %v715_v47 = vpop.permute.xlu0 %714  ;;  %v717_v48 = vpop.permute.xlu1 %716 }
  0xbd   : > { %966 = vrot.lane.b32.xlu1 %v675_v39, %s3763_s26  ;;  %v722_v55 = vsel %vm636_vm4, %v715_v47, %v717_v48 }
  0xbe   : > { %823 = vrot.lane.b32.xlu0 %v762_v49, %s3758_s22 }
  0xc0   : > { %v677_v50 = vpop.permute.xlu0 %676  ;;  %v679_v51 = vpop.permute.xlu1 %678 }
  0xc1   : > { %793 = vrot.lane.b32.xlu1 %v717_v48, %s3758_s22  ;;  %v682_v2 = vsel %vm680_vm3, %v677_v50, %v679_v51 }
  0xc2   : > { %964 = vrot.lane.b32.xlu0 %v681_v52, %s3763_s26 }
  0xc4   : > { %v759_v53 = vpop.permute.xlu0 %758  ;;  %v761_v54 = vpop.permute.xlu1 %760 }
  0xc5   : > { %934 = vrot.lane.b32.xlu1 %v631_v45, %s3763_s26  ;;  %v763_v61 = vsel %vm680_vm3, %v759_v53, %v761_v54 }
  0xc6   : > { %791 = vrot.lane.b32.xlu0 %v722_v55, %s3758_s22 }
  0xc8   : > { %v633_v56 = vpop.permute.xlu0 %632  ;;  %v635_v57 = vpop.permute.xlu1 %634 }
  0xc9   : > { %829 = vrot.lane.b32.xlu1 %v761_v54, %s3758_s22  ;;  %v638_v8 = vsel %vm636_vm4, %v633_v56, %v635_v57 }
  0xca   : > { %932 = vrot.lane.b32.xlu0 %v637_v58, %s3763_s26 }
  0xcc   : > { %v719_v59 = vpop.permute.xlu0 %718  ;;  %v721_v60 = vpop.permute.xlu1 %720 }
  0xcd   : > { %970 = vrot.lane.b32.xlu1 %v679_v51, %s3763_s26  ;;  %v723_v5 = vsel %vm636_vm4, %v719_v59, %v721_v60 }
  0xce   : > { %827 = vrot.lane.b32.xlu0 %v763_v61, %s3758_s22 }
  0xd0   : > { %v765_v62 = vpop.permute.xlu0 %764  ;;  %v767_v63 = vpop.permute.xlu1 %766 }
  0xd1   : > { %797 = vrot.lane.b32.xlu1 %v721_v60, %s3758_s22  ;;  %v773_v11 = vsel %vm772_vm5, %v765_v62, %v767_v63 }
  0xd2   : > { %968 = vrot.lane.b32.xlu0 %v682_v2, %s3763_s26 }
  0xd4   : > { %v640_v3 = vpop.permute.xlu0 %639  ;;  %v642_v4 = vpop.permute.xlu1 %641 }
  0xd5   : > { %938 = vrot.lane.b32.xlu1 %v635_v57, %s3763_s26  ;;  %v648_v18 = vsel %vm647_vm6, %v640_v3, %v642_v4 }
  0xd6   : > { %795 = vrot.lane.b32.xlu0 %v723_v5, %s3758_s22 }
  0xd8   : > { %v725_v6 = vpop.permute.xlu0 %724  ;;  %v727_v7 = vpop.permute.xlu1 %726 }
  0xd9   : > { %833 = vrot.lane.b32.xlu1 %v767_v63, %s3758_s22  ;;  %v732_v14 = vsel %vm647_vm6, %v725_v6, %v727_v7 }
  0xda   : > { %936 = vrot.lane.b32.xlu0 %v638_v8, %s3763_s26 }
  0xdc   : > { %v684_v9 = vpop.permute.xlu0 %683  ;;  %v769_v10 = vpop.permute.xlu1 %768 }
  0xdd   : > { %801 = vrot.lane.b32.xlu1 %v727_v7, %s3758_s22 }
  0xde   : > { %831 = vrot.lane.b32.xlu0 %v773_v11, %s3758_s22 }
  0xe0   : > { %v771_v12 = vpop.permute.xlu0 %770  ;;  %v644_v13 = vpop.permute.xlu1 %643 }
  0xe1   : > { %942 = vrot.lane.b32.xlu1 %v642_v4, %s3763_s26  ;;  %v774_v15 = vsel %vm772_vm5, %v769_v10, %v771_v12 }
  0xe2   : > { %799 = vrot.lane.b32.xlu0 %v732_v14, %s3758_s22 }
  0xe4   : > { %v646_v16 = vpop.permute.xlu0 %645  ;;  %v729_v17 = vpop.permute.xlu1 %728 }
  0xe5   : > { %835 = vrot.lane.b32.xlu1 %v774_v15, %s3758_s22  ;;  %v649_v28 = vsel %vm647_vm6, %v644_v13, %v646_v16 }
  0xe6   : > { %940 = vrot.lane.b32.xlu0 %v648_v18, %s3763_s26 }
  0xe8   : > { %v731_v21 = vpop.permute.xlu0 %730  ;;  %v686_v22 = vpop.permute.xlu1 %685 }
  0xe9   : > { %v733_v23 = vsel %vm647_vm6, %v729_v17, %v731_v21 }
  0xea   : > { %972 = vrot.lane.b32.xlu0 %v684_v9, %s3763_s26  ;;  %803 = vrot.lane.b32.xlu1 %v733_v23, %s3758_s22 }
  0xec   : > { %v919_v26 = vpop.permute.xlu1 %918  ;;  %v917_v27 = vpop.permute.xlu0 %916 }
  0xed   : > { %v977_v40 = vsel %vm976_vm7, %v917_v27, %v919_v26 }
  0xee   : > { %837 = vrot.lane.b32.xlu0 %v771_v12, %s3758_s22  ;;  %944 = vrot.lane.b32.xlu1 %v649_v28, %s3763_s26 }
  0xf0   : > { %v923_v30 = vpop.permute.xlu1 %922  ;;  %v921_v32 = vpop.permute.xlu0 %920 }
  0xf1   : > { %v978_v51 = vsel %vm976_vm7, %v921_v32, %v923_v30 }
  0xf2   : > { %805 = vrot.lane.b32.xlu0 %v731_v21, %s3758_s22  ;;  %974 = vrot.lane.b32.xlu1 %v686_v22, %s3763_s26 }
  0xf4   : > { %v810_v33 = vpop.permute.xlu1 %809  ;;  %v808_v35 = vpop.permute.xlu0 %807 }
  0xf5   : > { %v845_v36 = vsel %vm625_vm2, %v808_v35, %v810_v33 }
  0xf6   : > { %946 = vrot.lane.b32.xlu0 %v646_v16, %s3763_s26  ;;  %3400 = vmatprep.subr.bf16.mxu0 %v845_v36 }
  0xf7   : > { %3401 = vmatpush3.bf16.msra.mxu0 %v4001_v31 }
  0xf8   : > { %v951_v37 = vpop.permute.xlu1 %950  ;;  %v949_v38 = vpop.permute.xlu0 %948 }
  0xf9   : > { %v985_v39 = vsel %vm976_vm7, %v949_v38, %v951_v37 }
  0xfa   : > { %1050 = vperm.xlu0 %3688, %v1047_v34   ;;  %3422 = vmatprep.subr.bf16.mxu1 %v985_v39 }
  0xfb   : > { %3423 = vmatpush3.bf16.msra.mxu1 %v977_v40 }
  0xfc   : > { %v814_v41 = vpop.permute.xlu1 %813 }
  0xfe   : > { %1278 = vrot.lane.b32.xlu0 %v3755_v1, %s3756_s29 }
 0x102   : > { %1280 = vrot.lane.b32.xlu0 %v3755_v1, %s3756_s29 }
 0x106   : > { %1359 = vrot.lane.b32.xlu0 %v3755_v1, %s3756_s29 }
 0x107   : > { %v818_v31 = vpop.permute.xlu1 %817 }
 0x108   : > { %v816_v42 = vpop.permute.xlu0 %815 }
 0x109   : > { %v847_v48 = vsel %vm625_vm2, %v816_v42, %v818_v31 }
 0x10a   : > { %1361 = vrot.lane.b32.xlu0 %v3755_v1, %s3756_s29 }
 0x10b   : > { %v955_v44 = vpop.permute.xlu1 %954 }
 0x10c   : > { %v812_v45 = vpop.permute.xlu0 %811 }
 0x10d   : > { %v846_v46 = vsel %vm625_vm2, %v812_v45, %v814_v41 }
 0x10e   : > { %3402 = vmatprep.subr.bf16.mxu0 %v846_v46  ;;  %1282 = vrot.lane.b32.xlu0 %v3755_v1, %s3756_s29 }
 0x10f   : > { %3403 = vmatpush3.bf16.msra.mxu0 %v4016_v43  ;;  %v959_v47 = vpop.permute.xlu1 %958 }
 0x110   : > { %v953_v49 = vpop.permute.xlu0 %952  ;;  %3404 = vmatprep.subr.bf16.mxu0 %v847_v48 }
 0x111   : > { %v986_v50 = vsel %vm976_vm7, %v953_v49, %v955_v44 }
 0x112   : > { %3424 = vmatprep.subr.bf16.mxu1 %v986_v50  ;;  %1288 = vrot.lane.b32.xlu0 %v3755_v1, %s3757_s21 }
 0x113   : > { %3425 = vmatpush3.bf16.msra.mxu1 %v978_v51  ;;  %v786_v52 = vpop.permute.xlu1 %785 }
 0x114   : > { %v957_v53 = vpop.permute.xlu0 %956 }
 0x115   : > { %v987_v54 = vsel %vm976_vm7, %v957_v53, %v959_v47 }
 0x116   : > { %3426 = vmatprep.subr.bf16.mxu1 %v987_v54  ;;  %1290 = vrot.lane.b32.xlu0 %v3755_v1, %s3757_s21  ;;  %v3354_v54 = vcombine.low %v4060_v19, %v4060_v19 }
 0x117   : > { %v927_v43 = vpop.permute.xlu1 %926 }
 0x118   : > { %v784_v55 = vpop.permute.xlu0 %783 }
 0x119   : > { %v839_v56 = vsel %vm625_vm2, %v784_v55, %v786_v52 }
 0x11a   : > { %3405 = vmatpush3.bf16.msra.mxu0 %v839_v56  ;;  %1369 = vrot.lane.b32.xlu0 %v3755_v1, %s3757_s21  ;;  %v3356_v56 = vcombine.low %v4068_v24, %v4068_v24 }
 0x11b   : > { %v822_v57 = vpop.permute.xlu1 %821 }
 0x11c   : > { %v925_v58 = vpop.permute.xlu0 %924 }
 0x11d   : > { %v979_v59 = vsel %vm976_vm7, %v925_v58, %v927_v43 }
 0x11e   : > { %3427 = vmatpush3.bf16.msra.mxu1 %v979_v59  ;;  %1371 = vrot.lane.b32.xlu0 %v3755_v1, %s3757_s21 }
 0x11f   : > { %v963_v60 = vpop.permute.xlu1 %962 }
 0x120   : > { %v820_v61 = vpop.permute.xlu0 %819 }
 0x121   : > { %v848_v62 = vsel %vm625_vm2, %v820_v61, %v822_v57 }
 0x122   : > { %3406 = vmatprep.subr.bf16.mxu0 %v848_v62  ;;  %1250 = vrot.lane.b32.xlu0 %v3755_v1, %s3758_s22 }
 0x123   : > { %v790_v63 = vpop.permute.xlu1 %789 }
 0x124   : > { %v961_v2 = vpop.permute.xlu0 %960 }
 0x125   : > { %v988_v3 = vsel %vm976_vm7, %v961_v2, %v963_v60 }
 0x126   : > { %3428 = vmatprep.subr.bf16.mxu1 %v988_v3  ;;  %1331 = vrot.lane.b32.xlu0 %v3755_v1, %s3758_s22 }
 0x127   : > { %v931_v4 = vpop.permute.xlu1 %930 }
 0x128   : > { %v788_v5 = vpop.permute.xlu0 %787 }
 0x129   : > { %v840_v6 = vsel %vm625_vm2, %v788_v5, %v790_v63 }
 0x12a   : > { %3407 = vmatpush3.bf16.msra.mxu0 %v840_v6  ;;  %1375 = vrot.lane.b32.xlu0 %v3755_v1, %s3757_s21 }
 0x12b   : > { %v826_v7 = vpop.permute.xlu1 %825 }
 0x12c   : > { %v929_v8 = vpop.permute.xlu0 %928 }
 0x12d   : > { %v980_v9 = vsel %vm976_vm7, %v929_v8, %v931_v4  ;;  %v1059_v8 = vld [vmem:[%s5474_s9] sm:$0x3] }
 0x12e   : > { %3429 = vmatpush3.bf16.msra.mxu1 %v980_v9  ;;  %1335 = vrot.lane.b32.xlu0 %v3755_v1, %s3758_s22 }
 0x12f   : > { %v967_v10 = vpop.permute.xlu1 %966 }
 0x130   : > { %v824_v11 = vpop.permute.xlu0 %823 }
 0x131   : > { %v849_v12 = vsel %vm625_vm2, %v824_v11, %v826_v7 }
 0x132   : > { %3408 = vmatprep.subr.bf16.mxu0 %v849_v12  ;;  %1300 = vrot.lane.b32.xlu0 %v3755_v1, %s3759_s2  ;;  %v1135_v12 = vld [vmem:[%s5478_s13] sm:$0xff] }
 0x133   : > { %v794_v13 = vpop.permute.xlu1 %793 }
 0x134   : > { %v965_v14 = vpop.permute.xlu0 %964 }
 0x135   : > { %v989_v15 = vsel %vm976_vm7, %v965_v14, %v967_v10 }
 0x136   : > { %3430 = vmatprep.subr.bf16.mxu1 %v989_v15  ;;  %1381 = vrot.lane.b32.xlu0 %v3755_v1, %s3759_s2 }
 0x137   : > { %v935_v16 = vpop.permute.xlu1 %934 }
 0x138   : > { %v792_v17 = vpop.permute.xlu0 %791 }
 0x139   : > { %v841_v18 = vsel %vm625_vm2, %v792_v17, %v794_v13 }
 0x13a   : > { %3409 = vmatpush3.bf16.msra.mxu0 %v841_v18  ;;  %1260 = vrot.lane.b32.xlu0 %v3755_v1, %s3760_s23 }
 0x13b   : > { %v830_v20 = vpop.permute.xlu1 %829 }
 0x13c   : > { %v933_v21 = vpop.permute.xlu0 %932 }
 0x13d   : > { %v981_v22 = vsel %vm976_vm7, %v933_v21, %v935_v16 }
 0x13e   : > { %3431 = vmatpush3.bf16.msra.mxu1 %v981_v22  ;;  %1341 = vrot.lane.b32.xlu0 %v3755_v1, %s3760_s23 }
 0x13f   : > { %v971_v23 = vpop.permute.xlu1 %970 }
 0x140   : > { %v828_v25 = vpop.permute.xlu0 %827 }
 0x141   : > { %v850_v26 = vsel %vm625_vm2, %v828_v25, %v830_v20 }
 0x142   : > { %3410 = vmatprep.subr.bf16.mxu0 %v850_v26  ;;  %1385 = vrot.lane.b32.xlu0 %v3755_v1, %s3759_s2 }
 0x143   : > { %v798_v27 = vpop.permute.xlu1 %797 }
 0x144   : > { %v969_v28 = vpop.permute.xlu0 %968 }
 0x145   : > { %v990_v29 = vsel %vm976_vm7, %v969_v28, %v971_v23 }
 0x146   : > { %3432 = vmatprep.subr.bf16.mxu1 %v990_v29  ;;  %1345 = vrot.lane.b32.xlu0 %v3755_v1, %s3760_s23 }
 0x147   : > { %v939_v30 = vpop.permute.xlu1 %938 }
 0x148   : > { %v796_v32 = vpop.permute.xlu0 %795 }
 0x149   : > { %v842_v33 = vsel %vm625_vm2, %v796_v32, %v798_v27 }
 0x14a   : > { %3411 = vmatpush3.bf16.msra.mxu0 %v842_v33  ;;  %1391 = vrot.lane.b32.xlu0 %v3755_v1, %s5486_s24 }
 0x14b   : > { %v834_v34 = vpop.permute.xlu1 %833 }
 0x14c   : > { %v937_v35 = vpop.permute.xlu0 %936 }
 0x14d   : > { %v982_v36 = vsel %vm976_vm7, %v937_v35, %v939_v30 }
 0x14e   : > { %3433 = vmatpush3.bf16.msra.mxu1 %v982_v36 }
 0x14f   : > { %v802_v37 = vpop.permute.xlu1 %801 }
 0x150   : > { %v832_v38 = vpop.permute.xlu0 %831 }
 0x151   : > { %v851_v39 = vsel %vm625_vm2, %v832_v38, %v834_v34 }
 0x152   : > { %3412 = vmatprep.subr.bf16.mxu0 %v851_v39 }
 0x153   : > { %v943_v40 = vpop.permute.xlu1 %942 }
 0x154   : > { %v800_v41 = vpop.permute.xlu0 %799 }
 0x155   : > { %v843_v31 = vsel %vm625_vm2, %v800_v41, %v802_v37 }
 0x156   : > { %3413 = vmatpush3.bf16.msra.mxu0 %v843_v31 }
 0x157   : > { %v836_v42 = vpop.permute.xlu1 %835 }
 0x158   : > { %v941_v44 = vpop.permute.xlu0 %940 }
 0x159   : > { %v983_v47 = vsel %vm976_vm7, %v941_v44, %v943_v40 }
 0x15c   : > { %v973_v45 = vpop.permute.xlu0 %972  ;;  %v804_v46 = vpop.permute.xlu1 %803 }
 0x15d   : > { %3434 = vmatprep.subr.bf16.mxu1 %v973_v45 }
 0x15e   : > { %3435 = vmatpush3.bf16.msra.mxu1 %v983_v47 }
 0x160   : > { %v838_v48 = vpop.permute.xlu0 %837  ;;  %v945_v49 = vpop.permute.xlu1 %944 }
 0x161   : > { %v852_v50 = vsel %vm625_vm2, %v836_v42, %v838_v48 }
 0x162   : > { %3414 = vmatprep.subr.bf16.mxu0 %v852_v50 }
 0x164   : > { %v806_v51 = vpop.permute.xlu0 %805  ;;  %v975_v52 = vpop.permute.xlu1 %974 }
 0x165   : > { %v844_v53 = vsel %vm625_vm2, %v804_v46, %v806_v51  ;;  %3436 = vmatprep.subr.bf16.mxu1 %v975_v52 }
 0x166   : > { %3415 = vmatpush3.bf16.msra.mxu0 %v844_v53 }
 0x167   : > { %3610 = vmatprep.subr.mxu0 %v3754_v0 }
 0x168   : > { %v947_v43 = vpop.permute.xlu0 %946 }
 0x169   : > { %902 = vmatmul.mubr.bf16.vlgmr.msra.gmra.mrb[0].mxu0 %v3354_v54  ;;  %v984_v55 = vsel %vm976_vm7, %v945_v49, %v947_v43 }
 0x16a   : > { %3437 = vmatpush3.bf16.msra.mxu1 %v984_v55  ;;  %3612 = vmatprep.mubr.msk.f32.mxu0 %vm3765_vm8, %v3754_v0 }
 0x16b   : > { %3615 = vmatprep.subr.mxu1 %v3754_v0 }
 0x16d   : > { %1040 = vmatmul.mubr.bf16.vlgmr.msra.gmra.mrb[0].mxu1 %v3356_v56 }
 0x16e   : > { %3617 = vmatprep.mubr.msk.f32.mxu1 %vm3765_vm8, %v3754_v0 }
 0x179   : > { %v1051_v4 = vpop.permute.xlu0 %1050 }
 0x17d   : > { %v1279_v13 = vpop.permute.xlu0 %1278 }
 0x181   : > { %v1281_v14 = vpop.permute.xlu0 %1280 }
 0x182   : > { %v1286_v20 = vsel %vm658_vm0, %v1279_v13, %v1281_v14 }
 0x185   : > { %v1360_v15 = vpop.permute.xlu0 %1359 }
 0x189   : > { %v1362_v16 = vpop.permute.xlu0 %1361 }
 0x18a   : > { %v1367_v17 = vsel %vm658_vm0, %v1360_v15, %v1362_v16 }
 0x18d   : > { %v4213_v18 = vpop.permute.xlu0 %1282 }
 0x191   : > { %v1289_v21 = vpop.permute.xlu0 %1288 }
 0x195   : > { %v1291_v22 = vpop.permute.xlu0 %1290 }
 0x196   : > { %v1296_v28 = vsel %vm669_vm1, %v1289_v21, %v1291_v22 }
 0x199   : > { %v1370_v23 = vpop.permute.xlu0 %1369 }
 0x19d   : > { %v1372_v26 = vpop.permute.xlu0 %1371 }
 0x19e   : > { %v1377_v27 = vsel %vm669_vm1, %v1370_v23, %v1372_v26 }
 0x1a1   : > { %v1251_v29 = vpop.permute.xlu0 %1250 }
 0x1a5   : > { %v1332_v32 = vpop.permute.xlu0 %1331 }
 0x1a9   : > { %v4233_v36 = vpop.permute.xlu0 %1375 }
 0x1ad   : > { %v4238_v38 = vpop.permute.xlu0 %1335 }
 0x1b1   : > { %v1301_v40 = vpop.permute.xlu0 %1300 }
 0x1b5   : > { %v1382_v31 = vpop.permute.xlu0 %1381 }
 0x1b9   : > { %v1261_v46 = vpop.permute.xlu0 %1260 }
 0x1bd   : > { %v1342_v48 = vpop.permute.xlu0 %1341 }
 0x23c   : > { %v3416_v57 = vpop.f32.mrb[0].mxu0 }
 0x23d   : > { %v3417_v58 = vpop.f32.mrb[1].mxu0 }
 0x23e   : > { %v3418_v59 = vadd.f32 %v3417_v58, %v3416_v57  ;;  %v3419_v60 = vpop.f32.mrb[2].mxu0 }
 0x23f   : > { %v3420_v61 = vpop.f32.mrb[3].mxu0  ;;  %v4278_v60 = vpop.permute.xlu0 %1385 }
 0x240   : > { %v3438_v19 = vpop.f32.mrb[0].mxu1 }
 0x241   : > { %v3439_v62 = vpop.f32.mrb[1].mxu1 }
 0x242   : > { %v3440_v63 = vadd.f32 %v3439_v62, %v3438_v19  ;;  %v3441_v2 = vpop.f32.mrb[2].mxu1 }
 0x243   : > { %v3442_v3 = vpop.f32.mrb[3].mxu1  ;;  %v4280_v19 = vpop.permute.xlu0 %1345 }
 0x244   : > { %v1042_v5 = vadd.f32 %v3440_v63, %v3418_v59 }
 0x246   : > { %v4159_v6 = vadd.f32 %v1051_v4, %v1042_v5  ;;  %v1239_v4 = vld [vmem:[#allocation2 + $0x50] sm:$0xff] }
 0x247   : > { %v1392_v63 = vpop.permute.xlu0 %1391 }
 0x248   : > { %v1054_v24 = vmax.f32 %v4159_v6, 0.0 }
 0x24a   : > { %1055 = vadd.xlane.f32.xlu1 %v1054_v24 }
 0x25b   : > { %1365 = vrot.lane.b32.xlu1 %v3755_v1, %s3756_s29 }
 0x25f   : > { %1248 = vrot.lane.b32.xlu1 %v3755_v1, %s3758_s22 }
 0x263   : > { %1329 = vrot.lane.b32.xlu1 %v3755_v1, %s3758_s22 }
 0x267   : > { %1292 = vrot.lane.b32.xlu1 %v3755_v1, %s3757_s21 }
 0x26b   : > { %1252 = vrot.lane.b32.xlu1 %v3755_v1, %s3758_s22 }
 0x26f   : > { %1298 = vrot.lane.b32.xlu1 %v3755_v1, %s3759_s2 }
 0x273   : > { %1379 = vrot.lane.b32.xlu1 %v3755_v1, %s3759_s2 }
 0x277   : > { %1258 = vrot.lane.b32.xlu1 %v3755_v1, %s3760_s23 }
 0x27b   : > { %1339 = vrot.lane.b32.xlu1 %v3755_v1, %s3760_s23 }
 0x27f   : > { %1302 = vrot.lane.b32.xlu1 %v3755_v1, %s3759_s2 }
 0x283   : > { %1262 = vrot.lane.b32.xlu1 %v3755_v1, %s3760_s23 }
 0x287   : > { %1389 = vrot.lane.b32.xlu1 %v3755_v1, %s5486_s24 }
 0x28b   : > { %1268 = vrot.lane.b32.xlu1 %v3755_v1, %s5488_s25 }
 0x28f   : > { %1349 = vrot.lane.b32.xlu1 %v3755_v1, %s5488_s25 }
 0x293   : > { %1308 = vrot.lane.b32.xlu1 %v3755_v1, %s5486_s24 }
 0x297   : > { %1395 = vrot.lane.b32.xlu1 %v3755_v1, %s5486_s24 }
 0x29b   : > { %1355 = vrot.lane.b32.xlu1 %v3755_v1, %s5488_s25 }
 0x29f   : > { %1431 = vrot.lane.b32.xlu1 %v1367_v17, %s3758_s22 }
 0x2a3   : > { %1572 = vrot.lane.b32.xlu1 %v1286_v20, %s3763_s26 }
 0x2a7   : > { %1540 = vrot.lane.b32.xlu1 %v3755_v1, %s3763_s26 }
 0x2ab   : > { %1544 = vrot.lane.b32.xlu1 %v3755_v1, %s3763_s26 }
 0x2af   : > { %1439 = vrot.lane.b32.xlu1 %v1377_v27, %s3758_s22 }
 0x2b3   : > { %1580 = vrot.lane.b32.xlu1 %v1296_v28, %s3763_s26 }
 0x2d7   : > { %v1056_v0 = vpop.xlane.xlu1 %1055 }
 0x2d8   : > { %v1058_v7 = vmul.f32 0.0078125, %v1056_v0 }
 0x2da   : > { %3611 = vmatpush3.msra.mxu0 %v1058_v7 }
 0x2db   : > { %3613 = vmatmul.mubr.msk.f32.vlgmr.msra.gmra.mrb[4].mxu0 %vm1060_vm9, %v1059_v8  ;;  %v4221_v25 = vpop.permute.xlu1 %1365 }
 0x2df   : > { %v1249_v30 = vpop.permute.xlu1 %1248 }
 0x2e0   : > { %v1256_v35 = vsel %vm625_vm2, %v1249_v30, %v1251_v29 }
 0x2e3   : > { %v1330_v33 = vpop.permute.xlu1 %1329 }
 0x2e4   : > { %v4228_v34 = vsel %vm625_vm2, %v1330_v33, %v1332_v32 }
 0x2e5   : > { %1407 = vrot.lane.b32.xlu1 %v4228_v34, %s3758_s22 }
 0x2e7   : > { %v4235_v37 = vpop.permute.xlu1 %1292 }
 0x2e9   : > { %1548 = vrot.lane.b32.xlu1 %v1256_v35, %s3763_s26 }
 0x2eb   : > { %v4240_v39 = vpop.permute.xlu1 %1252 }
 0x2ef   : > { %v1299_v41 = vpop.permute.xlu1 %1298 }
 0x2f0   : > { %v1306_v45 = vsel %vm680_vm3, %v1299_v41, %v1301_v40 }
 0x2f3   : > { %v1380_v42 = vpop.permute.xlu1 %1379 }
 0x2f4   : > { %v1387_v44 = vsel %vm680_vm3, %v1380_v42, %v1382_v31 }
 0x2f5   : > { %1447 = vrot.lane.b32.xlu1 %v1387_v44, %s3758_s22 }
 0x2f7   : > { %v1259_v47 = vpop.permute.xlu1 %1258 }
 0x2f8   : > { %v1266_v51 = vsel %vm636_vm4, %v1259_v47, %v1261_v46 }
 0x2f9   : > { %1588 = vrot.lane.b32.xlu1 %v1306_v45, %s3763_s26 }
 0x2fb   : > { %v1340_v49 = vpop.permute.xlu1 %1339 }
 0x2fc   : > { %v1347_v50 = vsel %vm636_vm4, %v1340_v49, %v1342_v48 }
 0x2fd   : > { %1415 = vrot.lane.b32.xlu1 %v1347_v50, %s3758_s22 }
 0x2ff   : > { %v4274_v57 = vpop.permute.xlu1 %1302 }
 0x301   : > { %1556 = vrot.lane.b32.xlu1 %v1266_v51, %s3763_s26 }
 0x303   : > { %v4276_v58 = vpop.permute.xlu1 %1262 }
 0x307   : > { %v1390_v59 = vpop.permute.xlu1 %1389 }
 0x30b   : > { %v1269_v61 = vpop.permute.xlu1 %1268 }
 0x30f   : > { %v1350_v62 = vpop.permute.xlu1 %1349 }
 0x313   : > { %v1309_v2 = vpop.permute.xlu1 %1308 }
 0x317   : > { %v4284_v0 = vpop.permute.xlu1 %1395 }
 0x3ae   : > { %v1130_v9 = vpop.f32.mrb[4].mxu0 }
 0x3af   : > { %v1134_v10 = vmax.f32 %v1130_v9, 0.0  ;;  %v3614_v11 = vpop.f32.mrb[5].mxu0 }
 0x3b1   : > { %3616 = vmatpush3.msk.msra.mxu1 %vm1140_vm10, %v1134_v10  ;;  %v4292_v10 = vpop.permute.xlu1 %1355 }
 0x3b2   : > { %3618 = vmatmul.mubr.msk.f32.vlgmr.msra.gmra.mrb[4].mxu1 %vm1136_vm11, %v1135_v12 }
 0x485   : > { %v1210_v52 = vpop.f32.mrb[4].mxu1 }
 0x486   : > { %v3361_v53 = vmul.f32 -1.442695, %v1210_v52  ;;  %v3619_v54 = vpop.f32.mrb[5].mxu1 }
 0x488   : > { %3714 = vpow2.f32 %v3361_v53 }
 0x492   : > { %v3715_v43 = vpop.eup %3714 }
 0x493   : > { %v1217_v55 = vadd.f32 1.0, %v3715_v43 }
 0x495   : > { %3716 = vrcp.f32 %v1217_v55 }
 0x49f   : > { %v3717_v56 = vpop.eup %3716 }
 0x4a0   : > { %1222 = vperm.xlu0 %3688, %v3717_v56  }
 0x4a4   : > { %1270 = vrot.lane.b32.xlu0 %v3755_v1, %s5488_s25 }
 0x4a8   : > { %1351 = vrot.lane.b32.xlu0 %v3755_v1, %s5488_s25 }
 0x4ac   : > { %1272 = vrot.lane.b32.xlu0 %v3755_v1, %s5488_s25 }
 0x4b0   : > { %1433 = vrot.lane.b32.xlu0 %v1362_v16, %s3758_s22  ;;  %v1397_v16 = vsel %vm772_vm5, %v1390_v59, %v1392_v63 }
 0x4b4   : > { %1574 = vrot.lane.b32.xlu0 %v1281_v14, %s3763_s26 }
 0x4b8   : > { %1542 = vrot.lane.b32.xlu0 %v3755_v1, %s3763_s26 }
 0x4bc   : > { %1437 = vrot.lane.b32.xlu0 %v4221_v25, %s3758_s22 }
 0x4c0   : > { %1441 = vrot.lane.b32.xlu0 %v1372_v26, %s3758_s22 }
 0x4c4   : > { %1582 = vrot.lane.b32.xlu0 %v1291_v22, %s3763_s26 }
 0x4c8   : > { %1409 = vrot.lane.b32.xlu0 %v1332_v32, %s3758_s22 }
 0x4cc   : > { %1550 = vrot.lane.b32.xlu0 %v1251_v29, %s3763_s26 }
 0x4d0   : > { %1445 = vrot.lane.b32.xlu0 %v4233_v36, %s3758_s22 }
 0x4d4   : > { %1413 = vrot.lane.b32.xlu0 %v4238_v38, %s3758_s22 }
 0x4d8   : > { %1449 = vrot.lane.b32.xlu0 %v1382_v31, %s3758_s22 }
 0x4dc   : > { %1590 = vrot.lane.b32.xlu0 %v1301_v40, %s3763_s26 }
 0x4e0   : > { %1417 = vrot.lane.b32.xlu0 %v1342_v48, %s3758_s22 }
 0x4e4   : > { %1558 = vrot.lane.b32.xlu0 %v1261_v46, %s3763_s26 }
 0x51f   : > { %v1223_v3 = vpop.permute.xlu0 %1222 }
 0x520   : > { %v1225_v5 = vmul.f32 %v1223_v3, %v1054_v24  ;;  %v1432_v24 = vpop.permute.xlu1 %1431 }
 0x522   : > { %1226 = vst [vmem:[#allocation2 + $0x38] sm:$0xff] %v1225_v5  ;;  %v4286_v7 = vpack.c.bf16 %v1239_v4, %v1225_v5 }
 0x523   : > { %v1271_v8 = vpop.permute.xlu0 %1270 }
 0x524   : > { %1284 = vrot.lane.b32.xlu0 %v4286_v7, %s3756_s29  ;;  %1373 = vrot.lane.b32.xlu1 %v4286_v7, %s3757_s21  ;;  %v1573_v13 = vpop.permute.xlu1 %1572  ;;  %v1276_v23 = vsel %vm647_vm6, %v1269_v61, %v1271_v8 }
 0x527   : > { %v1352_v9 = vpop.permute.xlu0 %1351 }
 0x528   : > { %1363 = vrot.lane.b32.xlu0 %v4286_v7, %s3756_s29  ;;  %1333 = vrot.lane.b32.xlu1 %v4286_v7, %s3758_s22  ;;  %v1541_v20 = vpop.permute.xlu1 %1540  ;;  %v1357_v22 = vsel %vm647_vm6, %v1350_v62, %v1352_v9 }
 0x52b   : > { %v4298_v6 = vpop.permute.xlu0 %1272 }
 0x52c   : > { %1294 = vrot.lane.b32.xlu0 %v4286_v7, %s3757_s21  ;;  %1383 = vrot.lane.b32.xlu1 %v4286_v7, %s3759_s2  ;;  %v4350_v30 = vpop.permute.xlu1 %1544 }
 0x52f   : > { %v1434_v11 = vpop.permute.xlu0 %1433 }
 0x530   : > { %v1469_v12 = vsel %vm625_vm2, %v1432_v24, %v1434_v11  ;;  %1254 = vrot.lane.b32.xlu0 %v4286_v7, %s3758_s22  ;;  %1343 = vrot.lane.b32.xlu1 %v4286_v7, %s3760_s23  ;;  %v4354_v33 = vpop.permute.xlu1 %1439 }
 0x531   : > { %3448 = vmatprep.subr.bf16.mxu0 %v1469_v12 }
 0x532   : > { %3449 = vmatpush3.bf16.msra.mxu0 %v4228_v34 }
 0x533   : > { %v1575_v14 = vpop.permute.xlu0 %1574 }
 0x534   : > { %v1608_v15 = vsel %vm976_vm7, %v1573_v13, %v1575_v14  ;;  %1304 = vrot.lane.b32.xlu0 %v4286_v7, %s3759_s2  ;;  %1274 = vrot.lane.b32.xlu1 %v4286_v7, %s5488_s25  ;;  %v4358_v35 = vpop.permute.xlu1 %1580  ;;  %v4450_v14 = vld [vmem:[#allocation2] sm:$0xff] }
 0x535   : > { %3470 = vmatprep.subr.bf16.mxu1 %v1608_v15  ;;  %v4454_v15 = vpack.c.bf16 %v4450_v14, %v4450_v14 }
 0x537   : > { %v1543_v17 = vpop.permute.xlu0 %1542 }
 0x538   : > { %v1600_v21 = vsel %vm976_vm7, %v1541_v20, %v1543_v17  ;;  %1264 = vrot.lane.b32.xlu0 %v4286_v7, %s3760_s23  ;;  %1455 = vrot.lane.b32.xlu1 %v1397_v16, %s3758_s22  ;;  %v4362_v41 = vpop.permute.xlu1 %1407 }
 0x539   : > { %3471 = vmatpush3.bf16.msra.mxu1 %v1600_v21 }
 0x53b   : > { %v4339_v26 = vpop.permute.xlu0 %1437 }
 0x53c   : > { %1393 = vrot.lane.b32.xlu0 %v4286_v7, %s5486_s24  ;;  %1423 = vrot.lane.b32.xlu1 %v1357_v22, %s3758_s22  ;;  %v4366_v42 = vpop.permute.xlu1 %1548 }
 0x53f   : > { %v4344_v27 = vpop.permute.xlu0 %1441 }
 0x540   : > { %1353 = vrot.lane.b32.xlu0 %v4286_v7, %s5488_s25  ;;  %1564 = vrot.lane.b32.xlu1 %v1276_v23, %s3763_s26  ;;  %v4368_v44 = vpop.permute.xlu1 %1447 }
 0x543   : > { %v4346_v28 = vpop.permute.xlu0 %1582 }
 0x544   : > { %1310 = vrot.lane.b32.xlu0 %v4286_v7, %s5486_s24  ;;  %1596 = vrot.lane.b32.xlu1 %v1309_v2, %s3763_s26  ;;  %v4372_v46 = vpop.permute.xlu1 %1588 }
 0x547   : > { %v4348_v29 = vpop.permute.xlu0 %1409 }
 0x548   : > { %1453 = vrot.lane.b32.xlu0 %v4278_v60, %s3758_s22  ;;  %1461 = vrot.lane.b32.xlu1 %v4284_v0, %s3758_s22  ;;  %v4376_v48 = vpop.permute.xlu1 %1415 }
 0x54b   : > { %v4352_v32 = vpop.permute.xlu0 %1550 }
 0x54c   : > { %1421 = vrot.lane.b32.xlu0 %v4280_v19, %s3758_s22  ;;  %v4381_v51 = vpop.permute.xlu1 %1556 }
 0x54f   : > { %v4356_v34 = vpop.permute.xlu0 %1445 }
 0x550   : > { %1457 = vrot.lane.b32.xlu0 %v1392_v63, %s3758_s22 }
 0x553   : > { %v4360_v40 = vpop.permute.xlu0 %1413 }
 0x554   : > { %1425 = vrot.lane.b32.xlu0 %v1352_v9, %s3758_s22 }
 0x557   : > { %v4364_v31 = vpop.permute.xlu0 %1449 }
 0x558   : > { %1566 = vrot.lane.b32.xlu0 %v1271_v8, %s3763_s26 }
 0x55b   : > { %v4370_v45 = vpop.permute.xlu0 %1590 }
 0x55c   : > { %1546 = vrot.lane.b32.xlu0 %v4286_v7, %s3763_s26 }
 0x55f   : > { %v4374_v47 = vpop.permute.xlu0 %1417 }
 0x563   : > { %v4378_v49 = vpop.permute.xlu0 %1558 }
 0x596   : > { %v1285_v50 = vpop.permute.xlu0 %1284  ;;  %v1374_v54 = vpop.permute.xlu1 %1373 }
 0x597   : > { %1578 = vrot.lane.b32.xlu0 %v1285_v50, %s3763_s26  ;;  %v1287_v55 = vsel %vm658_vm0, %v4213_v18, %v1285_v50  ;;  %v1378_v61 = vsel %vm669_vm1, %v1374_v54, %v4233_v36 }
 0x59a   : > { %v1364_v52 = vpop.permute.xlu0 %1363  ;;  %v1334_v56 = vpop.permute.xlu1 %1333 }
 0x59b   : > { %v1368_v53 = vsel %vm658_vm0, %v1364_v52, %v4221_v25  ;;  %v4400_v2 = vsel %vm625_vm2, %v1334_v56, %v4238_v38 }
 0x59c   : > { %1435 = vrot.lane.b32.xlu1 %v1368_v53, %s3758_s22 }
 0x59e   : > { %v1295_v43 = vpop.permute.xlu0 %1294  ;;  %v1384_v63 = vpop.permute.xlu1 %1383 }
 0x59f   : > { %1586 = vrot.lane.b32.xlu0 %v1295_v43, %s3763_s26  ;;  %v1297_v62 = vsel %vm669_vm1, %v4235_v37, %v1295_v43  ;;  %v1388_v38 = vsel %vm680_vm3, %v1384_v63, %v4278_v60  ;;  %v4426_v60 = vld [vmem:[%s5495_s30 + $0x8] sm:$0xff] }
 0x5a0   : > { %1576 = vrot.lane.b32.xlu1 %v1287_v55, %s3763_s26  ;;  %v3363_v24 = vcombine.high %v4426_v60, %v4426_v60 }
 0x5a2   : > { %v1255_v59 = vpop.permute.xlu0 %1254  ;;  %v1344_v36 = vpop.permute.xlu1 %1343  ;;  %1525 = vmatprep.mubr.bf16.mxu0 %v3363_v24 }
 0x5a3   : > { %1554 = vrot.lane.b32.xlu0 %v1255_v59, %s3763_s26  ;;  %v1257_v37 = vsel %vm625_vm2, %v4240_v39, %v1255_v59  ;;  %v1348_v11 = vsel %vm636_vm4, %v1344_v36, %v4280_v19  ;;  %v1670_v19 = vld [vmem:[%s5471_s6] sm:$0xff]  ;;  %v1471_v59 = vsel %vm625_vm2, %v4354_v33, %v4344_v27  ;;  %v1610_v27 = vsel %vm976_vm7, %v4358_v35, %v4346_v28 }
 0x5a4   : > { %1443 = vrot.lane.b32.xlu1 %v1378_v61, %s3758_s22 }
 0x5a6   : > { %v1305_v25 = vpop.permute.xlu0 %1304  ;;  %v1275_v9 = vpop.permute.xlu1 %1274 }
 0x5a7   : > { %1594 = vrot.lane.b32.xlu0 %v1305_v25, %s3763_s26  ;;  %v1277_v39 = vsel %vm647_vm6, %v4298_v6, %v1275_v9 }
 0x5a8   : > { %1584 = vrot.lane.b32.xlu1 %v1297_v62, %s3763_s26  ;;  %v1463_v62 = vsel %vm625_vm2, %v4362_v41, %v4348_v29  ;;  %v1602_v29 = vsel %vm976_vm7, %v4366_v42, %v4352_v32  ;;  %v1473_v32 = vsel %vm625_vm2, %v4368_v44, %v4364_v31  ;;  %v1465_v42 = vsel %vm625_vm2, %v4376_v48, %v4374_v47 }
 0x5a9   : > { %v1604_v31 = vsel %vm976_vm7, %v4381_v51, %v4378_v49 }
 0x5aa   : > { %v1265_v18 = vpop.permute.xlu0 %1264  ;;  %v4480_v16 = vpop.permute.xlu1 %1455 }
 0x5ab   : > { %1562 = vrot.lane.b32.xlu0 %v1265_v18, %s3763_s26  ;;  %v1267_v13 = vsel %vm636_vm4, %v4276_v58, %v1265_v18 }
 0x5ac   : > { %1411 = vrot.lane.b32.xlu1 %v4400_v2, %s3758_s22 }
 0x5ae   : > { %v1394_v3 = vpop.permute.xlu0 %1393  ;;  %v4486_v20 = vpop.permute.xlu1 %1423 }
 0x5af   : > { %v1398_v4 = vsel %vm772_vm5, %v1394_v3, %v4284_v0  ;;  %v1307_v0 = vsel %vm680_vm3, %v4274_v57, %v1305_v25  ;;  %v4435_v57 = vld [vmem:[%s5495_s30] sm:$0xff] }
 0x5b0   : > { %1459 = vrot.lane.b32.xlu0 %v1398_v4, %s3758_s22  ;;  %1552 = vrot.lane.b32.xlu1 %v1257_v37, %s3763_s26  ;;  %v3365_v6 = vcombine.high %v4435_v57, %v4435_v57 }
 0x5b2   : > { %v1354_v5 = vpop.permute.xlu0 %1353  ;;  %1662 = vmatprep.mubr.bf16.mxu1 %v3365_v6  ;;  %v4492_v22 = vpop.permute.xlu1 %1564 }
 0x5b3   : > { %v1358_v8 = vsel %vm647_vm6, %v1354_v5, %v4292_v10 }
 0x5b4   : > { %1427 = vrot.lane.b32.xlu0 %v1358_v8, %s3758_s22  ;;  %1451 = vrot.lane.b32.xlu1 %v1388_v38, %s3758_s22 }
 0x5b6   : > { %v1311_v12 = vpop.permute.xlu0 %1310  ;;  %v4498_v50 = vpop.permute.xlu1 %1596 }
 0x5b8   : > { %1592 = vrot.lane.b32.xlu1 %v1307_v0, %s3763_s26  ;;  %1568 = vrot.lane.b32.xlu0 %v1277_v39, %s3763_s26 }
 0x5ba   : > { %v4470_v58 = vpop.permute.xlu0 %1453  ;;  %v4504_v53 = vpop.permute.xlu1 %1461 }
 0x5bc   : > { %1419 = vrot.lane.b32.xlu1 %v1348_v11, %s3758_s22  ;;  %1598 = vrot.lane.b32.xlu0 %v1311_v12, %s3763_s26  ;;  %v3362_v12 = vcombine.low %v4426_v60, %v4426_v60 }
 0x5c0   : > { %1560 = vrot.lane.b32.xlu1 %v1267_v13, %s3763_s26 }
 0x5c4   : > { %1429 = vrot.lane.b32.xlu1 %v4292_v10, %s3758_s22  ;;  %v4476_v10 = vpop.permute.xlu0 %1421 }
 0x5c8   : > { %1570 = vrot.lane.b32.xlu1 %v1275_v9, %s3763_s26  ;;  %v4482_v17 = vpop.permute.xlu0 %1457 }
 0x5cc   : > { %1673 = vperm.xlu1 %3689, %v1670_v19   ;;  %v4490_v21 = vpop.permute.xlu0 %1425 }
 0x5cd   : > { %v1467_v8 = vsel %vm625_vm2, %v4486_v20, %v4490_v21 }
 0x5d0   : > { %1896 = vrot.lane.b32.xlu1 %v4454_v15, %s3756_s29  ;;  %v4496_v23 = vpop.permute.xlu0 %1566 }
 0x5d1   : > { %v1606_v24 = vsel %vm976_vm7, %v4492_v22, %v4496_v23 }
 0x5d4   : > { %1979 = vrot.lane.b32.xlu1 %v4454_v15, %s3756_s29  ;;  %v1547_v52 = vpop.permute.xlu0 %1546 }
 0x5d8   : > { %1900 = vrot.lane.b32.xlu1 %v4454_v15, %s3756_s29 }
 0x5dc   : > { %1902 = vrot.lane.b32.xlu1 %v4286_v7, %s3756_s29 }
 0x5e0   : > { %1981 = vrot.lane.b32.xlu1 %v4286_v7, %s3756_s29 }
 0x5e4   : > { %1906 = vrot.lane.b32.xlu1 %v4454_v15, %s3757_s21 }
 0x5e8   : > { %1989 = vrot.lane.b32.xlu1 %v4454_v15, %s3757_s21 }
 0x5ec   : > { %1866 = vrot.lane.b32.xlu1 %v4454_v15, %s3758_s22 }
 0x5f0   : > { %1910 = vrot.lane.b32.xlu1 %v4454_v15, %s3757_s21 }
 0x5f4   : > { %1991 = vrot.lane.b32.xlu1 %v4286_v7, %s3757_s21 }
 0x5f8   : > { %1870 = vrot.lane.b32.xlu1 %v4454_v15, %s3758_s22 }
 0x5fc   : > { %1951 = vrot.lane.b32.xlu1 %v4286_v7, %s3758_s22 }
 0x600   : > { %1916 = vrot.lane.b32.xlu1 %v4454_v15, %s3759_s2 }
 0x604   : > { %1876 = vrot.lane.b32.xlu1 %v4454_v15, %s3760_s23 }
 0x608   : > { %1920 = vrot.lane.b32.xlu1 %v4454_v15, %s3759_s2 }
 0x609   : > { %v1579_v54 = vpop.permute.xlu0 %1578 }
 0x60c   : > { %2001 = vrot.lane.b32.xlu1 %v4286_v7, %s3759_s2 }
 0x60e   : > { %v1436_v43 = vpop.permute.xlu1 %1435 }
 0x60f   : > { %v1470_v55 = vsel %vm625_vm2, %v1436_v43, %v4339_v26  ;;  %v1601_v26 = vsel %vm976_vm7, %v4350_v30, %v1547_v52 }
 0x610   : > { %1880 = vrot.lane.b32.xlu1 %v4454_v15, %s3760_s23  ;;  %3450 = vmatprep.subr.bf16.mxu0 %v1470_v55 }
 0x611   : > { %v1587_v56 = vpop.permute.xlu0 %1586  ;;  %3451 = vmatpush3.bf16.msra.mxu0 %v4400_v2 }
 0x612   : > { %3452 = vmatprep.subr.bf16.mxu0 %v1471_v59  ;;  %v1577_v61 = vpop.permute.xlu1 %1576 }
 0x613   : > { %v1609_v25 = vsel %vm976_vm7, %v1577_v61, %v1579_v54 }
 0x614   : > { %1961 = vrot.lane.b32.xlu1 %v4286_v7, %s3760_s23  ;;  %3472 = vmatprep.subr.bf16.mxu1 %v1609_v25 }
 0x615   : > { %v1555_v63 = vpop.permute.xlu0 %1554  ;;  %3453 = vmatpush3.bf16.msra.mxu0 %v1463_v62  ;;  %3473 = vmatpush3.bf16.msra.mxu1 %v1601_v26  ;;  %v1681_v26 = vld [vmem:[%s5475_s10] sm:$0x3] }
 0x616   : > { %3474 = vmatprep.subr.bf16.mxu1 %v1610_v27  ;;  %v1444_v33 = vpop.permute.xlu1 %1443 }
 0x617   : > { %v1472_v18 = vsel %vm625_vm2, %v1444_v33, %v4356_v34 }
 0x618   : > { %3454 = vmatprep.subr.bf16.mxu0 %v1472_v18  ;;  %1886 = vrot.lane.b32.xlu1 %v4454_v15, %s5488_s25 }
 0x619   : > { %3475 = vmatpush3.bf16.msra.mxu1 %v1602_v29  ;;  %v1595_v30 = vpop.permute.xlu0 %1594 }
 0x61a   : > { %v1585_v41 = vpop.permute.xlu1 %1584 }
 0x61b   : > { %v1611_v2 = vsel %vm976_vm7, %v1585_v41, %v1587_v56 }
 0x61c   : > { %3476 = vmatprep.subr.bf16.mxu1 %v1611_v2 }
 0x61d   : > { %v1563_v36 = vpop.permute.xlu0 %1562 }
 0x61e   : > { %v1412_v28 = vpop.permute.xlu1 %1411 }
 0x61f   : > { %v1464_v35 = vsel %vm625_vm2, %v1412_v28, %v4360_v40  ;;  %v1612_v40 = vsel %vm976_vm7, %v4372_v46, %v4370_v45  ;;  %v1475_v46 = vsel %vm625_vm2, %v4480_v16, %v4482_v17 }
 0x620   : > { %3455 = vmatpush3.bf16.msra.mxu0 %v1464_v35 }
 0x621   : > { %3456 = vmatprep.subr.bf16.mxu0 %v1473_v32 }
 0x622   : > { %v1553_v34 = vpop.permute.xlu1 %1552  ;;  %v1460_v4 = vpop.permute.xlu0 %1459 }
 0x623   : > { %v1603_v3 = vsel %vm976_vm7, %v1553_v34, %v1555_v63  ;;  %v1476_v0 = vsel %vm625_vm2, %v1460_v4, %v4504_v53 }
 0x624   : > { %3457 = vmatpush3.bf16.msra.mxu0 %v1465_v42  ;;  %3477 = vmatpush3.bf16.msra.mxu1 %v1603_v3  ;;  %v1756_v3 = vld [vmem:[%s5479_s14] sm:$0xff] }
 0x625   : > { %3478 = vmatprep.subr.bf16.mxu1 %v1612_v40 }
 0x626   : > { %v1452_v37 = vpop.permute.xlu1 %1451  ;;  %v1428_v5 = vpop.permute.xlu0 %1427 }
 0x627   : > { %v1474_v44 = vsel %vm625_vm2, %v1452_v37, %v4470_v58  ;;  %v3364_v58 = vcombine.low %v4435_v57, %v4435_v57 }
 0x628   : > { %3458 = vmatprep.subr.bf16.mxu0 %v1474_v44  ;;  %3479 = vmatpush3.bf16.msra.mxu1 %v1604_v31 }
 0x62a   : > { %v1593_v47 = vpop.permute.xlu1 %1592  ;;  %v1569_v49 = vpop.permute.xlu0 %1568 }
 0x62b   : > { %v1613_v48 = vsel %vm976_vm7, %v1593_v47, %v1595_v30 }
 0x62c   : > { %3480 = vmatprep.subr.bf16.mxu1 %v1613_v48 }
 0x62e   : > { %v1420_v38 = vpop.permute.xlu1 %1419  ;;  %v1599_v6 = vpop.permute.xlu0 %1598 }
 0x62f   : > { %v1466_v45 = vsel %vm625_vm2, %v1420_v38, %v4476_v10 }
 0x630   : > { %3459 = vmatpush3.bf16.msra.mxu0 %v1466_v45 }
 0x631   : > { %3460 = vmatprep.subr.bf16.mxu0 %v1475_v46 }
 0x632   : > { %v1561_v51 = vpop.permute.xlu1 %1560 }
 0x633   : > { %v1605_v9 = vsel %vm976_vm7, %v1561_v51, %v1563_v36 }
 0x634   : > { %3461 = vmatpush3.bf16.msra.mxu0 %v1467_v8  ;;  %3481 = vmatpush3.bf16.msra.mxu1 %v1605_v9 }
 0x635   : > { %3462 = vmatprep.subr.bf16.mxu0 %v1476_v0  ;;  %3482 = vmatprep.subr.bf16.mxu1 %v4498_v50 }
 0x636   : > { %v1430_v39 = vpop.permute.xlu1 %1429 }
 0x637   : > { %v1468_v11 = vsel %vm625_vm2, %v1428_v5, %v1430_v39 }
 0x638   : > { %3463 = vmatpush3.bf16.msra.mxu0 %v1468_v11  ;;  %3483 = vmatpush3.bf16.msra.mxu1 %v1606_v24 }
 0x639   : > { %3484 = vmatprep.subr.bf16.mxu1 %v1599_v6  ;;  %3620 = vmatprep.subr.mxu0 %v4450_v14 }
 0x63a   : > { %v1571_v13 = vpop.permute.xlu1 %1570 }
 0x63b   : > { %v1607_v19 = vsel %vm976_vm7, %v1569_v49, %v1571_v13  ;;  %1526 = vmatmul.mubr.bf16.vlgmr.msra.gmra.mrb[8].mxu0 %v3362_v12 }
 0x63c   : > { %3485 = vmatpush3.bf16.msra.mxu1 %v1607_v19  ;;  %3622 = vmatprep.mubr.msk.f32.mxu0 %vm3765_vm8, %v4450_v14 }
 0x63d   : > { %3625 = vmatprep.subr.mxu1 %v4450_v14 }
 0x63f   : > { %1663 = vmatmul.mubr.bf16.vlgmr.msra.gmra.mrb[8].mxu1 %v3364_v58 }
 0x640   : > { %3627 = vmatprep.mubr.msk.f32.mxu1 %vm3765_vm8, %v4450_v14 }
 0x64b   : > { %v1674_v53 = vpop.permute.xlu1 %1673 }
 0x64f   : > { %v4619_v55 = vpop.permute.xlu1 %1896 }
 0x653   : > { %v4623_v56 = vpop.permute.xlu1 %1979 }
 0x657   : > { %v1901_v59 = vpop.permute.xlu1 %1900 }
 0x65b   : > { %v1903_v61 = vpop.permute.xlu1 %1902 }
 0x65c   : > { %v1905_v51 = vsel %vm658_vm0, %v1901_v59, %v1903_v61 }
 0x65f   : > { %v1982_v63 = vpop.permute.xlu1 %1981 }
 0x663   : > { %v4635_v18 = vpop.permute.xlu1 %1906 }
 0x667   : > { %v4639_v30 = vpop.permute.xlu1 %1989 }
 0x66b   : > { %v4662_v47 = vpop.permute.xlu1 %1866 }
 0x66f   : > { %v1911_v5 = vpop.permute.xlu1 %1910 }
 0x673   : > { %v1992_v38 = vpop.permute.xlu1 %1991 }
 0x677   : > { %v1871_v45 = vpop.permute.xlu1 %1870 }
 0x67b   : > { %v1952_v49 = vpop.permute.xlu1 %1951 }
 0x67f   : > { %v4676_v8 = vpop.permute.xlu1 %1916 }
 0x683   : > { %v4682_v9 = vpop.permute.xlu1 %1876 }
 0x687   : > { %v1921_v11 = vpop.permute.xlu1 %1920 }
 0x68b   : > { %v2002_v13 = vpop.permute.xlu1 %2001 }
 0x68f   : > { %v1881_v58 = vpop.permute.xlu1 %1880 }
 0x70e   : > { %v3464_v60 = vpop.f32.mrb[8].mxu0 }
 0x70f   : > { %v3465_v10 = vpop.f32.mrb[9].mxu0 }
 0x710   : > { %v3466_v16 = vadd.f32 %v3465_v10, %v3464_v60  ;;  %v3467_v17 = vpop.f32.mrb[10].mxu0  ;;  %v1962_v60 = vpop.permute.xlu1 %1961 }
 0x711   : > { %v3468_v20 = vpop.f32.mrb[11].mxu0 }
 0x712   : > { %v3486_v21 = vpop.f32.mrb[8].mxu1 }
 0x713   : > { %v3487_v22 = vpop.f32.mrb[9].mxu1 }
 0x714   : > { %v3488_v23 = vadd.f32 %v3487_v22, %v3486_v21  ;;  %v3489_v50 = vpop.f32.mrb[10].mxu1  ;;  %v4695_v10 = vpop.permute.xlu1 %1886 }
 0x715   : > { %v3490_v57 = vpop.f32.mrb[11].mxu1 }
 0x716   : > { %v1665_v52 = vadd.f32 %v3488_v23, %v3466_v16 }
 0x718   : > { %v4580_v54 = vadd.f32 %v1674_v53, %v1665_v52 }
 0x71a   : > { %v1677_v43 = vmax.f32 %v4580_v54, 0.0 }
 0x71c   : > { %1678 = vadd.xlane.f32.xlu0 %v1677_v43 }
 0x732   : > { %1983 = vrot.lane.b32.xlu0 %v4454_v15, %s3756_s29 }
 0x736   : > { %1949 = vrot.lane.b32.xlu0 %v4454_v15, %s3758_s22 }
 0x73a   : > { %1912 = vrot.lane.b32.xlu0 %v4286_v7, %s3757_s21 }
 0x73e   : > { %1993 = vrot.lane.b32.xlu0 %v4454_v15, %s3757_s21 }
 0x742   : > { %1872 = vrot.lane.b32.xlu0 %v4286_v7, %s3758_s22 }
 0x746   : > { %1953 = vrot.lane.b32.xlu0 %v4454_v15, %s3758_s22 }
 0x74a   : > { %1999 = vrot.lane.b32.xlu0 %v4454_v15, %s3759_s2 }
 0x74e   : > { %1959 = vrot.lane.b32.xlu0 %v4454_v15, %s3760_s23 }
 0x752   : > { %1922 = vrot.lane.b32.xlu0 %v4286_v7, %s3759_s2 }
 0x756   : > { %2003 = vrot.lane.b32.xlu0 %v4454_v15, %s3759_s2 }
 0x75a   : > { %1882 = vrot.lane.b32.xlu0 %v4286_v7, %s3760_s23 }
 0x75e   : > { %1963 = vrot.lane.b32.xlu0 %v4454_v15, %s3760_s23 }
 0x762   : > { %2009 = vrot.lane.b32.xlu0 %v4454_v15, %s5496_s20 }
 0x766   : > { %1969 = vrot.lane.b32.xlu0 %v4454_v15, %s5488_s25 }
 0x76a   : > { %2011 = vrot.lane.b32.xlu0 %v4286_v7, %s5496_s20 }
 0x76e   : > { %1890 = vrot.lane.b32.xlu0 %v4454_v15, %s5488_s25 }
 0x772   : > { %1971 = vrot.lane.b32.xlu0 %v4286_v7, %s5488_s25 }
 0x776   : > { %1928 = vrot.lane.b32.xlu0 %v4286_v7, %s5496_s20 }
 0x77a   : > { %2051 = vrot.lane.b32.xlu0 %v4623_v56, %s3758_s22 }
 0x7a9   : > { %v1679_v25 = vpop.xlane.xlu0 %1678 }
 0x7aa   : > { %v1680_v62 = vmul.f32 0.0078125, %v1679_v25 }
 0x7ac   : > { %3621 = vmatpush3.msra.mxu0 %v1680_v62 }
 0x7ad   : > { %3623 = vmatmul.mubr.msk.f32.vlgmr.msra.gmra.mrb[6].mxu0 %vm1060_vm9, %v1681_v26  ;;  %v1984_v27 = vpop.permute.xlu0 %1983 }
 0x7ae   : > { %2055 = vrot.lane.b32.xlu0 %v1984_v27, %s3758_s22  ;;  %v1986_v46 = vsel %vm658_vm0, %v1982_v63, %v1984_v27 }
 0x7b1   : > { %v4632_v33 = vpop.permute.xlu0 %1949 }
 0x7b2   : > { %2196 = vrot.lane.b32.xlu0 %v1903_v61, %s3763_s26 }
 0x7b5   : > { %v1913_v29 = vpop.permute.xlu0 %1912 }
 0x7b6   : > { %2164 = vrot.lane.b32.xlu0 %v4286_v7, %s3763_s26  ;;  %v1915_v0 = vsel %vm669_vm1, %v1911_v5, %v1913_v29 }
 0x7b9   : > { %v1994_v41 = vpop.permute.xlu0 %1993 }
 0x7ba   : > { %2059 = vrot.lane.b32.xlu0 %v4639_v30, %s3758_s22 }
 0x7bd   : > { %v1873_v2 = vpop.permute.xlu0 %1872 }
 0x7be   : > { %2027 = vrot.lane.b32.xlu0 %v4632_v33, %s3758_s22  ;;  %v1875_v12 = vsel %vm625_vm2, %v1871_v45, %v1873_v2 }
 0x7c1   : > { %v1954_v28 = vpop.permute.xlu0 %1953 }
 0x7c2   : > { %2063 = vrot.lane.b32.xlu0 %v1994_v41, %s3758_s22  ;;  %v4687_v24 = vsel %vm625_vm2, %v1952_v49, %v1954_v28 }
 0x7c5   : > { %v4649_v35 = vpop.permute.xlu0 %1999 }
 0x7c6   : > { %2204 = vrot.lane.b32.xlu0 %v1913_v29, %s3763_s26 }
 0x7c9   : > { %v4653_v36 = vpop.permute.xlu0 %1959 }
 0x7ca   : > { %2031 = vrot.lane.b32.xlu0 %v1954_v28, %s3758_s22 }
 0x7cd   : > { %v1923_v39 = vpop.permute.xlu0 %1922 }
 0x7ce   : > { %2172 = vrot.lane.b32.xlu0 %v1873_v2, %s3763_s26  ;;  %v1925_v57 = vsel %vm680_vm3, %v1921_v11, %v1923_v39 }
 0x7d1   : > { %v2004_v6 = vpop.permute.xlu0 %2003 }
 0x7d2   : > { %2067 = vrot.lane.b32.xlu0 %v4649_v35, %s3758_s22  ;;  %v2006_v19 = vsel %vm680_vm3, %v2002_v13, %v2004_v6 }
 0x7d5   : > { %v1883_v21 = vpop.permute.xlu0 %1882 }
 0x7d6   : > { %2035 = vrot.lane.b32.xlu0 %v4653_v36, %s3758_s22  ;;  %v1885_v59 = vsel %vm636_vm4, %v1881_v58, %v1883_v21 }
 0x7d9   : > { %v1964_v22 = vpop.permute.xlu0 %1963 }
 0x7da   : > { %v1966_v54 = vsel %vm636_vm4, %v1962_v60, %v1964_v22 }
 0x7dd   : > { %v4712_v23 = vpop.permute.xlu0 %2009 }
 0x7e1   : > { %v4718_v50 = vpop.permute.xlu0 %1969 }
 0x7e5   : > { %v2012_v52 = vpop.permute.xlu0 %2011 }
 0x7e9   : > { %v1891_v53 = vpop.permute.xlu0 %1890 }
 0x7ed   : > { %v1972_v25 = vpop.permute.xlu0 %1971 }
 0x7f1   : > { %v1929_v62 = vpop.permute.xlu0 %1928 }
 0x7f5   : > { %v4741_v63 = vpop.permute.xlu0 %2051 }
 0x820   : > { %v4744_v29 = vpop.permute.xlu0 %2055 }
 0x880   : > { %v1751_v32 = vpop.f32.mrb[6].mxu0 }
 0x881   : > { %v1755_v34 = vmax.f32 %v1751_v32, 0.0  ;;  %v3624_v42 = vpop.f32.mrb[7].mxu0 }
 0x883   : > { %3626 = vmatpush3.msk.msra.mxu1 %vm1140_vm10, %v1755_v34 }
 0x884   : > { %3628 = vmatmul.mubr.msk.f32.vlgmr.msra.gmra.mrb[6].mxu1 %vm1136_vm11, %v1756_v3 }
 0x957   : > { %v1829_v40 = vpop.f32.mrb[6].mxu1 }
 0x958   : > { %v3369_v4 = vmul.f32 -1.442695, %v1829_v40  ;;  %v3629_v37 = vpop.f32.mrb[7].mxu1 }
 0x95a   : > { %3718 = vpow2.f32 %v3369_v4 }
 0x964   : > { %v3719_v31 = vpop.eup %3718 }
 0x965   : > { %v1836_v44 = vadd.f32 1.0, %v3719_v31 }
 0x967   : > { %3720 = vrcp.f32 %v1836_v44 }
 0x971   : > { %v3721_v48 = vpop.eup %3720 }
 0x972   : > { %1841 = vperm.xlu1 %3689, %v3721_v48  }
 0x976   : > { %2013 = vrot.lane.b32.xlu1 %v4454_v15, %s5496_s20 }
 0x97a   : > { %1892 = vrot.lane.b32.xlu1 %v4286_v7, %s5488_s25  ;;  %v1996_v7 = vsel %vm669_vm1, %v1992_v38, %v1994_v41  ;;  %v4747_v41 = vpop.permute.xlu0 %2196 }
 0x97e   : > { %1973 = vrot.lane.b32.xlu1 %v4454_v15, %s5488_s25  ;;  %v4751_v28 = vpop.permute.xlu0 %2164 }
 0x982   : > { %2158 = vrot.lane.b32.xlu1 %v4454_v15, %s3763_s26  ;;  %v4755_v34 = vpop.permute.xlu0 %2059 }
 0x986   : > { %2053 = vrot.lane.b32.xlu1 %v1986_v46, %s3758_s22  ;;  %v4759_v3 = vpop.permute.xlu0 %2027 }
 0x98a   : > { %2194 = vrot.lane.b32.xlu1 %v1905_v51, %s3763_s26  ;;  %v4763_v4 = vpop.permute.xlu0 %2063 }
 0x98e   : > { %2162 = vrot.lane.b32.xlu1 %v4454_v15, %s3763_s26  ;;  %v4767_v31 = vpop.permute.xlu0 %2204 }
 0x992   : > { %2061 = vrot.lane.b32.xlu1 %v1996_v7, %s3758_s22  ;;  %v4771_v48 = vpop.permute.xlu0 %2031 }
 0x996   : > { %2202 = vrot.lane.b32.xlu1 %v1915_v0, %s3763_s26  ;;  %v4775_v38 = vpop.permute.xlu0 %2172 }
 0x99a   : > { %2029 = vrot.lane.b32.xlu1 %v4687_v24, %s3758_s22  ;;  %v4779_v46 = vpop.permute.xlu0 %2067 }
 0x99e   : > { %2170 = vrot.lane.b32.xlu1 %v1875_v12, %s3763_s26  ;;  %v4783_v51 = vpop.permute.xlu0 %2035 }
 0x9a2   : > { %2069 = vrot.lane.b32.xlu1 %v2006_v19, %s3758_s22 }
 0x9f1   : > { %v1842_v16 = vpop.permute.xlu1 %1841 }
 0x9f2   : > { %v4699_v17 = vmul.f32 %v1842_v16, %v1677_v43 }
 0x9f4   : > { %1845 = vst [vmem:[#allocation2 + $0x20] sm:$0xff] %v4699_v17  ;;  %v1859_v20 = vpack.c.bf16 %v4699_v17, %v4450_v14 }
 0x9f5   : > { %v2014_v43 = vpop.permute.xlu1 %2013 }
 0x9f6   : > { %1868 = vrot.lane.b32.xlu0 %v1859_v20, %s3758_s22  ;;  %1898 = vrot.lane.b32.xlu1 %v1859_v20, %s3756_s29  ;;  %v2016_v61 = vsel %vm772_vm5, %v2012_v52, %v2014_v43 }
 0x9f9   : > { %v4739_v26 = vpop.permute.xlu1 %1892 }
 0x9fa   : > { %1918 = vrot.lane.b32.xlu0 %v1859_v20, %s3759_s2  ;;  %1977 = vrot.lane.b32.xlu1 %v1859_v20, %s3756_s29 }
 0x9fd   : > { %v1974_v27 = vpop.permute.xlu1 %1973 }
 0x9fe   : > { %1878 = vrot.lane.b32.xlu0 %v1859_v20, %s3760_s23  ;;  %1908 = vrot.lane.b32.xlu1 %v1859_v20, %s3757_s21  ;;  %v1976_v11 = vsel %vm647_vm6, %v1972_v25, %v1974_v27 }
 0xa01   : > { %v4749_v2 = vpop.permute.xlu1 %2158 }
 0xa02   : > { %2071 = vrot.lane.b32.xlu0 %v2004_v6, %s3758_s22  ;;  %1987 = vrot.lane.b32.xlu1 %v1859_v20, %s3757_s21 }
 0xa05   : > { %v4753_v32 = vpop.permute.xlu1 %2053 }
 0xa06   : > { %1888 = vrot.lane.b32.xlu0 %v1859_v20, %s5488_s25  ;;  %1947 = vrot.lane.b32.xlu1 %v1859_v20, %s3758_s22 }
 0xa09   : > { %v4757_v42 = vpop.permute.xlu1 %2194 }
 0xa0a   : > { %2212 = vrot.lane.b32.xlu0 %v1923_v39, %s3763_s26  ;;  %1997 = vrot.lane.b32.xlu1 %v1859_v20, %s3759_s2 }
 0xa0d   : > { %v4761_v40 = vpop.permute.xlu1 %2162 }
 0xa0e   : > { %2039 = vrot.lane.b32.xlu0 %v1964_v22, %s3758_s22  ;;  %2210 = vrot.lane.b32.xlu1 %v1925_v57, %s3763_s26 }
 0xa11   : > { %v4765_v37 = vpop.permute.xlu1 %2061 }
 0xa12   : > { %2180 = vrot.lane.b32.xlu0 %v1883_v21, %s3763_s26  ;;  %1957 = vrot.lane.b32.xlu1 %v1859_v20, %s3760_s23  ;;  %v1895_v21 = vsel %vm647_vm6, %v1891_v53, %v4739_v26 }
 0xa15   : > { %v4769_v44 = vpop.permute.xlu1 %2202 }
 0xa16   : > { %2075 = vrot.lane.b32.xlu0 %v4712_v23, %s3758_s22  ;;  %2007 = vrot.lane.b32.xlu1 %v1859_v20, %s5496_s20 }
 0xa19   : > { %v4773_v5 = vpop.permute.xlu1 %2029 }
 0xa1a   : > { %2043 = vrot.lane.b32.xlu0 %v4718_v50, %s3758_s22  ;;  %2037 = vrot.lane.b32.xlu1 %v1966_v54, %s3758_s22 }
 0xa1d   : > { %v4777_v45 = vpop.permute.xlu1 %2170 }
 0xa1e   : > { %2178 = vrot.lane.b32.xlu1 %v1885_v59, %s3763_s26  ;;  %2077 = vrot.lane.b32.xlu0 %v2016_v61, %s3758_s22 }
 0xa21   : > { %v4781_v49 = vpop.permute.xlu1 %2069 }
 0xa22   : > { %2160 = vrot.lane.b32.xlu0 %v1859_v20, %s3763_s26  ;;  %2079 = vrot.lane.b32.xlu1 %v2014_v43, %s3758_s22 }
 0xa26   : > { %1967 = vrot.lane.b32.xlu1 %v1859_v20, %s5488_s25 }
 0xa2a   : > { %1926 = vrot.lane.b32.xlu1 %v1859_v20, %s5496_s20 }
 0xa2e   : > { %2047 = vrot.lane.b32.xlu1 %v1974_v27, %s3758_s22 }
 0xa68   : > { %v1899_v7 = vpop.permute.xlu1 %1898  ;;  %v1869_v0 = vpop.permute.xlu0 %1868 }
 0xa69   : > { %2192 = vrot.lane.b32.xlu0 %v1899_v7, %s3763_s26  ;;  %v1904_v27 = vsel %vm658_vm0, %v4619_v55, %v1899_v7  ;;  %v1874_v55 = vsel %vm625_vm2, %v4662_v47, %v1869_v0 }
 0xa6c   : > { %v1978_v39 = vpop.permute.xlu1 %1977  ;;  %v1919_v6 = vpop.permute.xlu0 %1918 }
 0xa6d   : > { %2045 = vrot.lane.b32.xlu0 %v1976_v11, %s3758_s22  ;;  %v1985_v53 = vsel %vm658_vm0, %v1978_v39, %v4623_v56  ;;  %v2288_v39 = vld [vmem:[%s5472_s7] sm:$0xff] }
 0xa70   : > { %v1909_v12 = vpop.permute.xlu1 %1908  ;;  %v1879_v19 = vpop.permute.xlu0 %1878 }
 0xa71   : > { %2200 = vrot.lane.b32.xlu0 %v1909_v12, %s3763_s26  ;;  %v1914_v11 = vsel %vm669_vm1, %v4635_v18, %v1909_v12  ;;  %v1924_v18 = vsel %vm680_vm3, %v4676_v8, %v1919_v6  ;;  %v1884_v47 = vsel %vm636_vm4, %v4682_v9, %v1879_v19  ;;  %v2475_v12 = vld [vmem:[#allocation2 + $0x50] sm:$0xff] }
 0xa74   : > { %v1988_v13 = vpop.permute.xlu1 %1987  ;;  %v4792_v16 = vpop.permute.xlu0 %2071 }
 0xa75   : > { %2168 = vrot.lane.b32.xlu0 %v1869_v0, %s3763_s26 }
 0xa78   : > { %v1948_v58 = vpop.permute.xlu1 %1947  ;;  %v1889_v22 = vpop.permute.xlu0 %1888 }
 0xa79   : > { %2208 = vrot.lane.b32.xlu0 %v1919_v6, %s3763_s26  ;;  %v1955_v56 = vsel %vm625_vm2, %v1948_v58, %v4632_v33 }
 0xa7c   : > { %v1998_v60 = vpop.permute.xlu1 %1997 }
 0xa7d   : > { %2176 = vrot.lane.b32.xlu0 %v1879_v19, %s3763_s26 }
 0xa80   : > { %v4794_v20 = vpop.permute.xlu1 %2210 }
 0xa81   : > { %2186 = vrot.lane.b32.xlu0 %v1895_v21, %s3763_s26 }
 0xa84   : > { %v1958_v57 = vpop.permute.xlu1 %1957 }
 0xa85   : > { %2184 = vrot.lane.b32.xlu0 %v1889_v22, %s3763_s26  ;;  %v1965_v33 = vsel %vm636_vm4, %v1958_v57, %v4653_v36  ;;  %v4850_v36 = vld [vmem:[%s5468_s3] sm:$0xff] }
 0xa86   : > { %v3373_v9 = vcombine.high %v4850_v36, %v4850_v36 }
 0xa88   : > { %v2008_v52 = vpop.permute.xlu1 %2007  ;;  %2280 = vmatprep.mubr.bf16.mxu1 %v3373_v9 }
 0xa89   : > { %2216 = vrot.lane.b32.xlu0 %v1929_v62, %s3763_s26  ;;  %v1995_v62 = vsel %vm669_vm1, %v1988_v13, %v4639_v30  ;;  %v2005_v30 = vsel %vm680_vm3, %v1998_v60, %v4649_v35  ;;  %v4841_v35 = vld [vmem:[%s5468_s3 + $0x8] sm:$0xff]  ;;  %v2015_v7 = vsel %vm772_vm5, %v2008_v52, %v4712_v23  ;;  %v1894_v23 = vsel %vm647_vm6, %v4695_v10, %v1889_v22 }
 0xa8a   : > { %v3371_v8 = vcombine.high %v4841_v35, %v4841_v35 }
 0xa8c   : > { %v4801_v54 = vpop.permute.xlu1 %2037  ;;  %2143 = vmatprep.mubr.bf16.mxu0 %v3371_v8 }
 0xa90   : > { %v4803_v43 = vpop.permute.xlu1 %2178 }
 0xa94   : > { %v4805_v59 = vpop.permute.xlu1 %2079 }
 0xa98   : > { %v1968_v61 = vpop.permute.xlu1 %1967 }
 0xa99   : > { %v1975_v0 = vsel %vm647_vm6, %v1968_v61, %v4718_v50  ;;  %v2473_v50 = vld [vmem:[#allocation2 + $0x38] sm:$0xff] }
 0xa9a   : > { %v4872_v10 = vpack.c.bf16 %v2475_v12, %v2473_v50 }
 0xa9c   : > { %v1927_v25 = vpop.permute.xlu1 %1926 }
 0xa9d   : > { %2214 = vrot.lane.b32.xlu1 %v1927_v25, %s3763_s26 }
 0xaa0   : > { %v4904_v21 = vpop.permute.xlu1 %2047 }
 0xaa1   : > { %2049 = vrot.lane.b32.xlu1 %v1985_v53, %s3758_s22  ;;  %v2088_v53 = vsel %vm625_vm2, %v4753_v32, %v4744_v29 }
 0xaa5   : > { %2190 = vrot.lane.b32.xlu1 %v1904_v27, %s3763_s26 }
 0xaa9   : > { %2057 = vrot.lane.b32.xlu1 %v1995_v62, %s3758_s22 }
 0xaad   : > { %2198 = vrot.lane.b32.xlu1 %v1914_v11, %s3763_s26 }
 0xab1   : > { %2025 = vrot.lane.b32.xlu1 %v1955_v56, %s3758_s22 }
 0xab5   : > { %2166 = vrot.lane.b32.xlu1 %v1874_v55, %s3763_s26 }
 0xab9   : > { %2065 = vrot.lane.b32.xlu1 %v2005_v30, %s3758_s22 }
 0xabd   : > { %2206 = vrot.lane.b32.xlu1 %v1924_v18, %s3763_s26  ;;  %v2082_v18 = vsel %vm625_vm2, %v4773_v5, %v4771_v48 }
 0xac1   : > { %2033 = vrot.lane.b32.xlu1 %v1965_v33, %s3758_s22 }
 0xac5   : > { %2174 = vrot.lane.b32.xlu1 %v1884_v47, %s3763_s26 }
 0xac9   : > { %2073 = vrot.lane.b32.xlu1 %v2015_v7, %s3758_s22 }
 0xacd   : > { %2041 = vrot.lane.b32.xlu1 %v1975_v0, %s3758_s22 }
 0xad1   : > { %2182 = vrot.lane.b32.xlu1 %v1894_v23, %s3763_s26 }
 0xad5   : > { %2188 = vrot.lane.b32.xlu1 %v4739_v26, %s3763_s26  ;;  %v4876_v26 = vpop.permute.xlu0 %2212 }
 0xad9   : > { %2291 = vperm.xlu1 %3689, %v2288_v39   ;;  %v4880_v6 = vpop.permute.xlu0 %2039 }
 0xadd   : > { %2514 = vrot.lane.b32.xlu1 %v4454_v15, %s3756_s29  ;;  %v4886_v13 = vpop.permute.xlu0 %2180 }
 0xae1   : > { %2600 = vrot.lane.b32.xlu1 %v4454_v15, %s3756_s29  ;;  %v4890_v19 = vpop.permute.xlu0 %2075 }
 0xae5   : > { %2518 = vrot.lane.b32.xlu1 %v4454_v15, %s3756_s29  ;;  %v4896_v58 = vpop.permute.xlu0 %2043 }
 0xae9   : > { %2520 = vrot.lane.b32.xlu1 %v4872_v10, %s3756_s29  ;;  %v4900_v60 = vpop.permute.xlu0 %2077 }
 0xaed   : > { %2602 = vrot.lane.b32.xlu1 %v4872_v10, %s3756_s29  ;;  %v2161_v22 = vpop.permute.xlu0 %2160 }
 0xaee   : > { %v2218_v11 = vsel %vm976_vm7, %v4749_v2, %v2161_v22  ;;  %v2219_v2 = vsel %vm976_vm7, %v4761_v40, %v4751_v28  ;;  %v2090_v28 = vsel %vm625_vm2, %v4765_v37, %v4763_v4  ;;  %v2221_v37 = vsel %vm976_vm7, %v4777_v45, %v4775_v38 }
 0xaef   : > { %v2092_v38 = vsel %vm625_vm2, %v4781_v49, %v4792_v16  ;;  %v2223_v49 = vsel %vm976_vm7, %v4803_v43, %v4886_v13 }
 0xaf1   : > { %2524 = vrot.lane.b32.xlu1 %v4454_v15, %s3757_s21  ;;  %v2193_v52 = vpop.permute.xlu0 %2192 }
 0xaf5   : > { %2610 = vrot.lane.b32.xlu1 %v4454_v15, %s3757_s21  ;;  %v4922_v55 = vpop.permute.xlu0 %2045 }
 0xaf6   : > { %v2086_v43 = vsel %vm625_vm2, %v4922_v55, %v4904_v21 }
 0xaf9   : > { %2484 = vrot.lane.b32.xlu1 %v4454_v15, %s3758_s22 }
 0xafd   : > { %2570 = vrot.lane.b32.xlu1 %v4454_v15, %s3758_s22 }
 0xb01   : > { %2530 = vrot.lane.b32.xlu1 %v4872_v10, %s3757_s21 }
 0xb05   : > { %2614 = vrot.lane.b32.xlu1 %v4454_v15, %s3757_s21 }
 0xb09   : > { %2490 = vrot.lane.b32.xlu1 %v4872_v10, %s3758_s22 }
 0xb0d   : > { %2574 = vrot.lane.b32.xlu1 %v4454_v15, %s3758_s22 }
 0xb0f   : > { %v4908_v57 = vpop.permute.xlu1 %2214 }
 0xb11   : > { %2620 = vrot.lane.b32.xlu1 %v4454_v15, %s3759_s2 }
 0xb13   : > { %v2050_v61 = vpop.permute.xlu1 %2049 }
 0xb14   : > { %v2087_v25 = vsel %vm625_vm2, %v2050_v61, %v4741_v63  ;;  %v2227_v63 = vsel %vm976_vm7, %v4757_v42, %v4747_v41 }
 0xb15   : > { %2580 = vrot.lane.b32.xlu1 %v4454_v15, %s3760_s23  ;;  %3496 = vmatprep.subr.bf16.mxu0 %v2087_v25 }
 0xb16   : > { %3497 = vmatpush3.bf16.msra.mxu0 %v1955_v56 }
 0xb17   : > { %3498 = vmatprep.subr.bf16.mxu0 %v2088_v53  ;;  %v2191_v27 = vpop.permute.xlu1 %2190 }
 0xb18   : > { %v2226_v62 = vsel %vm976_vm7, %v2191_v27, %v2193_v52 }
 0xb19   : > { %2540 = vrot.lane.b32.xlu1 %v4872_v10, %s3759_s2  ;;  %3518 = vmatprep.subr.bf16.mxu1 %v2226_v62 }
 0xb1a   : > { %3499 = vmatpush3.bf16.msra.mxu0 %v4687_v24  ;;  %3519 = vmatpush3.bf16.msra.mxu1 %v2218_v11  ;;  %v2201_v24 = vpop.permute.xlu0 %2200 }
 0xb1b   : > { %3520 = vmatprep.subr.bf16.mxu1 %v2227_v63  ;;  %v2058_v29 = vpop.permute.xlu1 %2057 }
 0xb1c   : > { %v2089_v32 = vsel %vm625_vm2, %v2058_v29, %v4755_v34 }
 0xb1d   : > { %2624 = vrot.lane.b32.xlu1 %v4454_v15, %s3759_s2  ;;  %3500 = vmatprep.subr.bf16.mxu0 %v2089_v32 }
 0xb1e   : > { %3521 = vmatpush3.bf16.msra.mxu1 %v2219_v2  ;;  %v2169_v42 = vpop.permute.xlu0 %2168 }
 0xb1f   : > { %v2199_v56 = vpop.permute.xlu1 %2198 }
 0xb20   : > { %v2228_v30 = vsel %vm976_vm7, %v2199_v56, %v2201_v24 }
 0xb21   : > { %2500 = vrot.lane.b32.xlu1 %v4872_v10, %s3760_s23  ;;  %3522 = vmatprep.subr.bf16.mxu1 %v2228_v30 }
 0xb22   : > { %v2209_v5 = vpop.permute.xlu0 %2208 }
 0xb23   : > { %v2026_v41 = vpop.permute.xlu1 %2025 }
 0xb24   : > { %v2081_v34 = vsel %vm625_vm2, %v2026_v41, %v4759_v3  ;;  %v2229_v3 = vsel %vm976_vm7, %v4769_v44, %v4767_v31 }
 0xb25   : > { %3501 = vmatpush3.bf16.msra.mxu0 %v2081_v34  ;;  %2584 = vrot.lane.b32.xlu1 %v4454_v15, %s3760_s23 }
 0xb26   : > { %3502 = vmatprep.subr.bf16.mxu0 %v2090_v28  ;;  %v2177_v31 = vpop.permute.xlu0 %2176 }
 0xb27   : > { %v2167_v40 = vpop.permute.xlu1 %2166 }
 0xb28   : > { %v2220_v33 = vsel %vm976_vm7, %v2167_v40, %v2169_v42 }
 0xb29   : > { %3503 = vmatpush3.bf16.msra.mxu0 %v2082_v18  ;;  %3523 = vmatpush3.bf16.msra.mxu1 %v2220_v33  ;;  %v2299_v18 = vld [vmem:[%s5476_s11] sm:$0x3] }
 0xb2a   : > { %3524 = vmatprep.subr.bf16.mxu1 %v2229_v3  ;;  %2630 = vrot.lane.b32.xlu1 %v4454_v15, %s5496_s20  ;;  %v2187_v0 = vpop.permute.xlu0 %2186 }
 0xb2b   : > { %v2066_v4 = vpop.permute.xlu1 %2065 }
 0xb2c   : > { %v2091_v48 = vsel %vm625_vm2, %v2066_v4, %v4779_v46  ;;  %v2084_v46 = vsel %vm625_vm2, %v4801_v54, %v4880_v6  ;;  %v3370_v6 = vcombine.low %v4841_v35, %v4841_v35 }
 0xb2d   : > { %3504 = vmatprep.subr.bf16.mxu0 %v2091_v48  ;;  %3525 = vmatpush3.bf16.msra.mxu1 %v2221_v37 }
 0xb2e   : > { %v2185_v54 = vpop.permute.xlu0 %2184 }
 0xb2f   : > { %v2207_v47 = vpop.permute.xlu1 %2206 }
 0xb30   : > { %v2230_v8 = vsel %vm976_vm7, %v2207_v47, %v2209_v5 }
 0xb31   : > { %3526 = vmatprep.subr.bf16.mxu1 %v2230_v8 }
 0xb32   : > { %v2217_v13 = vpop.permute.xlu0 %2216 }
 0xb33   : > { %v2034_v44 = vpop.permute.xlu1 %2033 }
 0xb34   : > { %v2083_v7 = vsel %vm625_vm2, %v2034_v44, %v4783_v51  ;;  %v2231_v51 = vsel %vm976_vm7, %v4794_v20, %v4876_v26  ;;  %v2094_v20 = vsel %vm625_vm2, %v4900_v60, %v4805_v59 }
 0xb35   : > { %3505 = vmatpush3.bf16.msra.mxu0 %v2083_v7 }
 0xb36   : > { %3506 = vmatprep.subr.bf16.mxu0 %v2092_v38 }
 0xb37   : > { %v2175_v45 = vpop.permute.xlu1 %2174 }
 0xb38   : > { %v2222_v9 = vsel %vm976_vm7, %v2175_v45, %v2177_v31 }
 0xb39   : > { %3507 = vmatpush3.bf16.msra.mxu0 %v2084_v46  ;;  %3527 = vmatpush3.bf16.msra.mxu1 %v2222_v9 }
 0xb3a   : > { %3528 = vmatprep.subr.bf16.mxu1 %v2231_v51 }
 0xb3b   : > { %v2074_v23 = vpop.permute.xlu1 %2073 }
 0xb3c   : > { %v2093_v16 = vsel %vm625_vm2, %v2074_v23, %v4890_v19 }
 0xb3d   : > { %3508 = vmatprep.subr.bf16.mxu0 %v2093_v16  ;;  %3529 = vmatpush3.bf16.msra.mxu1 %v2223_v49 }
 0xb3e   : > { %3530 = vmatprep.subr.bf16.mxu1 %v4908_v57 }
 0xb3f   : > { %v2042_v39 = vpop.permute.xlu1 %2041 }
 0xb40   : > { %v2085_v50 = vsel %vm625_vm2, %v2042_v39, %v4896_v58  ;;  %v3372_v58 = vcombine.low %v4850_v36, %v4850_v36 }
 0xb41   : > { %3509 = vmatpush3.bf16.msra.mxu0 %v2085_v50 }
 0xb42   : > { %3510 = vmatprep.subr.bf16.mxu0 %v2094_v20 }
 0xb43   : > { %v2183_v12 = vpop.permute.xlu1 %2182 }
 0xb44   : > { %v2224_v26 = vsel %vm976_vm7, %v2183_v12, %v2185_v54 }
 0xb45   : > { %3511 = vmatpush3.bf16.msra.mxu0 %v2086_v43  ;;  %3531 = vmatpush3.bf16.msra.mxu1 %v2224_v26  ;;  %v2374_v43 = vld [vmem:[%s5480_s15] sm:$0xff] }
 0xb46   : > { %3532 = vmatprep.subr.bf16.mxu1 %v2217_v13  ;;  %3630 = vmatprep.subr.mxu0 %v4450_v14 }
 0xb47   : > { %v2189_v19 = vpop.permute.xlu1 %2188 }
 0xb48   : > { %v2225_v59 = vsel %vm976_vm7, %v2187_v0, %v2189_v19  ;;  %2144 = vmatmul.mubr.bf16.vlgmr.msra.gmra.mrb[12].mxu0 %v3370_v6 }
 0xb49   : > { %3533 = vmatpush3.bf16.msra.mxu1 %v2225_v59  ;;  %3632 = vmatprep.mubr.msk.f32.mxu0 %vm3765_vm8, %v4450_v14 }
 0xb4a   : > { %3635 = vmatprep.subr.mxu1 %v4450_v14 }
 0xb4c   : > { %2281 = vmatmul.mubr.bf16.vlgmr.msra.gmra.mrb[12].mxu1 %v3372_v58 }
 0xb4d   : > { %3637 = vmatprep.mubr.msk.f32.mxu1 %vm3765_vm8, %v4450_v14 }
 0xb58   : > { %v2292_v62 = vpop.permute.xlu1 %2291 }
 0xb5c   : > { %v5035_v14 = vpop.permute.xlu1 %2514 }
 0xb60   : > { %v5039_v63 = vpop.permute.xlu1 %2600 }
 0xb64   : > { %v2519_v29 = vpop.permute.xlu1 %2518 }
 0xb68   : > { %v5041_v32 = vpop.permute.xlu1 %2520 }
 0xb69   : > { %v2523_v48 = vsel %vm658_vm0, %v2519_v29, %v5041_v32 }
 0xb6c   : > { %v2603_v2 = vpop.permute.xlu1 %2602 }
 0xb70   : > { %v5043_v24 = vpop.permute.xlu1 %2524 }
 0xb74   : > { %v5045_v56 = vpop.permute.xlu1 %2610 }
 0xb78   : > { %v5047_v30 = vpop.permute.xlu1 %2484 }
 0xb7c   : > { %v5049_v41 = vpop.permute.xlu1 %2570 }
 0xb80   : > { %v5051_v34 = vpop.permute.xlu1 %2530 }
 0xb84   : > { %v2615_v28 = vpop.permute.xlu1 %2614 }
 0xb88   : > { %v2491_v4 = vpop.permute.xlu1 %2490 }
 0xb8c   : > { %v2575_v5 = vpop.permute.xlu1 %2574 }
 0xb90   : > { %v5065_v44 = vpop.permute.xlu1 %2620 }
 0xb94   : > { %v5071_v45 = vpop.permute.xlu1 %2580 }
 0xb98   : > { %v5083_v23 = vpop.permute.xlu1 %2540 }
 0xb9c   : > { %v5086_v16 = vpop.permute.xlu1 %2624 }
 0xc1b   : > { %v3512_v35 = vpop.f32.mrb[12].mxu0 }
 0xc1c   : > { %v3513_v60 = vpop.f32.mrb[13].mxu0 }
 0xc1d   : > { %v3514_v21 = vadd.f32 %v3513_v60, %v3512_v35  ;;  %v3515_v22 = vpop.f32.mrb[14].mxu0 }
 0xc1e   : > { %v3516_v57 = vpop.f32.mrb[15].mxu0 }
 0xc1f   : > { %v3534_v52 = vpop.f32.mrb[12].mxu1 }
 0xc20   : > { %v3535_v61 = vpop.f32.mrb[13].mxu1 }
 0xc21   : > { %v3536_v25 = vadd.f32 %v3535_v61, %v3534_v52  ;;  %v3537_v53 = vpop.f32.mrb[14].mxu1 }
 0xc22   : > { %v3538_v36 = vpop.f32.mrb[15].mxu1 }
 0xc23   : > { %v2283_v27 = vadd.f32 %v3536_v25, %v3514_v21 }
 0xc25   : > { %v5000_v11 = vadd.f32 %v2292_v62, %v2283_v27 }
 0xc27   : > { %v2295_v55 = vmax.f32 %v5000_v11, 0.0 }
 0xc29   : > { %2296 = vadd.xlane.f32.xlu0 %v2295_v55 }
 0xc3f   : > { %2604 = vrot.lane.b32.xlu0 %v4454_v15, %s3756_s29 }
 0xc43   : > { %2528 = vrot.lane.b32.xlu0 %v4454_v15, %s3757_s21 }
 0xc47   : > { %2612 = vrot.lane.b32.xlu0 %v4872_v10, %s3757_s21 }
 0xc4b   : > { %2488 = vrot.lane.b32.xlu0 %v4454_v15, %s3758_s22 }
 0xc4f   : > { %2572 = vrot.lane.b32.xlu0 %v4872_v10, %s3758_s22 }
 0xc53   : > { %2534 = vrot.lane.b32.xlu0 %v4454_v15, %s3759_s2 }
 0xc57   : > { %2494 = vrot.lane.b32.xlu0 %v4454_v15, %s3760_s23 }
 0xc5b   : > { %2538 = vrot.lane.b32.xlu0 %v4454_v15, %s3759_s2 }
 0xc5f   : > { %2622 = vrot.lane.b32.xlu0 %v4872_v10, %s3759_s2 }
 0xc63   : > { %2498 = vrot.lane.b32.xlu0 %v4454_v15, %s3760_s23 }
 0xc67   : > { %2582 = vrot.lane.b32.xlu0 %v4872_v10, %s3760_s23 }
 0xc6b   : > { %2504 = vrot.lane.b32.xlu0 %v4454_v15, %s5497_s1 }
 0xc6f   : > { %2634 = vrot.lane.b32.xlu0 %v4454_v15, %s5496_s20 }
 0xc73   : > { %2510 = vrot.lane.b32.xlu0 %v4872_v10, %s5497_s1 }
 0xc77   : > { %2594 = vrot.lane.b32.xlu0 %v4454_v15, %s5497_s1 }
 0xc7b   : > { %2817 = vrot.lane.b32.xlu0 %v4454_v15, %s3763_s26 }
 0xcb6   : > { %v2297_v42 = vpop.xlane.xlu0 %2296 }
 0xcb7   : > { %v2298_v40 = vmul.f32 0.0078125, %v2297_v42 }
 0xcb9   : > { %3631 = vmatpush3.msra.mxu0 %v2298_v40 }
 0xcba   : > { %3633 = vmatmul.mubr.msk.f32.vlgmr.msra.gmra.mrb[16].mxu0 %vm1060_vm9, %v2299_v18  ;;  %v2605_v33 = vpop.permute.xlu0 %2604 }
 0xcbb   : > { %v2607_v3 = vsel %vm658_vm0, %v2603_v2, %v2605_v33 }
 0xcbc   : > { %2690 = vrot.lane.b32.xlu0 %v2607_v3, %s3758_s22 }
 0xcbe   : > { %v2529_v37 = vpop.permute.xlu0 %2528 }
 0xcbf   : > { %v2533_v38 = vsel %vm669_vm1, %v2529_v37, %v5051_v34 }
 0xcc0   : > { %2853 = vrot.lane.b32.xlu0 %v2523_v48, %s3763_s26 }
 0xcc2   : > { %v2613_v47 = vpop.permute.xlu0 %2612 }
 0xcc3   : > { %v2617_v31 = vsel %vm669_vm1, %v2613_v47, %v2615_v28 }
 0xcc4   : > { %2821 = vrot.lane.b32.xlu0 %v4454_v15, %s3763_s26 }
 0xcc6   : > { %v2489_v8 = vpop.permute.xlu0 %2488 }
 0xcc7   : > { %v2493_v51 = vsel %vm625_vm2, %v2489_v8, %v2491_v4 }
 0xcc8   : > { %2698 = vrot.lane.b32.xlu0 %v2617_v31, %s3758_s22 }
 0xcca   : > { %v2573_v7 = vpop.permute.xlu0 %2572 }
 0xccb   : > { %v5076_v9 = vsel %vm625_vm2, %v2573_v7, %v2575_v5 }
 0xccc   : > { %2861 = vrot.lane.b32.xlu0 %v2533_v38, %s3763_s26 }
 0xcce   : > { %v5073_v46 = vpop.permute.xlu0 %2534 }
 0xcd0   : > { %2666 = vrot.lane.b32.xlu0 %v5076_v9, %s3758_s22 }
 0xcd2   : > { %v5080_v0 = vpop.permute.xlu0 %2494 }
 0xcd4   : > { %2829 = vrot.lane.b32.xlu0 %v2493_v51, %s3763_s26 }
 0xcd6   : > { %v2539_v49 = vpop.permute.xlu0 %2538 }
 0xcd7   : > { %v2543_v57 = vsel %vm680_vm3, %v2539_v49, %v5083_v23 }
 0xcda   : > { %v2623_v54 = vpop.permute.xlu0 %2622 }
 0xcdb   : > { %v2627_v39 = vsel %vm680_vm3, %v2623_v54, %v5086_v16 }
 0xcdc   : > { %2706 = vrot.lane.b32.xlu0 %v2627_v39, %s3758_s22 }
 0xcde   : > { %v2499_v52 = vpop.permute.xlu0 %2498 }
 0xd8d   : > { %v2369_v50 = vpop.f32.mrb[16].mxu0 }
 0xd8e   : > { %v2373_v20 = vmax.f32 %v2369_v50, 0.0  ;;  %v3634_v12 = vpop.f32.mrb[17].mxu0 }
 0xd90   : > { %3636 = vmatpush3.msk.msra.mxu1 %vm1140_vm10, %v2373_v20 }
 0xd91   : > { %3638 = vmatmul.mubr.msk.f32.vlgmr.msra.gmra.mrb[16].mxu1 %vm1136_vm11, %v2374_v43 }
 0xe64   : > { %v2447_v26 = vpop.f32.mrb[16].mxu1 }
 0xe65   : > { %v3377_v6 = vmul.f32 -1.442695, %v2447_v26  ;;  %v3639_v13 = vpop.f32.mrb[17].mxu1 }
 0xe67   : > { %3722 = vpow2.f32 %v3377_v6 }
 0xe71   : > { %v3723_v19 = vpop.eup %3722 }
 0xe72   : > { %v2454_v59 = vadd.f32 1.0, %v3723_v19 }
 0xe74   : > { %3724 = vrcp.f32 %v2454_v59 }
 0xe7e   : > { %v3725_v58 = vpop.eup %3724 }
 0xe7f   : > { %2459 = vperm.xlu1 %3689, %v3725_v58  }
 0xe83   : > { %2590 = vrot.lane.b32.xlu1 %v4454_v15, %s5497_s1 }
 0xe87   : > { %2632 = vrot.lane.b32.xlu1 %v4872_v10, %s5496_s20 }
 0xe8b   : > { %2508 = vrot.lane.b32.xlu1 %v4454_v15, %s5497_s1  ;;  %v2501_v15 = vpop.permute.xlu1 %2500 }
 0xe8c   : > { %v2503_v27 = vsel %vm636_vm4, %v2499_v52, %v2501_v15 }
 0xe8f   : > { %2592 = vrot.lane.b32.xlu1 %v4872_v10, %s5497_s1 }
 0xe93   : > { %2546 = vrot.lane.b32.xlu1 %v4872_v10, %s5496_s20 }
 0xe97   : > { %2688 = vrot.lane.b32.xlu1 %v5039_v63, %s3758_s22 }
 0xe9b   : > { %2692 = vrot.lane.b32.xlu1 %v2605_v33, %s3758_s22 }
 0xe9f   : > { %2855 = vrot.lane.b32.xlu1 %v5041_v32, %s3763_s26 }
 0xea3   : > { %2823 = vrot.lane.b32.xlu1 %v4872_v10, %s3763_s26  ;;  %v2585_v10 = vpop.permute.xlu1 %2584 }
 0xea7   : > { %2696 = vrot.lane.b32.xlu1 %v5045_v56, %s3758_s22  ;;  %v5126_v35 = vpop.permute.xlu1 %2630 }
 0xeab   : > { %2664 = vrot.lane.b32.xlu1 %v5049_v41, %s3758_s22 }
 0xeaf   : > { %2700 = vrot.lane.b32.xlu1 %v2615_v28, %s3758_s22 }
 0xeb3   : > { %2863 = vrot.lane.b32.xlu1 %v5051_v34, %s3763_s26 }
 0xeb7   : > { %2668 = vrot.lane.b32.xlu1 %v2575_v5, %s3758_s22 }
 0xebb   : > { %2831 = vrot.lane.b32.xlu1 %v2491_v4, %s3763_s26 }
 0xebf   : > { %2704 = vrot.lane.b32.xlu1 %v5065_v44, %s3758_s22 }
 0xec3   : > { %2672 = vrot.lane.b32.xlu1 %v5071_v45, %s3758_s22 }
 0xefe   : > { %v2460_v60 = vpop.permute.xlu1 %2459 }
 0xeff   : > { %v5130_v21 = vmul.f32 %v2460_v60, %v2295_v55 }
 0xf01   : > { %v2560_v22 = vpack.c.bf16 %v4699_v17, %v5130_v21  ;;  %v2583_v17 = vpop.permute.xlu0 %2582 }
 0xf02   : > { %v5144_v61 = vpop.permute.xlu1 %2590  ;;  %v2587_v25 = vsel %vm636_vm4, %v2583_v17, %v2585_v10 }
 0xf03   : > { %2568 = vrot.lane.b32.xlu0 %v2560_v22, %s3758_s22  ;;  %2516 = vrot.lane.b32.xlu1 %v2560_v22, %s3756_s29 }
 0xf05   : > { %v5151_v53 = vpop.permute.xlu0 %2504 }
 0xf06   : > { %v2633_v36 = vpop.permute.xlu1 %2632 }
 0xf07   : > { %2618 = vrot.lane.b32.xlu0 %v2560_v22, %s3759_s2  ;;  %2598 = vrot.lane.b32.xlu1 %v2560_v22, %s3756_s29 }
 0xf09   : > { %v2635_v62 = vpop.permute.xlu0 %2634 }
 0xf0a   : > { %v2509_v11 = vpop.permute.xlu1 %2508  ;;  %v2637_v42 = vsel %vm772_vm5, %v2633_v36, %v2635_v62 }
 0xf0b   : > { %2869 = vrot.lane.b32.xlu0 %v2543_v57, %s3763_s26  ;;  %2526 = vrot.lane.b32.xlu1 %v2560_v22, %s3757_s21 }
 0xf0d   : > { %v5161_v29 = vpop.permute.xlu0 %2510 }
 0xf0e   : > { %v2593_v55 = vpop.permute.xlu1 %2592  ;;  %v2513_v52 = vsel %vm647_vm6, %v2509_v11, %v5161_v29  ;;  %v2957_v11 = vld [vmem:[%s5473_s8 + $0x8] sm:$0xff] }
 0xf0f   : > { %2578 = vrot.lane.b32.xlu0 %v2560_v22, %s3760_s23  ;;  %2608 = vrot.lane.b32.xlu1 %v2560_v22, %s3757_s21 }
 0xf11   : > { %v2595_v32 = vpop.permute.xlu0 %2594 }
 0xf12   : > { %v2547_v2 = vpop.permute.xlu1 %2546  ;;  %v2597_v12 = vsel %vm647_vm6, %v2593_v55, %v2595_v32 }
 0xf13   : > { %2628 = vrot.lane.b32.xlu0 %v2560_v22, %s5496_s20  ;;  %2486 = vrot.lane.b32.xlu1 %v2560_v22, %s3758_s22 }
 0xf15   : > { %v5182_v18 = vpop.permute.xlu0 %2817 }
 0xf16   : > { %v5169_v34 = vpop.permute.xlu1 %2688 }
 0xf17   : > { %2674 = vrot.lane.b32.xlu0 %v2587_v25, %s3758_s22  ;;  %2536 = vrot.lane.b32.xlu1 %v2560_v22, %s3759_s2 }
 0xf19   : > { %v5186_v3 = vpop.permute.xlu0 %2690 }
 0xf1a   : > { %v5173_v28 = vpop.permute.xlu1 %2692 }
 0xf1b   : > { %2837 = vrot.lane.b32.xlu0 %v2503_v27, %s3763_s26  ;;  %2496 = vrot.lane.b32.xlu1 %v2560_v22, %s3760_s23 }
 0xf1d   : > { %v5190_v37 = vpop.permute.xlu0 %2853 }
 0xf1e   : > { %v5179_v40 = vpop.permute.xlu1 %2855 }
 0xf1f   : > { %2716 = vrot.lane.b32.xlu0 %v2635_v62, %s3758_s22  ;;  %2708 = vrot.lane.b32.xlu1 %v5086_v16, %s3758_s22 }
 0xf21   : > { %v5194_v5 = vpop.permute.xlu0 %2821 }
 0xf22   : > { %v5184_v33 = vpop.permute.xlu1 %2823 }
 0xf23   : > { %2588 = vrot.lane.b32.xlu0 %v2560_v22, %s5497_s1  ;;  %2506 = vrot.lane.b32.xlu1 %v2560_v22, %s5497_s1  ;;  %s3666_s1 = smul.u32 56, %s5499_s28 }
 0xf25   : > { %v5198_v8 = vpop.permute.xlu0 %2698  ;;  %s585_s0 = scalar_lea.vmem %s5483_s18, %s3666_s1 }
 0xf26   : > { %v5188_v4 = vpop.permute.xlu1 %2696 }
 0xf27   : > { %2544 = vrot.lane.b32.xlu0 %v2560_v22, %s5496_s20  ;;  %2871 = vrot.lane.b32.xlu1 %v5083_v23, %s3763_s26 }
 0xf29   : > { %v5202_v7 = vpop.permute.xlu0 %2861 }
 0xf2a   : > { %v5192_v48 = vpop.permute.xlu1 %2664 }
 0xf2b   : > { %2676 = vrot.lane.b32.xlu1 %v2585_v10, %s3758_s22  ;;  %2684 = vrot.lane.b32.xlu0 %v2595_v32, %s3758_s22 }
 0xf2d   : > { %v5206_v51 = vpop.permute.xlu0 %2666 }
 0xf2e   : > { %v5196_v47 = vpop.permute.xlu1 %2700 }
 0xf2f   : > { %2839 = vrot.lane.b32.xlu1 %v2501_v15, %s3763_s26 }
 0xf31   : > { %v5212_v16 = vpop.permute.xlu0 %2829 }
 0xf32   : > { %v5200_v31 = vpop.permute.xlu1 %2863 }
 0xf33   : > { %2712 = vrot.lane.b32.xlu1 %v5126_v35, %s3758_s22 }
 0xf35   : > { %v2707_v54 = vpop.permute.xlu0 %2706 }
 0xf36   : > { %v5204_v38 = vpop.permute.xlu1 %2668 }
 0xf37   : > { %2680 = vrot.lane.b32.xlu1 %v5144_v61, %s3758_s22 }
 0xf3a   : > { %v5208_v23 = vpop.permute.xlu1 %2831 }
 0xf3b   : > { %2714 = vrot.lane.b32.xlu1 %v2637_v42, %s3758_s22  ;;  %v2958_v42 = vld [vmem:[%s5473_s8 + $0x10] sm:$0xff] }
 0xf3e   : > { %v5210_v49 = vpop.permute.xlu1 %2704 }
 0xf3f   : > { %2819 = vrot.lane.b32.xlu1 %v2560_v22, %s3763_s26 }
 0xf42   : > { %v5214_v39 = vpop.permute.xlu1 %2672 }
 0xf75   : > { %v2569_v50 = vpop.permute.xlu0 %2568  ;;  %v2517_v20 = vpop.permute.xlu1 %2516 }
 0xf76   : > { %2851 = vrot.lane.b32.xlu1 %v2517_v20, %s3763_s26 }
 0xf79   : > { %v2619_v43 = vpop.permute.xlu0 %2618  ;;  %v2599_v26 = vpop.permute.xlu1 %2598 }
 0xf7a   : > { %2682 = vrot.lane.b32.xlu1 %v2597_v12, %s3758_s22  ;;  %v2606_v32 = vsel %vm658_vm0, %v2599_v26, %v5039_v63  ;;  %v2576_v12 = vsel %vm625_vm2, %v2569_v50, %v5049_v41 }
 0xf7d   : > { %v5219_v6 = vpop.permute.xlu0 %2869  ;;  %v2527_v13 = vpop.permute.xlu1 %2526 }
 0xf7e   : > { %2859 = vrot.lane.b32.xlu1 %v2527_v13, %s3763_s26  ;;  %v2532_v63 = vsel %vm669_vm1, %v5043_v24, %v2527_v13 }
 0xf81   : > { %v2579_v19 = vpop.permute.xlu0 %2578  ;;  %v2609_v59 = vpop.permute.xlu1 %2608 }
 0xf82   : > { %v2586_v41 = vsel %vm636_vm4, %v2579_v19, %v5071_v45  ;;  %v3707_v45 = vld [vmem:[%s5469_s4 + $0x4] ss:$16 sps:$4 sm:$0xff]  }
 0xf83   : > { %2939 = vmatprep.mubr.bf16.mxu1 %v3707_v45  ;;  %v3702_v45 = vld [vmem:[%s5469_s4 + $0x8] ss:$16 sps:$4 sm:$0xff]  }
 0xf85   : > { %v2629_v58 = vpop.permute.xlu0 %2628  ;;  %v2487_v15 = vpop.permute.xlu1 %2486 }
 0xf86   : > { %2827 = vrot.lane.b32.xlu1 %v2487_v15, %s3763_s26  ;;  %v2636_v50 = vsel %vm772_vm5, %v2629_v58, %v5126_v35  ;;  %v2956_v35 = vld [vmem:[%s5473_s8] sm:$0xff] }
 0xf89   : > { %v5223_v10 = vpop.permute.xlu0 %2674  ;;  %v2537_v60 = vpop.permute.xlu1 %2536 }
 0xf8a   : > { %2867 = vrot.lane.b32.xlu1 %v2537_v60, %s3763_s26  ;;  %v2542_v24 = vsel %vm680_vm3, %v5073_v46, %v2537_v60 }
 0xf8d   : > { %v5226_v22 = vpop.permute.xlu0 %2837  ;;  %v2497_v57 = vpop.permute.xlu1 %2496 }
 0xf8e   : > { %2835 = vrot.lane.b32.xlu1 %v2497_v57, %s3763_s26 }
 0xf91   : > { %v5231_v17 = vpop.permute.xlu0 %2716  ;;  %v2709_v25 = vpop.permute.xlu1 %2708 }
 0xf92   : > { %2845 = vrot.lane.b32.xlu1 %v2513_v52, %s3763_s26  ;;  %v5235_v36 = vsel %vm625_vm2, %v2707_v54, %v2709_v25  ;;  %v2522_v54 = vsel %vm658_vm0, %v5035_v14, %v2517_v20  ;;  %v2492_v14 = vsel %vm625_vm2, %v5047_v30, %v2487_v15  ;;  %v2502_v30 = vsel %vm636_vm4, %v5080_v0, %v2497_v57  ;;  %v2959_v20 = vld [vmem:[%s5473_s8 + $0x18] sm:$0xf] }
 0xf93   : > { %v2725_v52 = vsel %vm625_vm2, %v5186_v3, %v5173_v28  ;;  %v2878_v3 = vsel %vm976_vm7, %v5194_v5, %v5184_v33  ;;  %v2719_v33 = vsel %vm625_vm2, %v5206_v51, %v5204_v38  ;;  %vm3098_vm0 = vcmask 1046528  }
 0xf95   : > { %v2589_v27 = vpop.permute.xlu0 %2588  ;;  %v2507_v62 = vpop.permute.xlu1 %2506 }
 0xf96   : > { %2843 = vrot.lane.b32.xlu1 %v2507_v62, %s3763_s26  ;;  %v2596_v46 = vsel %vm647_vm6, %v2589_v27, %v5144_v61  ;;  %v2512_v0 = vsel %vm647_vm6, %v5151_v53, %v2507_v62 }
 0xf99   : > { %v2545_v55 = vpop.permute.xlu0 %2544  ;;  %v5299_v61 = vpop.permute.xlu1 %2871 }
 0xf9a   : > { %2873 = vrot.lane.b32.xlu0 %v2545_v55, %s3763_s26  ;;  %2875 = vrot.lane.b32.xlu1 %v2547_v2, %s3763_s26  ;;  %v2616_v2 = vsel %vm669_vm1, %v2609_v59, %v5045_v56  ;;  %v2626_v56 = vsel %vm680_vm3, %v2619_v43, %v5065_v44  ;;  %v3704_v44 = vld [vmem:[%s5469_s4 + $0xc] ss:$16 sps:$4 sm:$0xff]   ;;  %vm1230_vm1 = vcmask 7168  }
 0xf9b   : > { %2780 = vmatprep.mubr.bf16.mxu0 %v3704_v44 }
 0xf9d   : > { %v2677_v43 = vpop.permute.xlu1 %2676  ;;  %v5309_v19 = vpop.permute.xlu0 %2684 }
 0xf9e   : > { %2686 = vrot.lane.b32.xlu0 %v2606_v32, %s3758_s22  ;;  %2967 = vperm.xlu1 %3689, %v2957_v11  }
 0xfa1   : > { %v5301_v26 = vpop.permute.xlu1 %2839 }
 0xfa2   : > { %2849 = vrot.lane.b32.xlu0 %v2522_v54, %s3763_s26  ;;  %2972 = vperm.xlu1 %3689, %v2958_v42  }
 0xfa5   : > { %v5303_v53 = vpop.permute.xlu1 %2712 }
 0xfa6   : > { %2694 = vrot.lane.b32.xlu0 %v2616_v2, %s3758_s22 }
 0xfa9   : > { %v5305_v13 = vpop.permute.xlu1 %2680 }
 0xfaa   : > { %2857 = vrot.lane.b32.xlu0 %v2532_v63, %s3763_s26 }
 0xfae   : > { %2662 = vrot.lane.b32.xlu0 %v2576_v12, %s3758_s22 }
 0xfb2   : > { %2825 = vrot.lane.b32.xlu0 %v2492_v14, %s3763_s26 }
 0xfb6   : > { %2702 = vrot.lane.b32.xlu0 %v2626_v56, %s3758_s22  ;;  %v2890_v56 = vsel %vm976_vm7, %v5219_v6, %v5299_v61  ;;  %v3711_v61 = vld [vmem:[%s5469_s4 + $0x24] ss:$16 sps:$4 sm:$0x3f]  }
 0xfba   : > { %2865 = vrot.lane.b32.xlu0 %v2542_v24, %s3763_s26 }
 0xfbe   : > { %2670 = vrot.lane.b32.xlu0 %v2586_v41, %s3758_s22 }
 0xfc2   : > { %2833 = vrot.lane.b32.xlu0 %v2502_v30, %s3763_s26 }
 0xfc6   : > { %2710 = vrot.lane.b32.xlu0 %v2636_v50, %s3758_s22 }
 0xfca   : > { %2678 = vrot.lane.b32.xlu0 %v2596_v46, %s3758_s22  ;;  %s3399_s22 = sshll.u32 %s5499_s28, 5 }
 0xfcb   : > { %s580_s20 = scalar_lea.vmem %s5482_s17, %s3399_s22 }
 0xfce   : > { %2841 = vrot.lane.b32.xlu0 %v2512_v0, %s3763_s26  ;;  %v3708_v0 = vld [vmem:[%s5469_s4 + $0x2c] ss:$16 sps:$4 sm:$0x3f]  }
 0xfd2   : > { %2847 = vrot.lane.b32.xlu0 %v5161_v29, %s3763_s26  ;;  %v5307_v29 = vpop.permute.xlu1 %2714 }
 0xfd3   : > { %v2731_v6 = vsel %vm625_vm2, %v5307_v29, %v5231_v17 }
 0xfd6   : > { %2962 = vperm.xlu0 %3688, %v2956_v35   ;;  %v2820_v59 = vpop.permute.xlu1 %2819 }
 0xfd7   : > { %v2877_v62 = vsel %vm976_vm7, %v5182_v18, %v2820_v59 }
 0xfda   : > { %2977 = vperm.xlu0 %3688, %v2959_v20   ;;  %v3705_v20 = vld [vmem:[%s5469_s4] ss:$16 sps:$4 sm:$0xff]  }
 0xfe8   : > { %v2852_v15 = vpop.permute.xlu1 %2851 }
 0xfec   : > { %v5321_v55 = vpop.permute.xlu1 %2682 }
 0xff0   : > { %v2860_v18 = vpop.permute.xlu1 %2859 }
0x100c   : > { %v5311_v58 = vpop.permute.xlu0 %2873 }
0x1010   : > { %v2687_v60 = vpop.permute.xlu0 %2686 }
0x1011   : > { %v2724_v57 = vsel %vm625_vm2, %v2687_v60, %v5169_v34  ;;  %v2886_v34 = vsel %vm976_vm7, %v5190_v37, %v5179_v40  ;;  %v2828_v37 = vpop.permute.xlu1 %2827 }
0x1012   : > { %3544 = vmatprep.subr.bf16.mxu0 %v2724_v57 }
0x1013   : > { %3545 = vmatpush3.bf16.msra.mxu0 %v2576_v12 }
0x1014   : > { %3546 = vmatprep.subr.bf16.mxu0 %v2725_v52  ;;  %v2850_v25 = vpop.permute.xlu0 %2849 }
0x1015   : > { %v2885_v27 = vsel %vm976_vm7, %v2850_v25, %v2852_v15  ;;  %v2868_v63 = vpop.permute.xlu1 %2867 }
0x1016   : > { %3572 = vmatprep.subr.bf16.mxu1 %v2885_v27 }
0x1017   : > { %3547 = vmatpush3.bf16.msra.mxu0 %v5076_v9  ;;  %3573 = vmatpush3.bf16.msra.mxu1 %v2877_v62 }
0x1018   : > { %v2695_v11 = vpop.permute.xlu0 %2694  ;;  %3574 = vmatprep.subr.bf16.mxu1 %v2886_v34 }
0x1019   : > { %v2726_v28 = vsel %vm625_vm2, %v2695_v11, %v5188_v4  ;;  %v2727_v4 = vsel %vm625_vm2, %v5198_v8, %v5196_v47  ;;  %v2880_v47 = vsel %vm976_vm7, %v5212_v16, %v5208_v23  ;;  %v2836_v12 = vpop.permute.xlu1 %2835  ;;  %v2721_v23 = vsel %vm625_vm2, %v5223_v10, %v2677_v43  ;;  %v3710_v43 = vld [vmem:[%s5469_s4 + $0x28] ss:$16 sps:$4 sm:$0x3f]  }
0x101a   : > { %3548 = vmatprep.subr.bf16.mxu0 %v2726_v28 }
0x101b   : > { %3575 = vmatpush3.bf16.msra.mxu1 %v2878_v3 }
0x101c   : > { %v2858_v32 = vpop.permute.xlu0 %2857 }
0x101d   : > { %v2887_v9 = vsel %vm976_vm7, %v2858_v32, %v2860_v18  ;;  %v2846_v16 = vpop.permute.xlu1 %2845 }
0x101e   : > { %3576 = vmatprep.subr.bf16.mxu1 %v2887_v9 }
0x1020   : > { %v2663_v42 = vpop.permute.xlu0 %2662 }
0x1021   : > { %v2718_v40 = vsel %vm625_vm2, %v2663_v42, %v5192_v48  ;;  %v2888_v48 = vsel %vm976_vm7, %v5202_v7, %v5200_v31  ;;  %v2844_v10 = vpop.permute.xlu1 %2843 }
0x1022   : > { %3549 = vmatpush3.bf16.msra.mxu0 %v2718_v40 }
0x1023   : > { %3550 = vmatprep.subr.bf16.mxu0 %v2727_v4 }
0x1024   : > { %v2826_v54 = vpop.permute.xlu0 %2825 }
0x1025   : > { %v2879_v5 = vsel %vm976_vm7, %v2826_v54, %v2828_v37  ;;  %v2876_v46 = vpop.permute.xlu1 %2875 }
0x1026   : > { %3551 = vmatpush3.bf16.msra.mxu0 %v2719_v33  ;;  %3577 = vmatpush3.bf16.msra.mxu1 %v2879_v5 }
0x1027   : > { %3578 = vmatprep.subr.bf16.mxu1 %v2888_v48 }
0x1028   : > { %v2703_v2 = vpop.permute.xlu0 %2702 }
0x1029   : > { %v2728_v8 = vsel %vm625_vm2, %v2703_v2, %v5210_v49  ;;  %v2968_v42 = vpop.permute.xlu1 %2967 }
0x102a   : > { %3552 = vmatprep.subr.bf16.mxu0 %v2728_v8  ;;  %3579 = vmatpush3.bf16.msra.mxu1 %v2880_v47 }
0x102c   : > { %v2866_v38 = vpop.permute.xlu0 %2865 }
0x102d   : > { %v2889_v51 = vsel %vm976_vm7, %v2866_v38, %v2868_v63 }
0x102e   : > { %3580 = vmatprep.subr.bf16.mxu1 %v2889_v51  ;;  %v2973_v51 = vpop.permute.xlu1 %2972 }
0x1030   : > { %v2671_v14 = vpop.permute.xlu0 %2670 }
0x1031   : > { %v2720_v31 = vsel %vm625_vm2, %v2671_v14, %v5214_v39  ;;  %v2882_v39 = vsel %vm976_vm7, %v5226_v22, %v5301_v26  ;;  %v2723_v22 = vsel %vm625_vm2, %v5321_v55, %v5309_v19  ;;  %v3713_v26 = vld [vmem:[%s5469_s4 + $0x20] ss:$16 sps:$4 sm:$0x3f]  }
0x1032   : > { %3553 = vmatpush3.bf16.msra.mxu0 %v2720_v31 }
0x1033   : > { %3554 = vmatprep.subr.bf16.mxu0 %v5235_v36 }
0x1034   : > { %v2834_v7 = vpop.permute.xlu0 %2833 }
0x1035   : > { %v2881_v49 = vsel %vm976_vm7, %v2834_v7, %v2836_v12 }
0x1036   : > { %3555 = vmatpush3.bf16.msra.mxu0 %v2721_v23  ;;  %3581 = vmatpush3.bf16.msra.mxu1 %v2881_v49 }
0x1037   : > { %3582 = vmatprep.subr.bf16.mxu1 %v2890_v56 }
0x1038   : > { %v2711_v24 = vpop.permute.xlu0 %2710 }
0x1039   : > { %v2730_v36 = vsel %vm625_vm2, %v2711_v24, %v5303_v53  ;;  %v3743_v53 = vld [vmem:[#allocation2] sm:$0xff] }
0x103a   : > { %3556 = vmatprep.subr.bf16.mxu0 %v2730_v36  ;;  %3583 = vmatpush3.bf16.msra.mxu1 %v2882_v39 }
0x103b   : > { %3584 = vmatprep.subr.bf16.mxu1 %v5311_v58 }
0x103c   : > { %v2679_v41 = vpop.permute.xlu0 %2678 }
0x103d   : > { %v2722_v30 = vsel %vm625_vm2, %v2679_v41, %v5305_v13  ;;  %vm3255_vm2 = vcmask 3072  }
0x103e   : > { %3557 = vmatpush3.bf16.msra.mxu0 %v2722_v30 }
0x103f   : > { %3558 = vmatprep.subr.bf16.mxu0 %v2731_v6 }
0x1040   : > { %v2842_v44 = vpop.permute.xlu0 %2841 }
0x1041   : > { %v2883_v50 = vsel %vm976_vm7, %v2842_v44, %v2844_v10 }
0x1042   : > { %3559 = vmatpush3.bf16.msra.mxu0 %v2723_v22  ;;  %3585 = vmatpush3.bf16.msra.mxu1 %v2883_v50  ;;  %v3002_v50 = vld [vmem:[%s5477_s12] sm:$0x7f] }
0x1043   : > { %3586 = vmatprep.subr.bf16.mxu1 %v2876_v46  ;;  %3659 = vmatprep.subr.bf16.mxu0 %v3755_v1 }
0x1044   : > { %v2848_v17 = vpop.permute.xlu0 %2847 }
0x1045   : > { %v2884_v35 = vsel %vm976_vm7, %v2846_v16, %v2848_v17  ;;  %2781 = vmatmul.mubr.bf16.vlgmr.msra.gmra.mrb[20].mxu0 %v3702_v45  ;;  %v3081_v45 = vld [vmem:[%s5481_s16] sm:$0xff]  ;;  %v3082_v17 = vld [vmem:[%s5481_s16 + $0x8] sm:$0xff] }
0x1046   : > { %3587 = vmatpush3.bf16.msra.mxu1 %v2884_v35  ;;  %2788 = vmatprep.mubr.bf16.mxu0 %v3708_v0  ;;  %v3083_v35 = vld [vmem:[%s5481_s16 + $0x10] sm:$0xff] }
0x1049   : > { %2940 = vmatmul.mubr.bf16.vlgmr.msra.gmra.mrb[20].mxu1 %v3705_v20  ;;  %v3084_v20 = vld [vmem:[%s5481_s16 + $0x18] sm:$0xf] }
0x104a   : > { %2947 = vmatprep.mubr.bf16.mxu1 %v3711_v61 }
0x104d   : > { %2789 = vmatmul.mubr.bf16.gmra.mrb[24].mxu0 %v3710_v43 }
0x104e   : > { %3648 = vmatprep.mubr.msk.f32.mxu0 %vm3765_vm8, %v3743_v53 }
0x1051   : > { %2948 = vmatmul.mubr.bf16.gmra.mrb[24].mxu1 %v3713_v26 }
0x1052   : > { %3653 = vmatprep.mubr.msk.f32.mxu1 %vm976_vm7, %v3081_v45 }
0x1055   : > { %v2963_v11 = vpop.permute.xlu0 %2962 }
0x1059   : > { %v2978_v31 = vpop.permute.xlu0 %2977 }
0x1118   : > { %v3560_v13 = vpop.f32.mrb[20].mxu0 }
0x1119   : > { %v3561_v29 = vpop.f32.mrb[21].mxu0 }
0x111a   : > { %v3562_v19 = vadd.f32 %v3561_v29, %v3560_v13  ;;  %v3563_v59 = vpop.f32.mrb[22].mxu0 }
0x111b   : > { %v3564_v58 = vpop.f32.mrb[23].mxu0 }
0x111c   : > { %v3565_v15 = vadd.f32 %v3564_v58, %v3563_v59  ;;  %v3588_v60 = vpop.f32.mrb[20].mxu1 }
0x111d   : > { %v3589_v57 = vpop.f32.mrb[21].mxu1 }
0x111e   : > { %v3590_v52 = vadd.f32 %v3589_v57, %v3588_v60  ;;  %v3591_v25 = vpop.f32.mrb[22].mxu1 }
0x111f   : > { %v3592_v27 = vpop.f32.mrb[23].mxu1 }
0x1120   : > { %v2942_v62 = vadd.f32 %v3590_v52, %v3562_v19  ;;  %v3593_v55 = vadd.f32 %v3592_v27, %v3591_v25  ;;  %v3566_v34 = vpop.f32.mrb[24].mxu0 }
0x1121   : > { %v3567_v28 = vpop.f32.mrb[25].mxu0 }
0x1122   : > { %v2945_v3 = vadd.f32 %v3593_v55, %v3565_v15  ;;  %v3568_v18 = vadd.f32 %v3567_v28, %v3566_v34  ;;  %v3569_v32 = vpop.f32.mrb[26].mxu0  ;;  %v5395_v9 = vadd.f32 %v2963_v11, %v2942_v62 }
0x1123   : > { %v3570_v40 = vpop.f32.mrb[27].mxu0 }
0x1124   : > { %v3571_v4 = vadd.f32 %v3570_v40, %v3569_v32  ;;  %v3594_v37 = vpop.f32.mrb[24].mxu1  ;;  %v2984_v54 = vmax.f32 %v5395_v9, 0.0  ;;  %v5398_v33 = vadd.f32 %v2968_v42, %v2945_v3  ;;  %v3744_v3 = vld [vmem:[#allocation2 + $0x38] sm:$0xff] }
0x1125   : > { %v3595_v5 = vpop.f32.mrb[25].mxu1 }
0x1126   : > { %v3596_v48 = vadd.f32 %v3595_v5, %v3594_v37  ;;  %v3597_v2 = vpop.f32.mrb[26].mxu1  ;;  %2988 = vadd.xlane.f32.xlu0 %v2984_v54  ;;  %v2985_v47 = vmax.f32 %v5398_v33, 0.0 }
0x1127   : > { %v3598_v8 = vpop.f32.mrb[27].mxu1 }
0x1128   : > { %v2950_v63 = vadd.f32 %v3596_v48, %v3568_v18  ;;  %v3599_v38 = vadd.f32 %v3598_v8, %v3597_v2  ;;  %2990 = vadd.xlane.f32.xlu1 %v2985_v47  ;;  %v3745_v18 = vld [vmem:[#allocation2 + $0x20] sm:$0xff] }
0x112a   : > { %v2953_v12 = vadd.f32 %v3599_v38, %v3571_v4  ;;  %v5405_v14 = vadd.f32 %v2973_v51, %v2950_v63 }
0x112c   : > { %v2986_v7 = vmax.f32 %v5405_v14, 0.0  ;;  %v5408_v23 = vadd.f32 %v2978_v31, %v2953_v12 }
0x112e   : > { %2992 = vadd.xlane.f32.xlu0 %v2986_v7  ;;  %v2987_v49 = vmax.f32 %v5408_v23, 0.0 }
0x1130   : > { %v2995_v16 = vsel %vm2994_vm12, %v2987_v49, 0.0 }
0x1132   : > { %2996 = vadd.xlane.f32.xlu0 %v2995_v16 }
0x11b3   : > { %v2989_v56 = vpop.xlane.xlu0 %2988 }
0x11b4   : > { %v2998_v39 = vmul.f32 0.0078125, %v2989_v56 }
0x11b5   : > { %v2991_v24 = vpop.xlane.xlu1 %2990 }
0x11b6   : > { %v2999_v36 = vmul.f32 0.0078125, %v2991_v24 }
0x11b8   : > { %v3660_v10 = vpack.c.bf16 %v2999_v36, %v2998_v39 }
0x11ba   : > { %3661 = vmatpush3.bf16.msra.mxu0 %v3660_v10 }
0x11bb   : > { %v2993_v41 = vpop.xlane.xlu0 %2992  ;;  %3662 = vmatprep.subr.bf16.mxu0 %v3755_v1 }
0x11bc   : > { %v3000_v6 = vmul.f32 0.0078125, %v2993_v41 }
0x11bf   : > { %v2997_v30 = vpop.xlane.xlu0 %2996 }
0x11c0   : > { %v3001_v44 = vmul.f32 0.0078125, %v2997_v30 }
0x11c2   : > { %v3663_v22 = vpack.c.bf16 %v3001_v44, %v3000_v6 }
0x11c4   : > { %3665 = vmatpush3.bf16.msk.msra.mxu0 %vm3664_vm14, %v3663_v22 }
0x11c7   : > { %3649 = vmatmul.mubr.msk.f32.vlgmr.msra.gmra.mrb[18].mxu0 %vm3003_vm15, %v3002_v50 }
0x129a   : > { %v3076_v1 = vpop.f32.mrb[18].mxu0 }
0x129b   : > { %v3080_v46 = vmax.f32 %v3076_v1, 0.0  ;;  %v3650_v0 = vpop.f32.mrb[19].mxu0 }
0x129d   : > { %3651 = vmatprep.subr.msk.mxu1 %vm3098_vm0, %v3080_v46 }
0x129e   : > { %3652 = vmatpush3.msk.msra.mxu1 %vm3098_vm0, %v3080_v46 }
0x129f   : > { %3654 = vmatmul.mubr.msk.f32.vlgmr.msra.gmra.mrb[18].mxu1 %vm976_vm7, %v3082_v17 }
0x12a0   : > { %3656 = vmatprep.mubr.msk.f32.mxu1 %vm976_vm7, %v3083_v35 }
0x12a3   : > { %3657 = vmatmul.mubr.msk.f32.gmra.mrb[28].mxu1 %vm976_vm7, %v3084_v20 }
0x1372   : > { %v3655_v61 = vpop.f32.mrb[18].mxu1 }
0x1373   : > { %v3394_v43 = vmul.f32 -1.442695, %v3655_v61  ;;  %v3168_v26 = vpop.f32.mrb[19].mxu1 }
0x1374   : > { %v3393_v53 = vmul.f32 -1.442695, %v3168_v26 }
0x1375   : > { %3726 = vpow2.f32 %v3394_v43 }
0x1376   : > { %3728 = vpow2.f32 %v3393_v53  ;;  %v3658_v13 = vpop.f32.mrb[28].mxu1 }
0x1377   : > { %v3396_v29 = vmul.f32 -1.442695, %v3658_v13  ;;  %v3178_v19 = vpop.f32.mrb[29].mxu1 }
0x1378   : > { %v3395_v59 = vmul.f32 -1.442695, %v3178_v19 }
0x1379   : > { %3730 = vpow2.f32 %v3396_v29 }
0x137a   : > { %3732 = vpow2.f32 %v3395_v59 }
0x137f   : > { %v3727_v58 = vpop.eup %3726 }
0x1380   : > { %v3729_v15 = vpop.eup %3728  ;;  %v3200_v52 = vadd.f32 1.0, %v3727_v58 }
0x1381   : > { %v3199_v60 = vadd.f32 1.0, %v3729_v15 }
0x1383   : > { %v3731_v57 = vpop.eup %3730  ;;  %3734 = vrcp.f32 %v3199_v60 }
0x1384   : > { %v3733_v25 = vpop.eup %3732  ;;  %v3202_v27 = vadd.f32 1.0, %v3731_v57 }
0x1385   : > { %v3201_v62 = vadd.f32 1.0, %v3733_v25 }
0x1386   : > { %3736 = vrcp.f32 %v3202_v27 }
0x1387   : > { %3738 = vrcp.f32 %v3200_v52 }
0x1388   : > { %3740 = vrcp.f32 %v3201_v62 }
0x138d   : > { %v3735_v55 = vpop.eup %3734 }
0x138e   : > { %3213 = vperm.xlu1 %3689, %v3735_v55  }
0x1390   : > { %v3737_v34 = vpop.eup %3736 }
0x1391   : > { %v3739_v11 = vpop.eup %3738  ;;  %3228 = vperm.xlu0 %3688, %v3737_v34  }
0x1392   : > { %3218 = vperm.xlu1 %3689, %v3739_v11   ;;  %v3741_v28 = vpop.eup %3740 }
0x1396   : > { %3223 = vperm.xlu1 %3689, %v3741_v28  }
0x13b0   : > { %1227 = vadd.xlane.f32.xlu0 %v3744_v3 }
0x13b4   : > { %2464 = vadd.xlane.f32.xlu0 %v5130_v21 }
0x13ba   : > { %1846 = vadd.xlane.f32.xlu1 %v3745_v18 }
0x140d   : > { %v3214_v32 = vpop.permute.xlu1 %3213 }
0x140e   : > { %v3231_v42 = vmul.f32 %v3214_v32, %v2984_v54 }
0x1410   : > { %3235 = vst [vmem:[%s580_s20] sm:$0xff] %v3231_v42  ;;  %v3229_v40 = vpop.permute.xlu0 %3228 }
0x1411   : > { %v3234_v4 = vmul.f32 %v3229_v40, %v2987_v49  ;;  %v3219_v37 = vpop.permute.xlu1 %3218 }
0x1412   : > { %v3232_v21 = vmul.f32 %v3219_v37, %v2985_v47 }
0x1413   : > { %3238 = vst [vmem:[%s580_s20 + $0x18] sm:$0xf] %v3234_v4  ;;  %v3245_v9 = vsel %vm2994_vm12, %v3234_v4, 0.0 }
0x1414   : > { %3236 = vst [vmem:[%s580_s20 + $0x8] sm:$0xff] %v3232_v21  ;;  %3241 = vadd.xlane.f32.xlu0 %v3232_v21 }
0x1415   : > { %v3224_v5 = vpop.permute.xlu1 %3223 }
0x1416   : > { %v3233_v48 = vmul.f32 %v3224_v5, %v2986_v7 }
0x1418   : > { %3237 = vst [vmem:[%s580_s20 + $0x10] sm:$0xff] %v3233_v48  ;;  %3239 = vadd.xlane.f32.xlu0 %v3231_v42  ;;  %3243 = vadd.xlane.f32.xlu1 %v3233_v48 }
0x141c   : > { %3246 = vadd.xlane.f32.xlu0 %v3245_v9 }
0x143d   : > { %v1228_v54 = vpop.xlane.xlu0 %1227 }
0x143e   : > { %v1229_v33 = vmul.f32 0.0078125, %v1228_v54 }
0x1440   : > { %1231 = vst.msk [vmem:[%s585_s0] sm:$0xff] %vm1230_vm1, %v1229_v33 }
0x1441   : > { %v2465_v2 = vpop.xlane.xlu0 %2464 }
0x1442   : > { %v2466_v47 = vmul.f32 0.0078125, %v2465_v2 }
0x1444   : > { %2467 = vst.msk [vmem:[%s585_s0 + $0x10] sm:$0xff] %vm1230_vm1, %v2466_v47 }
0x1447   : > { %v1847_v8 = vpop.xlane.xlu1 %1846 }
0x1448   : > { %v1848_v63 = vmul.f32 0.0078125, %v1847_v8 }
0x144a   : > { %1849 = vst.msk [vmem:[%s585_s0 + $0x8] sm:$0xff] %vm1230_vm1, %v1848_v63 }
0x14a1   : > { %v3242_v38 = vpop.xlane.xlu0 %3241 }
0x14a2   : > { %v3249_v51 = vmul.f32 0.0078125, %v3242_v38 }
0x14a4   : > { %3253 = vst.msk [vmem:[%s585_s0 + $0x20] sm:$0xff] %vm1230_vm1, %v3249_v51 }
0x14a5   : > { %v3240_v12 = vpop.xlane.xlu0 %3239  ;;  %v3244_v14 = vpop.xlane.xlu1 %3243 }
0x14a6   : > { %v3248_v31 = vmul.f32 0.0078125, %v3240_v12  ;;  %v3250_v7 = vmul.f32 0.0078125, %v3244_v14 }
0x14a8   : > { %3252 = vst.msk [vmem:[%s585_s0 + $0x18] sm:$0xff] %vm1230_vm1, %v3248_v31  ;;  %3254 = vst.msk [vmem:[%s585_s0 + $0x28] sm:$0xff] %vm1230_vm1, %v3250_v7 }
0x14a9   : > { %v3247_v23 = vpop.xlane.xlu0 %3246 }
0x14aa   : > { %v3251_v49 = vmul.f32 0.0078125, %v3247_v23 }
0x14ac   : > { %3256 = vst.msk [vmem:[%s585_s0 + $0x30] sm:$0xf] %vm3255_vm2, %v3251_v49 }
0x14ad PF: > { %s29_s27 = sadd.s32 1, %s3752_s27  }
0x14ae   : > { %p26_p4 = scmp.ge.s32.totalorder %s29_s27, 4  }
0x14b0   :  { %28 = sbr.rel (!%p26_p4) target bundleno = 4 (0x4), region = 130 }

</bundles_post_ra>
